<compile_context>
chip_gen: v6e
topology: v6e:2x2x1
jax: 0.10.0
libtpu: 0.0.40
codegen_flags: <defaults>
</compile_context>

<pallas_src>
import functools

import jax
import jax.numpy as jnp
from jax import lax
from jax.experimental import pallas as pl
from jax.experimental.pallas import tpu as pltpu  # noqa: F401  (kept for CompilerParams use if needed)


# ------------------------------- fused kernel --------------------------------
def spam_fused_kernel(S, B, H, V, SLOT,
                      ids_ref, embw0_ref, whh0_ref, bhn0_ref,
                      wih1_ref, whh1_ref, b1_ref, bhn1_ref,
                      fcw_ref, fcb_ref, out_ref):
    """Embedding + 2-layer GRU (skewed schedule) + Linear, single invocation (no grid).

    Packing invariants (established once at param-load time):
      * Gate g of every weight matrix lives in its own 128-lane slot:
        lanes [g*SLOT, g*SLOT+H); all other lanes are zero.
      * embw0 = emb @ Wih0_packed + [b_ir0+b_hr0 | b_iz0+b_hz0 | b_in0], so a one-hot
        row times embw0 yields layer-0's full input-side pre-activation (bias included).
      * b_hn stays separate (it must sit inside r * (W_hn h + b_hn)).
    """
    GP = 3 * SLOT

    # ---- embedding "gather" as a one-hot matmul (fully vectorized, no dynamic index) ----
    ids = ids_ref[...]                                                   # (S, B, 1) int32
    onehot = jnp.where(
        ids == lax.broadcasted_iota(jnp.int32, (S, B, V), 2), 1.0, 0.0
    ).astype(jnp.float32)                                                # (S, B, V)

    embw0 = embw0_ref[...]   # (V, GP)  emb @ Wih0 (packed) + combined layer-0 biases
    whh0 = whh0_ref[...]     # (H, GP)
    wih1 = wih1_ref[...]     # (H, GP)
    whh1 = whh1_ref[...]     # (H, GP)

    # Hoist every bias broadcast out of the unrolled time loop.
    bhn0 = jnp.broadcast_to(bhn0_ref[...], (B, H))
    bhn1 = jnp.broadcast_to(bhn1_ref[...], (B, H))
    b1 = jnp.broadcast_to(b1_ref[...], (B, GP))

    def cell(gx, gh, bhn, h):
        # gx/gh: (B, GP); gate slots start at lanes 0 / SLOT / 2*SLOT -> vreg-aligned slices.
        r = jax.nn.sigmoid(gx[:, 0:H] + gh[:, 0:H])
        z = jax.nn.sigmoid(gx[:, SLOT:SLOT + H] + gh[:, SLOT:SLOT + H])
        n = jnp.tanh(gx[:, 2 * SLOT:2 * SLOT + H]
                     + r * (gh[:, 2 * SLOT:2 * SLOT + H] + bhn))
        return (1.0 - z) * n + z * h

    def step0(t, h0):        # layer-0 GRU step t (input = embedding of token t)
        gx = jnp.dot(onehot[t], embw0, preferred_element_type=jnp.float32)
        gh = jnp.dot(h0, whh0, preferred_element_type=jnp.float32)
        return cell(gx, gh, bhn0, h0)

    def step1(x, h1):        # layer-1 GRU step (input = a layer-0 hidden state)
        gx = jnp.dot(x, wih1, preferred_element_type=jnp.float32) + b1
        gh = jnp.dot(h1, whh1, preferred_element_type=jnp.float32)
        return cell(gx, gh, bhn1, h1)

    h0 = jnp.zeros((B, H), jnp.float32)
    h1 = jnp.zeros((B, H), jnp.float32)

    # Skewed (software-pipelined) 2-layer schedule, fully unrolled (S is static & tiny):
    # iteration t issues layer-0 step t and layer-1 step t-1, which are independent, so the
    # LLO scheduler can overlap their MXU push/pop and EUP sigmoid/tanh latency chains.
    h0 = step0(0, h0)
    for t in range(1, S):
        h0_next = step0(t, h0)      # layer-0 step t        (depends on h0_{t-1})
        h1 = step1(h0, h1)          # layer-1 step t-1      (depends on h0_{t-1}, h1_{t-2})
        h0 = h0_next
    h1 = step1(h0, h1)              # layer-1 step S-1

    # Dropout(p=0.2) is identity at inference; final Linear fused in the epilogue.
    out_ref[...] = (
        jnp.dot(h1, fcw_ref[...], preferred_element_type=jnp.float32) + fcb_ref[...]
    )


# --------------------------- one-time weight packing --------------------------
def pack_params(params):
    """Run ONCE at param-load time (outside the jitted per-call path)."""
    emb = params["embedding"].astype(jnp.float32)            # (V, H)
    V, H = emb.shape
    SLOT = ((H + 127) // 128) * 128                          # one 128-lane slot per gate
    GP = 3 * SLOT
    assert len(params["gru"]) == 2, "fused kernel is written for num_layers=2"
    (w_ih0, w_hh0, b_ih0, b_hh0), (w_ih1, w_hh1, b_ih1, b_hh1) = params["gru"]

    def slot_w(w3h):         # PyTorch (3H, Din) -> (Din, GP), transposed, per-gate slots
        din = w3h.shape[1]
        out = jnp.zeros((din, GP), jnp.float32)
        for g in range(3):
            out = out.at[:, g * SLOT:g * SLOT + H].set(
                w3h[g * H:(g + 1) * H, :].T.astype(jnp.float32))
        return out

    def slot_b(r, z, n):     # (H,) x3 -> (1, GP) matching the slot layout
        out = jnp.zeros((GP,), jnp.float32)
        out = out.at[0:H].set(r.astype(jnp.float32))
        out = out.at[SLOT:SLOT + H].set(z.astype(jnp.float32))
        out = out.at[2 * SLOT:2 * SLOT + H].set(n.astype(jnp.float32))
        return out.reshape(1, GP)

    # Layer 0: fold embedding table AND the r/z/n(input-side) biases into one (V, GP) matrix:
    #   onehot_t @ embw0 == emb[token_t] @ Wih0_packed + b0        (rows of onehot sum to 1)
    b0 = slot_b(b_ih0[0:H] + b_hh0[0:H],
                b_ih0[H:2 * H] + b_hh0[H:2 * H],
                b_ih0[2 * H:3 * H])
    embw0 = jnp.dot(emb, slot_w(w_ih0), precision=lax.Precision.HIGHEST) + b0

    return {
        "embw0": embw0,                                               # (V, GP)
        "whh0": slot_w(w_hh0),                                        # (H, GP)
        "bhn0": b_hh0[2 * H:3 * H].astype(jnp.float32).reshape(1, H),
        "wih1": slot_w(w_ih1),                                        # (H, GP)
        "whh1": slot_w(w_hh1),                                        # (H, GP)
        "b1": slot_b(b_ih1[0:H] + b_hh1[0:H],
                     b_ih1[H:2 * H] + b_hh1[H:2 * H],
                     b_ih1[2 * H:3 * H]),                             # (1, GP)
        "bhn1": b_hh1[2 * H:3 * H].astype(jnp.float32).reshape(1, H),
        "fcw": params["fc_w"].T.astype(jnp.float32),                  # (H, OUT)
        "fcb": params["fc_b"].astype(jnp.float32).reshape(1, -1),     # (1, OUT)
    }


# ------------------------------ per-call forward ------------------------------
@jax.jit
def spam_model_forward(packed, token_ids):
    """Per-call path: one trivial expand_dims + a single fused pallas_call."""
    S, B = token_ids.shape
    V, GP = packed["embw0"].shape
    H = packed["whh0"].shape[0]
    SLOT = GP // 3
    OUT = packed["fcw"].shape[1]

    ids3 = token_ids.astype(jnp.int32)[:, :, None]           # (S, B, 1)
    kernel = functools.partial(spam_fused_kernel, S, B, H, V, SLOT)
    return pl.pallas_call(
        kernel,
        out_shape=jax.ShapeDtypeStruct((B, OUT), jnp.float32),
        # Whole-array VMEM blocks, no grid: total live data < 300 KB, far below the
        # scoped-VMEM default on v5e/v6e/v7x, so no compiler_params needed.
    )(ids3, packed["embw0"], packed["whh0"], packed["bhn0"],
      packed["wih1"], packed["whh1"], packed["b1"], packed["bhn1"],
      packed["fcw"], packed["fcb"])


# ----------------------------------- params -----------------------------------
def init_params(key, vocab_size, embedding_dim, num_layers=2):
    H = embedding_dim
    params = {}
    k_emb, k_fc_w, k_fc_b, *k_gru = jax.random.split(key, 3 + 4 * num_layers)
    params["embedding"] = jax.random.normal(k_emb, (vocab_size, H), jnp.float32)
    bound = 1.0 / jnp.sqrt(H)
    params["gru"] = []
    for l in range(num_layers):
        din = H  # input_size == hidden_size for every layer here
        kw = k_gru[4 * l: 4 * l + 4]
        w_ih = jax.random.uniform(kw[0], (3 * H, din), jnp.float32, -bound, bound)
        w_hh = jax.random.uniform(kw[1], (3 * H, H), jnp.float32, -bound, bound)
        b_ih = jax.random.uniform(kw[2], (3 * H,), jnp.float32, -bound, bound)
        b_hh = jax.random.uniform(kw[3], (3 * H,), jnp.float32, -bound, bound)
        params["gru"].append((w_ih, w_hh, b_ih, b_hh))
    fc_bound = 1.0 / jnp.sqrt(H)
    params["fc_w"] = jax.random.uniform(k_fc_w, (2, H), jnp.float32, -fc_bound, fc_bound)
    params["fc_b"] = jax.random.uniform(k_fc_b, (2,), jnp.float32, -fc_bound, fc_bound)
    return params


# ----------------------------- pure-JAX reference -----------------------------
def gru_layer_ref(x_seq, w_ih, w_hh, b_ih, b_hh):
    S, B, _ = x_seq.shape
    H = w_hh.shape[1]
    wih = w_ih.reshape(3, H, -1)
    whh = w_hh.reshape(3, H, H)
    bih = b_ih.reshape(3, H)
    bhh = b_hh.reshape(3, H)
    h = jnp.zeros((B, H), jnp.float32)
    outs = []
    for t in range(S):
        x_t = x_seq[t]
        r = jax.nn.sigmoid(x_t @ wih[0].T + bih[0] + h @ whh[0].T + bhh[0])
        z = jax.nn.sigmoid(x_t @ wih[1].T + bih[1] + h @ whh[1].T + bhh[1])
        n = jnp.tanh(x_t @ wih[2].T + bih[2] + r * (h @ whh[2].T + bhh[2]))
        h = (1.0 - z) * n + z * h
        outs.append(h)
    return jnp.stack(outs, 0), h


def spam_model_ref(params, token_ids):
    x = params["embedding"][token_ids]
    hn = None
    for (w_ih, w_hh, b_ih, b_hh) in params["gru"]:
        x, hn = gru_layer_ref(x, w_ih, w_hh, b_ih, b_hh)
    return hn @ params["fc_w"].T + params["fc_b"]


# ------------------------------------ main ------------------------------------
if __name__ == "__main__":
    VOCAB = 50
    EMB = 32      # embedding_dim == hidden_size
    LAYERS = 2
    SEQ = 8
    BATCH = 2

    key = jax.random.PRNGKey(0)
    k_params, k_ids = jax.random.split(key)
    params = init_params(k_params, VOCAB, EMB, LAYERS)
    token_ids = jax.random.randint(k_ids, (SEQ, BATCH), 0, VOCAB, dtype=jnp.int32)

    packed = pack_params(params)   # one-time packing, OUTSIDE the jitted per-call path

    logits = spam_model_forward(packed, token_ids)
    logits = jax.block_until_ready(logits)

    ref = spam_model_ref(params, token_ids)
    assert logits.shape == (BATCH, 2)
    assert jnp.allclose(logits, ref, atol=1e-4, rtol=1e-4), "mismatch vs reference"

    print("KERNEL_OK")
</pallas_src>

<mosaic_0001>
module attributes {stable_mosaic.version = 11 : i64} {
  func.func @spam_fused_kernel(%arg0: memref<8x2x1xi32, #tpu.memory_space<vmem>>, %arg1: memref<50x384xf32, #tpu.memory_space<vmem>>, %arg2: memref<32x384xf32, #tpu.memory_space<vmem>>, %arg3: memref<1x32xf32, #tpu.memory_space<vmem>>, %arg4: memref<32x384xf32, #tpu.memory_space<vmem>>, %arg5: memref<32x384xf32, #tpu.memory_space<vmem>>, %arg6: memref<1x384xf32, #tpu.memory_space<vmem>>, %arg7: memref<1x32xf32, #tpu.memory_space<vmem>>, %arg8: memref<32x2xf32, #tpu.memory_space<vmem>>, %arg9: memref<1x2xf32, #tpu.memory_space<vmem>>, %arg10: memref<2x2xf32, #tpu.memory_space<vmem>>) attributes {dimension_semantics = [], scalar_prefetch = 0 : i64, scratch_operands = 0 : i64, tpu.core_type = #tpu.core_type<tc>} {
    %c0 = arith.constant 0 : index
    %c0_0 = arith.constant 0 : index
    %c0_1 = arith.constant 0 : index
    %0 = vector.load %arg0[%c0, %c0_0, %c0_1] : memref<8x2x1xi32, #tpu.memory_space<vmem>>, vector<8x2x1xi32>
    %1 = tpu.iota {dimensions = array<i32: 2>} : vector<8x2x50xi32>
    %2 = vector.broadcast %0 : vector<8x2x1xi32> to vector<8x2x50xi32>
    %3 = arith.cmpi eq, %2, %1 : vector<8x2x50xi32>
    %cst = arith.constant 1.000000e+00 : f32
    %cst_2 = arith.constant 0.000000e+00 : f32
    %4 = vector.broadcast %cst : f32 to vector<8x2x50xf32>
    %5 = vector.broadcast %cst_2 : f32 to vector<8x2x50xf32>
    %6 = arith.select %3, %4, %5 : vector<8x2x50xi1>, vector<8x2x50xf32>
    %c0_3 = arith.constant 0 : index
    %c0_4 = arith.constant 0 : index
    %7 = vector.load %arg1[%c0_3, %c0_4] : memref<50x384xf32, #tpu.memory_space<vmem>>, vector<50x384xf32>
    %c0_5 = arith.constant 0 : index
    %c0_6 = arith.constant 0 : index
    %8 = vector.load %arg2[%c0_5, %c0_6] : memref<32x384xf32, #tpu.memory_space<vmem>>, vector<32x384xf32>
    %c0_7 = arith.constant 0 : index
    %c0_8 = arith.constant 0 : index
    %9 = vector.load %arg4[%c0_7, %c0_8] : memref<32x384xf32, #tpu.memory_space<vmem>>, vector<32x384xf32>
    %c0_9 = arith.constant 0 : index
    %c0_10 = arith.constant 0 : index
    %10 = vector.load %arg5[%c0_9, %c0_10] : memref<32x384xf32, #tpu.memory_space<vmem>>, vector<32x384xf32>
    %c0_11 = arith.constant 0 : index
    %c0_12 = arith.constant 0 : index
    %11 = vector.load %arg3[%c0_11, %c0_12] : memref<1x32xf32, #tpu.memory_space<vmem>>, vector<1x32xf32>
    %12 = vector.shape_cast %11 : vector<1x32xf32> to vector<1x32xf32>
    %13 = vector.broadcast %12 : vector<1x32xf32> to vector<2x32xf32>
    %c0_13 = arith.constant 0 : index
    %c0_14 = arith.constant 0 : index
    %14 = vector.load %arg7[%c0_13, %c0_14] : memref<1x32xf32, #tpu.memory_space<vmem>>, vector<1x32xf32>
    %15 = vector.shape_cast %14 : vector<1x32xf32> to vector<1x32xf32>
    %16 = vector.broadcast %15 : vector<1x32xf32> to vector<2x32xf32>
    %c0_15 = arith.constant 0 : index
    %c0_16 = arith.constant 0 : index
    %17 = vector.load %arg6[%c0_15, %c0_16] : memref<1x384xf32, #tpu.memory_space<vmem>>, vector<1x384xf32>
    %18 = vector.shape_cast %17 : vector<1x384xf32> to vector<1x384xf32>
    %19 = vector.broadcast %18 : vector<1x384xf32> to vector<2x384xf32>
    %cst_17 = arith.constant 0.000000e+00 : f32
    %20 = vector.broadcast %cst_17 : f32 to vector<2x32xf32>
    %cst_18 = arith.constant 0.000000e+00 : f32
    %21 = vector.broadcast %cst_18 : f32 to vector<2x32xf32>
    %22 = vector.extract_strided_slice %6 {offsets = [0, 0, 0], sizes = [1, 2, 50], strides = [1, 1, 1]} : vector<8x2x50xf32> to vector<1x2x50xf32>
    %23 = vector.shape_cast %22 : vector<1x2x50xf32> to vector<2x50xf32>
    %cst_19 = arith.constant dense<0.000000e+00> : vector<2x384xf32>
    %24 = tpu.matmul %23, %7, %cst_19 {dimension_numbers = #tpu.dot_dimension_numbers<[1], [0], [0], [1], [0, 0, 1, 1], [], []>} : vector<2x50xf32>, vector<50x384xf32>, vector<2x384xf32> -> vector<2x384xf32>
    %cst_20 = arith.constant dense<0.000000e+00> : vector<2x384xf32>
    %25 = tpu.matmul %20, %8, %cst_20 {dimension_numbers = #tpu.dot_dimension_numbers<[1], [0], [0], [1], [0, 0, 1, 1], [], []>} : vector<2x32xf32>, vector<32x384xf32>, vector<2x384xf32> -> vector<2x384xf32>
    %26 = vector.extract_strided_slice %24 {offsets = [0, 0], sizes = [2, 32], strides = [1, 1]} : vector<2x384xf32> to vector<2x32xf32>
    %27 = vector.extract_strided_slice %25 {offsets = [0, 0], sizes = [2, 32], strides = [1, 1]} : vector<2x384xf32> to vector<2x32xf32>
    %28 = arith.addf %26, %27 : vector<2x32xf32>
    %29 = arith.negf %28 : vector<2x32xf32>
    %30 = math.exp %29 : vector<2x32xf32>
    %cst_21 = arith.constant 1.000000e+00 : f32
    %31 = vector.broadcast %cst_21 : f32 to vector<2x32xf32>
    %32 = arith.addf %31, %30 : vector<2x32xf32>
    %33 = arith.divf %31, %32 : vector<2x32xf32>
    %34 = vector.extract_strided_slice %24 {offsets = [0, 128], sizes = [2, 32], strides = [1, 1]} : vector<2x384xf32> to vector<2x32xf32>
    %35 = vector.extract_strided_slice %25 {offsets = [0, 128], sizes = [2, 32], strides = [1, 1]} : vector<2x384xf32> to vector<2x32xf32>
    %36 = arith.addf %34, %35 : vector<2x32xf32>
    %37 = arith.negf %36 : vector<2x32xf32>
    %38 = math.exp %37 : vector<2x32xf32>
    %cst_22 = arith.constant 1.000000e+00 : f32
    %39 = vector.broadcast %cst_22 : f32 to vector<2x32xf32>
    %40 = arith.addf %39, %38 : vector<2x32xf32>
    %41 = arith.divf %39, %40 : vector<2x32xf32>
    %42 = vector.extract_strided_slice %24 {offsets = [0, 256], sizes = [2, 32], strides = [1, 1]} : vector<2x384xf32> to vector<2x32xf32>
    %43 = vector.extract_strided_slice %25 {offsets = [0, 256], sizes = [2, 32], strides = [1, 1]} : vector<2x384xf32> to vector<2x32xf32>
    %44 = arith.addf %43, %13 : vector<2x32xf32>
    %45 = arith.mulf %33, %44 : vector<2x32xf32>
    %46 = arith.addf %42, %45 : vector<2x32xf32>
    %47 = math.tanh %46 : vector<2x32xf32>
    %cst_23 = arith.constant 1.000000e+00 : f32
    %48 = vector.broadcast %cst_23 : f32 to vector<2x32xf32>
    %49 = arith.subf %48, %41 : vector<2x32xf32>
    %50 = arith.mulf %49, %47 : vector<2x32xf32>
    %51 = arith.mulf %41, %20 : vector<2x32xf32>
    %52 = arith.addf %50, %51 : vector<2x32xf32>
    %53 = vector.extract_strided_slice %6 {offsets = [1, 0, 0], sizes = [1, 2, 50], strides = [1, 1, 1]} : vector<8x2x50xf32> to vector<1x2x50xf32>
    %54 = vector.shape_cast %53 : vector<1x2x50xf32> to vector<2x50xf32>
    %cst_24 = arith.constant dense<0.000000e+00> : vector<2x384xf32>
    %55 = tpu.matmul %54, %7, %cst_24 {dimension_numbers = #tpu.dot_dimension_numbers<[1], [0], [0], [1], [0, 0, 1, 1], [], []>} : vector<2x50xf32>, vector<50x384xf32>, vector<2x384xf32> -> vector<2x384xf32>
    %cst_25 = arith.constant dense<0.000000e+00> : vector<2x384xf32>
    %56 = tpu.matmul %52, %8, %cst_25 {dimension_numbers = #tpu.dot_dimension_numbers<[1], [0], [0], [1], [0, 0, 1, 1], [], []>} : vector<2x32xf32>, vector<32x384xf32>, vector<2x384xf32> -> vector<2x384xf32>
    %57 = vector.extract_strided_slice %55 {offsets = [0, 0], sizes = [2, 32], strides = [1, 1]} : vector<2x384xf32> to vector<2x32xf32>
    %58 = vector.extract_strided_slice %56 {offsets = [0, 0], sizes = [2, 32], strides = [1, 1]} : vector<2x384xf32> to vector<2x32xf32>
    %59 = arith.addf %57, %58 : vector<2x32xf32>
    %60 = arith.negf %59 : vector<2x32xf32>
    %61 = math.exp %60 : vector<2x32xf32>
    %cst_26 = arith.constant 1.000000e+00 : f32
    %62 = vector.broadcast %cst_26 : f32 to vector<2x32xf32>
    %63 = arith.addf %62, %61 : vector<2x32xf32>
    %64 = arith.divf %62, %63 : vector<2x32xf32>
    %65 = vector.extract_strided_slice %55 {offsets = [0, 128], sizes = [2, 32], strides = [1, 1]} : vector<2x384xf32> to vector<2x32xf32>
    %66 = vector.extract_strided_slice %56 {offsets = [0, 128], sizes = [2, 32], strides = [1, 1]} : vector<2x384xf32> to vector<2x32xf32>
    %67 = arith.addf %65, %66 : vector<2x32xf32>
    %68 = arith.negf %67 : vector<2x32xf32>
    %69 = math.exp %68 : vector<2x32xf32>
    %cst_27 = arith.constant 1.000000e+00 : f32
    %70 = vector.broadcast %cst_27 : f32 to vector<2x32xf32>
    %71 = arith.addf %70, %69 : vector<2x32xf32>
    %72 = arith.divf %70, %71 : vector<2x32xf32>
    %73 = vector.extract_strided_slice %55 {offsets = [0, 256], sizes = [2, 32], strides = [1, 1]} : vector<2x384xf32> to vector<2x32xf32>
    %74 = vector.extract_strided_slice %56 {offsets = [0, 256], sizes = [2, 32], strides = [1, 1]} : vector<2x384xf32> to vector<2x32xf32>
    %75 = arith.addf %74, %13 : vector<2x32xf32>
    %76 = arith.mulf %64, %75 : vector<2x32xf32>
    %77 = arith.addf %73, %76 : vector<2x32xf32>
    %78 = math.tanh %77 : vector<2x32xf32>
    %cst_28 = arith.constant 1.000000e+00 : f32
    %79 = vector.broadcast %cst_28 : f32 to vector<2x32xf32>
    %80 = arith.subf %79, %72 : vector<2x32xf32>
    %81 = arith.mulf %80, %78 : vector<2x32xf32>
    %82 = arith.mulf %72, %52 : vector<2x32xf32>
    %83 = arith.addf %81, %82 : vector<2x32xf32>
    %cst_29 = arith.constant dense<0.000000e+00> : vector<2x384xf32>
    %84 = tpu.matmul %52, %9, %cst_29 {dimension_numbers = #tpu.dot_dimension_numbers<[1], [0], [0], [1], [0, 0, 1, 1], [], []>} : vector<2x32xf32>, vector<32x384xf32>, vector<2x384xf32> -> vector<2x384xf32>
    %85 = arith.addf %84, %19 : vector<2x384xf32>
    %cst_30 = arith.constant dense<0.000000e+00> : vector<2x384xf32>
    %86 = tpu.matmul %21, %10, %cst_30 {dimension_numbers = #tpu.dot_dimension_numbers<[1], [0], [0], [1], [0, 0, 1, 1], [], []>} : vector<2x32xf32>, vector<32x384xf32>, vector<2x384xf32> -> vector<2x384xf32>
    %87 = vector.extract_strided_slice %85 {offsets = [0, 0], sizes = [2, 32], strides = [1, 1]} : vector<2x384xf32> to vector<2x32xf32>
    %88 = vector.extract_strided_slice %86 {offsets = [0, 0], sizes = [2, 32], strides = [1, 1]} : vector<2x384xf32> to vector<2x32xf32>
    %89 = arith.addf %87, %88 : vector<2x32xf32>
    %90 = arith.negf %89 : vector<2x32xf32>
    %91 = math.exp %90 : vector<2x32xf32>
    %cst_31 = arith.constant 1.000000e+00 : f32
    %92 = vector.broadcast %cst_31 : f32 to vector<2x32xf32>
    %93 = arith.addf %92, %91 : vector<2x32xf32>
    %94 = arith.divf %92, %93 : vector<2x32xf32>
    %95 = vector.extract_strided_slice %85 {offsets = [0, 128], sizes = [2, 32], strides = [1, 1]} : vector<2x384xf32> to vector<2x32xf32>
    %96 = vector.extract_strided_slice %86 {offsets = [0, 128], sizes = [2, 32], strides = [1, 1]} : vector<2x384xf32> to vector<2x32xf32>
    %97 = arith.addf %95, %96 : vector<2x32xf32>
    %98 = arith.negf %97 : vector<2x32xf32>
    %99 = math.exp %98 : vector<2x32xf32>
    %cst_32 = arith.constant 1.000000e+00 : f32
    %100 = vector.broadcast %cst_32 : f32 to vector<2x32xf32>
    %101 = arith.addf %100, %99 : vector<2x32xf32>
    %102 = arith.divf %100, %101 : vector<2x32xf32>
    %103 = vector.extract_strided_slice %85 {offsets = [0, 256], sizes = [2, 32], strides = [1, 1]} : vector<2x384xf32> to vector<2x32xf32>
    %104 = vector.extract_strided_slice %86 {offsets = [0, 256], sizes = [2, 32], strides = [1, 1]} : vector<2x384xf32> to vector<2x32xf32>
    %105 = arith.addf %104, %16 : vector<2x32xf32>
    %106 = arith.mulf %94, %105 : vector<2x32xf32>
    %107 = arith.addf %103, %106 : vector<2x32xf32>
    %108 = math.tanh %107 : vector<2x32xf32>
    %cst_33 = arith.constant 1.000000e+00 : f32
    %109 = vector.broadcast %cst_33 : f32 to vector<2x32xf32>
    %110 = arith.subf %109, %102 : vector<2x32xf32>
    %111 = arith.mulf %110, %108 : vector<2x32xf32>
    %112 = arith.mulf %102, %21 : vector<2x32xf32>
    %113 = arith.addf %111, %112 : vector<2x32xf32>
    %114 = vector.extract_strided_slice %6 {offsets = [2, 0, 0], sizes = [1, 2, 50], strides = [1, 1, 1]} : vector<8x2x50xf32> to vector<1x2x50xf32>
    %115 = vector.shape_cast %114 : vector<1x2x50xf32> to vector<2x50xf32>
    %cst_34 = arith.constant dense<0.000000e+00> : vector<2x384xf32>
    %116 = tpu.matmul %115, %7, %cst_34 {dimension_numbers = #tpu.dot_dimension_numbers<[1], [0], [0], [1], [0, 0, 1, 1], [], []>} : vector<2x50xf32>, vector<50x384xf32>, vector<2x384xf32> -> vector<2x384xf32>
    %cst_35 = arith.constant dense<0.000000e+00> : vector<2x384xf32>
    %117 = tpu.matmul %83, %8, %cst_35 {dimension_numbers = #tpu.dot_dimension_numbers<[1], [0], [0], [1], [0, 0, 1, 1], [], []>} : vector<2x32xf32>, vector<32x384xf32>, vector<2x384xf32> -> vector<2x384xf32>
    %118 = vector.extract_strided_slice %116 {offsets = [0, 0], sizes = [2, 32], strides = [1, 1]} : vector<2x384xf32> to vector<2x32xf32>
    %119 = vector.extract_strided_slice %117 {offsets = [0, 0], sizes = [2, 32], strides = [1, 1]} : vector<2x384xf32> to vector<2x32xf32>
    %120 = arith.addf %118, %119 : vector<2x32xf32>
    %121 = arith.negf %120 : vector<2x32xf32>
    %122 = math.exp %121 : vector<2x32xf32>
    %cst_36 = arith.constant 1.000000e+00 : f32
    %123 = vector.broadcast %cst_36 : f32 to vector<2x32xf32>
    %124 = arith.addf %123, %122 : vector<2x32xf32>
    %125 = arith.divf %123, %124 : vector<2x32xf32>
    %126 = vector.extract_strided_slice %116 {offsets = [0, 128], sizes = [2, 32], strides = [1, 1]} : vector<2x384xf32> to vector<2x32xf32>
    %127 = vector.extract_strided_slice %117 {offsets = [0, 128], sizes = [2, 32], strides = [1, 1]} : vector<2x384xf32> to vector<2x32xf32>
    %128 = arith.addf %126, %127 : vector<2x32xf32>
    %129 = arith.negf %128 : vector<2x32xf32>
    %130 = math.exp %129 : vector<2x32xf32>
    %cst_37 = arith.constant 1.000000e+00 : f32
    %131 = vector.broadcast %cst_37 : f32 to vector<2x32xf32>
    %132 = arith.addf %131, %130 : vector<2x32xf32>
    %133 = arith.divf %131, %132 : vector<2x32xf32>
    %134 = vector.extract_strided_slice %116 {offsets = [0, 256], sizes = [2, 32], strides = [1, 1]} : vector<2x384xf32> to vector<2x32xf32>
    %135 = vector.extract_strided_slice %117 {offsets = [0, 256], sizes = [2, 32], strides = [1, 1]} : vector<2x384xf32> to vector<2x32xf32>
    %136 = arith.addf %135, %13 : vector<2x32xf32>
    %137 = arith.mulf %125, %136 : vector<2x32xf32>
    %138 = arith.addf %134, %137 : vector<2x32xf32>
    %139 = math.tanh %138 : vector<2x32xf32>
    %cst_38 = arith.constant 1.000000e+00 : f32
    %140 = vector.broadcast %cst_38 : f32 to vector<2x32xf32>
    %141 = arith.subf %140, %133 : vector<2x32xf32>
    %142 = arith.mulf %141, %139 : vector<2x32xf32>
    %143 = arith.mulf %133, %83 : vector<2x32xf32>
    %144 = arith.addf %142, %143 : vector<2x32xf32>
    %cst_39 = arith.constant dense<0.000000e+00> : vector<2x384xf32>
    %145 = tpu.matmul %83, %9, %cst_39 {dimension_numbers = #tpu.dot_dimension_numbers<[1], [0], [0], [1], [0, 0, 1, 1], [], []>} : vector<2x32xf32>, vector<32x384xf32>, vector<2x384xf32> -> vector<2x384xf32>
    %146 = arith.addf %145, %19 : vector<2x384xf32>
    %cst_40 = arith.constant dense<0.000000e+00> : vector<2x384xf32>
    %147 = tpu.matmul %113, %10, %cst_40 {dimension_numbers = #tpu.dot_dimension_numbers<[1], [0], [0], [1], [0, 0, 1, 1], [], []>} : vector<2x32xf32>, vector<32x384xf32>, vector<2x384xf32> -> vector<2x384xf32>
    %148 = vector.extract_strided_slice %146 {offsets = [0, 0], sizes = [2, 32], strides = [1, 1]} : vector<2x384xf32> to vector<2x32xf32>
    %149 = vector.extract_strided_slice %147 {offsets = [0, 0], sizes = [2, 32], strides = [1, 1]} : vector<2x384xf32> to vector<2x32xf32>
    %150 = arith.addf %148, %149 : vector<2x32xf32>
    %151 = arith.negf %150 : vector<2x32xf32>
    %152 = math.exp %151 : vector<2x32xf32>
    %cst_41 = arith.constant 1.000000e+00 : f32
    %153 = vector.broadcast %cst_41 : f32 to vector<2x32xf32>
    %154 = arith.addf %153, %152 : vector<2x32xf32>
    %155 = arith.divf %153, %154 : vector<2x32xf32>
    %156 = vector.extract_strided_slice %146 {offsets = [0, 128], sizes = [2, 32], strides = [1, 1]} : vector<2x384xf32> to vector<2x32xf32>
    %157 = vector.extract_strided_slice %147 {offsets = [0, 128], sizes = [2, 32], strides = [1, 1]} : vector<2x384xf32> to vector<2x32xf32>
    %158 = arith.addf %156, %157 : vector<2x32xf32>
    %159 = arith.negf %158 : vector<2x32xf32>
    %160 = math.exp %159 : vector<2x32xf32>
    %cst_42 = arith.constant 1.000000e+00 : f32
    %161 = vector.broadcast %cst_42 : f32 to vector<2x32xf32>
    %162 = arith.addf %161, %160 : vector<2x32xf32>
    %163 = arith.divf %161, %162 : vector<2x32xf32>
    %164 = vector.extract_strided_slice %146 {offsets = [0, 256], sizes = [2, 32], strides = [1, 1]} : vector<2x384xf32> to vector<2x32xf32>
    %165 = vector.extract_strided_slice %147 {offsets = [0, 256], sizes = [2, 32], strides = [1, 1]} : vector<2x384xf32> to vector<2x32xf32>
    %166 = arith.addf %165, %16 : vector<2x32xf32>
    %167 = arith.mulf %155, %166 : vector<2x32xf32>
    %168 = arith.addf %164, %167 : vector<2x32xf32>
    %169 = math.tanh %168 : vector<2x32xf32>
    %cst_43 = arith.constant 1.000000e+00 : f32
    %170 = vector.broadcast %cst_43 : f32 to vector<2x32xf32>
    %171 = arith.subf %170, %163 : vector<2x32xf32>
    %172 = arith.mulf %171, %169 : vector<2x32xf32>
    %173 = arith.mulf %163, %113 : vector<2x32xf32>
    %174 = arith.addf %172, %173 : vector<2x32xf32>
    %175 = vector.extract_strided_slice %6 {offsets = [3, 0, 0], sizes = [1, 2, 50], strides = [1, 1, 1]} : vector<8x2x50xf32> to vector<1x2x50xf32>
    %176 = vector.shape_cast %175 : vector<1x2x50xf32> to vector<2x50xf32>
    %cst_44 = arith.constant dense<0.000000e+00> : vector<2x384xf32>
    %177 = tpu.matmul %176, %7, %cst_44 {dimension_numbers = #tpu.dot_dimension_numbers<[1], [0], [0], [1], [0, 0, 1, 1], [], []>} : vector<2x50xf32>, vector<50x384xf32>, vector<2x384xf32> -> vector<2x384xf32>
    %cst_45 = arith.constant dense<0.000000e+00> : vector<2x384xf32>
    %178 = tpu.matmul %144, %8, %cst_45 {dimension_numbers = #tpu.dot_dimension_numbers<[1], [0], [0], [1], [0, 0, 1, 1], [], []>} : vector<2x32xf32>, vector<32x384xf32>, vector<2x384xf32> -> vector<2x384xf32>
    %179 = vector.extract_strided_slice %177 {offsets = [0, 0], sizes = [2, 32], strides = [1, 1]} : vector<2x384xf32> to vector<2x32xf32>
    %180 = vector.extract_strided_slice %178 {offsets = [0, 0], sizes = [2, 32], strides = [1, 1]} : vector<2x384xf32> to vector<2x32xf32>
    %181 = arith.addf %179, %180 : vector<2x32xf32>
    %182 = arith.negf %181 : vector<2x32xf32>
    %183 = math.exp %182 : vector<2x32xf32>
    %cst_46 = arith.constant 1.000000e+00 : f32
    %184 = vector.broadcast %cst_46 : f32 to vector<2x32xf32>
    %185 = arith.addf %184, %183 : vector<2x32xf32>
    %186 = arith.divf %184, %185 : vector<2x32xf32>
    %187 = vector.extract_strided_slice %177 {offsets = [0, 128], sizes = [2, 32], strides = [1, 1]} : vector<2x384xf32> to vector<2x32xf32>
    %188 = vector.extract_strided_slice %178 {offsets = [0, 128], sizes = [2, 32], strides = [1, 1]} : vector<2x384xf32> to vector<2x32xf32>
    %189 = arith.addf %187, %188 : vector<2x32xf32>
    %190 = arith.negf %189 : vector<2x32xf32>
    %191 = math.exp %190 : vector<2x32xf32>
    %cst_47 = arith.constant 1.000000e+00 : f32
    %192 = vector.broadcast %cst_47 : f32 to vector<2x32xf32>
    %193 = arith.addf %192, %191 : vector<2x32xf32>
    %194 = arith.divf %192, %193 : vector<2x32xf32>
    %195 = vector.extract_strided_slice %177 {offsets = [0, 256], sizes = [2, 32], strides = [1, 1]} : vector<2x384xf32> to vector<2x32xf32>
    %196 = vector.extract_strided_slice %178 {offsets = [0, 256], sizes = [2, 32], strides = [1, 1]} : vector<2x384xf32> to vector<2x32xf32>
    %197 = arith.addf %196, %13 : vector<2x32xf32>
    %198 = arith.mulf %186, %197 : vector<2x32xf32>
    %199 = arith.addf %195, %198 : vector<2x32xf32>
    %200 = math.tanh %199 : vector<2x32xf32>
    %cst_48 = arith.constant 1.000000e+00 : f32
    %201 = vector.broadcast %cst_48 : f32 to vector<2x32xf32>
    %202 = arith.subf %201, %194 : vector<2x32xf32>
    %203 = arith.mulf %202, %200 : vector<2x32xf32>
    %204 = arith.mulf %194, %144 : vector<2x32xf32>
    %205 = arith.addf %203, %204 : vector<2x32xf32>
    %cst_49 = arith.constant dense<0.000000e+00> : vector<2x384xf32>
    %206 = tpu.matmul %144, %9, %cst_49 {dimension_numbers = #tpu.dot_dimension_numbers<[1], [0], [0], [1], [0, 0, 1, 1], [], []>} : vector<2x32xf32>, vector<32x384xf32>, vector<2x384xf32> -> vector<2x384xf32>
    %207 = arith.addf %206, %19 : vector<2x384xf32>
    %cst_50 = arith.constant dense<0.000000e+00> : vector<2x384xf32>
    %208 = tpu.matmul %174, %10, %cst_50 {dimension_numbers = #tpu.dot_dimension_numbers<[1], [0], [0], [1], [0, 0, 1, 1], [], []>} : vector<2x32xf32>, vector<32x384xf32>, vector<2x384xf32> -> vector<2x384xf32>
    %209 = vector.extract_strided_slice %207 {offsets = [0, 0], sizes = [2, 32], strides = [1, 1]} : vector<2x384xf32> to vector<2x32xf32>
    %210 = vector.extract_strided_slice %208 {offsets = [0, 0], sizes = [2, 32], strides = [1, 1]} : vector<2x384xf32> to vector<2x32xf32>
    %211 = arith.addf %209, %210 : vector<2x32xf32>
    %212 = arith.negf %211 : vector<2x32xf32>
    %213 = math.exp %212 : vector<2x32xf32>
    %cst_51 = arith.constant 1.000000e+00 : f32
    %214 = vector.broadcast %cst_51 : f32 to vector<2x32xf32>
    %215 = arith.addf %214, %213 : vector<2x32xf32>
    %216 = arith.divf %214, %215 : vector<2x32xf32>
    %217 = vector.extract_strided_slice %207 {offsets = [0, 128], sizes = [2, 32], strides = [1, 1]} : vector<2x384xf32> to vector<2x32xf32>
    %218 = vector.extract_strided_slice %208 {offsets = [0, 128], sizes = [2, 32], strides = [1, 1]} : vector<2x384xf32> to vector<2x32xf32>
    %219 = arith.addf %217, %218 : vector<2x32xf32>
    %220 = arith.negf %219 : vector<2x32xf32>
    %221 = math.exp %220 : vector<2x32xf32>
    %cst_52 = arith.constant 1.000000e+00 : f32
    %222 = vector.broadcast %cst_52 : f32 to vector<2x32xf32>
    %223 = arith.addf %222, %221 : vector<2x32xf32>
    %224 = arith.divf %222, %223 : vector<2x32xf32>
    %225 = vector.extract_strided_slice %207 {offsets = [0, 256], sizes = [2, 32], strides = [1, 1]} : vector<2x384xf32> to vector<2x32xf32>
    %226 = vector.extract_strided_slice %208 {offsets = [0, 256], sizes = [2, 32], strides = [1, 1]} : vector<2x384xf32> to vector<2x32xf32>
    %227 = arith.addf %226, %16 : vector<2x32xf32>
    %228 = arith.mulf %216, %227 : vector<2x32xf32>
    %229 = arith.addf %225, %228 : vector<2x32xf32>
    %230 = math.tanh %229 : vector<2x32xf32>
    %cst_53 = arith.constant 1.000000e+00 : f32
    %231 = vector.broadcast %cst_53 : f32 to vector<2x32xf32>
    %232 = arith.subf %231, %224 : vector<2x32xf32>
    %233 = arith.mulf %232, %230 : vector<2x32xf32>
    %234 = arith.mulf %224, %174 : vector<2x32xf32>
    %235 = arith.addf %233, %234 : vector<2x32xf32>
    %236 = vector.extract_strided_slice %6 {offsets = [4, 0, 0], sizes = [1, 2, 50], strides = [1, 1, 1]} : vector<8x2x50xf32> to vector<1x2x50xf32>
    %237 = vector.shape_cast %236 : vector<1x2x50xf32> to vector<2x50xf32>
    %cst_54 = arith.constant dense<0.000000e+00> : vector<2x384xf32>
    %238 = tpu.matmul %237, %7, %cst_54 {dimension_numbers = #tpu.dot_dimension_numbers<[1], [0], [0], [1], [0, 0, 1, 1], [], []>} : vector<2x50xf32>, vector<50x384xf32>, vector<2x384xf32> -> vector<2x384xf32>
    %cst_55 = arith.constant dense<0.000000e+00> : vector<2x384xf32>
    %239 = tpu.matmul %205, %8, %cst_55 {dimension_numbers = #tpu.dot_dimension_numbers<[1], [0], [0], [1], [0, 0, 1, 1], [], []>} : vector<2x32xf32>, vector<32x384xf32>, vector<2x384xf32> -> vector<2x384xf32>
    %240 = vector.extract_strided_slice %238 {offsets = [0, 0], sizes = [2, 32], strides = [1, 1]} : vector<2x384xf32> to vector<2x32xf32>
    %241 = vector.extract_strided_slice %239 {offsets = [0, 0], sizes = [2, 32], strides = [1, 1]} : vector<2x384xf32> to vector<2x32xf32>
    %242 = arith.addf %240, %241 : vector<2x32xf32>
    %243 = arith.negf %242 : vector<2x32xf32>
    %244 = math.exp %243 : vector<2x32xf32>
    %cst_56 = arith.constant 1.000000e+00 : f32
    %245 = vector.broadcast %cst_56 : f32 to vector<2x32xf32>
    %246 = arith.addf %245, %244 : vector<2x32xf32>
    %247 = arith.divf %245, %246 : vector<2x32xf32>
    %248 = vector.extract_strided_slice %238 {offsets = [0, 128], sizes = [2, 32], strides = [1, 1]} : vector<2x384xf32> to vector<2x32xf32>
    %249 = vector.extract_strided_slice %239 {offsets = [0, 128], sizes = [2, 32], strides = [1, 1]} : vector<2x384xf32> to vector<2x32xf32>
    %250 = arith.addf %248, %249 : vector<2x32xf32>
    %251 = arith.negf %250 : vector<2x32xf32>
    %252 = math.exp %251 : vector<2x32xf32>
    %cst_57 = arith.constant 1.000000e+00 : f32
    %253 = vector.broadcast %cst_57 : f32 to vector<2x32xf32>
    %254 = arith.addf %253, %252 : vector<2x32xf32>
    %255 = arith.divf %253, %254 : vector<2x32xf32>
    %256 = vector.extract_strided_slice %238 {offsets = [0, 256], sizes = [2, 32], strides = [1, 1]} : vector<2x384xf32> to vector<2x32xf32>
    %257 = vector.extract_strided_slice %239 {offsets = [0, 256], sizes = [2, 32], strides = [1, 1]} : vector<2x384xf32> to vector<2x32xf32>
    %258 = arith.addf %257, %13 : vector<2x32xf32>
    %259 = arith.mulf %247, %258 : vector<2x32xf32>
    %260 = arith.addf %256, %259 : vector<2x32xf32>
    %261 = math.tanh %260 : vector<2x32xf32>
    %cst_58 = arith.constant 1.000000e+00 : f32
    %262 = vector.broadcast %cst_58 : f32 to vector<2x32xf32>
    %263 = arith.subf %262, %255 : vector<2x32xf32>
    %264 = arith.mulf %263, %261 : vector<2x32xf32>
    %265 = arith.mulf %255, %205 : vector<2x32xf32>
    %266 = arith.addf %264, %265 : vector<2x32xf32>
    %cst_59 = arith.constant dense<0.000000e+00> : vector<2x384xf32>
    %267 = tpu.matmul %205, %9, %cst_59 {dimension_numbers = #tpu.dot_dimension_numbers<[1], [0], [0], [1], [0, 0, 1, 1], [], []>} : vector<2x32xf32>, vector<32x384xf32>, vector<2x384xf32> -> vector<2x384xf32>
    %268 = arith.addf %267, %19 : vector<2x384xf32>
    %cst_60 = arith.constant dense<0.000000e+00> : vector<2x384xf32>
    %269 = tpu.matmul %235, %10, %cst_60 {dimension_numbers = #tpu.dot_dimension_numbers<[1], [0], [0], [1], [0, 0, 1, 1], [], []>} : vector<2x32xf32>, vector<32x384xf32>, vector<2x384xf32> -> vector<2x384xf32>
    %270 = vector.extract_strided_slice %268 {offsets = [0, 0], sizes = [2, 32], strides = [1, 1]} : vector<2x384xf32> to vector<2x32xf32>
    %271 = vector.extract_strided_slice %269 {offsets = [0, 0], sizes = [2, 32], strides = [1, 1]} : vector<2x384xf32> to vector<2x32xf32>
    %272 = arith.addf %270, %271 : vector<2x32xf32>
    %273 = arith.negf %272 : vector<2x32xf32>
    %274 = math.exp %273 : vector<2x32xf32>
    %cst_61 = arith.constant 1.000000e+00 : f32
    %275 = vector.broadcast %cst_61 : f32 to vector<2x32xf32>
    %276 = arith.addf %275, %274 : vector<2x32xf32>
    %277 = arith.divf %275, %276 : vector<2x32xf32>
    %278 = vector.extract_strided_slice %268 {offsets = [0, 128], sizes = [2, 32], strides = [1, 1]} : vector<2x384xf32> to vector<2x32xf32>
    %279 = vector.extract_strided_slice %269 {offsets = [0, 128], sizes = [2, 32], strides = [1, 1]} : vector<2x384xf32> to vector<2x32xf32>
    %280 = arith.addf %278, %279 : vector<2x32xf32>
    %281 = arith.negf %280 : vector<2x32xf32>
    %282 = math.exp %281 : vector<2x32xf32>
    %cst_62 = arith.constant 1.000000e+00 : f32
    %283 = vector.broadcast %cst_62 : f32 to vector<2x32xf32>
    %284 = arith.addf %283, %282 : vector<2x32xf32>
    %285 = arith.divf %283, %284 : vector<2x32xf32>
    %286 = vector.extract_strided_slice %268 {offsets = [0, 256], sizes = [2, 32], strides = [1, 1]} : vector<2x384xf32> to vector<2x32xf32>
    %287 = vector.extract_strided_slice %269 {offsets = [0, 256], sizes = [2, 32], strides = [1, 1]} : vector<2x384xf32> to vector<2x32xf32>
    %288 = arith.addf %287, %16 : vector<2x32xf32>
    %289 = arith.mulf %277, %288 : vector<2x32xf32>
    %290 = arith.addf %286, %289 : vector<2x32xf32>
    %291 = math.tanh %290 : vector<2x32xf32>
    %cst_63 = arith.constant 1.000000e+00 : f32
    %292 = vector.broadcast %cst_63 : f32 to vector<2x32xf32>
    %293 = arith.subf %292, %285 : vector<2x32xf32>
    %294 = arith.mulf %293, %291 : vector<2x32xf32>
    %295 = arith.mulf %285, %235 : vector<2x32xf32>
    %296 = arith.addf %294, %295 : vector<2x32xf32>
    %297 = vector.extract_strided_slice %6 {offsets = [5, 0, 0], sizes = [1, 2, 50], strides = [1, 1, 1]} : vector<8x2x50xf32> to vector<1x2x50xf32>
    %298 = vector.shape_cast %297 : vector<1x2x50xf32> to vector<2x50xf32>
    %cst_64 = arith.constant dense<0.000000e+00> : vector<2x384xf32>
    %299 = tpu.matmul %298, %7, %cst_64 {dimension_numbers = #tpu.dot_dimension_numbers<[1], [0], [0], [1], [0, 0, 1, 1], [], []>} : vector<2x50xf32>, vector<50x384xf32>, vector<2x384xf32> -> vector<2x384xf32>
    %cst_65 = arith.constant dense<0.000000e+00> : vector<2x384xf32>
    %300 = tpu.matmul %266, %8, %cst_65 {dimension_numbers = #tpu.dot_dimension_numbers<[1], [0], [0], [1], [0, 0, 1, 1], [], []>} : vector<2x32xf32>, vector<32x384xf32>, vector<2x384xf32> -> vector<2x384xf32>
    %301 = vector.extract_strided_slice %299 {offsets = [0, 0], sizes = [2, 32], strides = [1, 1]} : vector<2x384xf32> to vector<2x32xf32>
    %302 = vector.extract_strided_slice %300 {offsets = [0, 0], sizes = [2, 32], strides = [1, 1]} : vector<2x384xf32> to vector<2x32xf32>
    %303 = arith.addf %301, %302 : vector<2x32xf32>
    %304 = arith.negf %303 : vector<2x32xf32>
    %305 = math.exp %304 : vector<2x32xf32>
    %cst_66 = arith.constant 1.000000e+00 : f32
    %306 = vector.broadcast %cst_66 : f32 to vector<2x32xf32>
    %307 = arith.addf %306, %305 : vector<2x32xf32>
    %308 = arith.divf %306, %307 : vector<2x32xf32>
    %309 = vector.extract_strided_slice %299 {offsets = [0, 128], sizes = [2, 32], strides = [1, 1]} : vector<2x384xf32> to vector<2x32xf32>
    %310 = vector.extract_strided_slice %300 {offsets = [0, 128], sizes = [2, 32], strides = [1, 1]} : vector<2x384xf32> to vector<2x32xf32>
    %311 = arith.addf %309, %310 : vector<2x32xf32>
    %312 = arith.negf %311 : vector<2x32xf32>
    %313 = math.exp %312 : vector<2x32xf32>
    %cst_67 = arith.constant 1.000000e+00 : f32
    %314 = vector.broadcast %cst_67 : f32 to vector<2x32xf32>
    %315 = arith.addf %314, %313 : vector<2x32xf32>
    %316 = arith.divf %314, %315 : vector<2x32xf32>
    %317 = vector.extract_strided_slice %299 {offsets = [0, 256], sizes = [2, 32], strides = [1, 1]} : vector<2x384xf32> to vector<2x32xf32>
    %318 = vector.extract_strided_slice %300 {offsets = [0, 256], sizes = [2, 32], strides = [1, 1]} : vector<2x384xf32> to vector<2x32xf32>
    %319 = arith.addf %318, %13 : vector<2x32xf32>
    %320 = arith.mulf %308, %319 : vector<2x32xf32>
    %321 = arith.addf %317, %320 : vector<2x32xf32>
    %322 = math.tanh %321 : vector<2x32xf32>
    %cst_68 = arith.constant 1.000000e+00 : f32
    %323 = vector.broadcast %cst_68 : f32 to vector<2x32xf32>
    %324 = arith.subf %323, %316 : vector<2x32xf32>
    %325 = arith.mulf %324, %322 : vector<2x32xf32>
    %326 = arith.mulf %316, %266 : vector<2x32xf32>
    %327 = arith.addf %325, %326 : vector<2x32xf32>
    %cst_69 = arith.constant dense<0.000000e+00> : vector<2x384xf32>
    %328 = tpu.matmul %266, %9, %cst_69 {dimension_numbers = #tpu.dot_dimension_numbers<[1], [0], [0], [1], [0, 0, 1, 1], [], []>} : vector<2x32xf32>, vector<32x384xf32>, vector<2x384xf32> -> vector<2x384xf32>
    %329 = arith.addf %328, %19 : vector<2x384xf32>
    %cst_70 = arith.constant dense<0.000000e+00> : vector<2x384xf32>
    %330 = tpu.matmul %296, %10, %cst_70 {dimension_numbers = #tpu.dot_dimension_numbers<[1], [0], [0], [1], [0, 0, 1, 1], [], []>} : vector<2x32xf32>, vector<32x384xf32>, vector<2x384xf32> -> vector<2x384xf32>
    %331 = vector.extract_strided_slice %329 {offsets = [0, 0], sizes = [2, 32], strides = [1, 1]} : vector<2x384xf32> to vector<2x32xf32>
    %332 = vector.extract_strided_slice %330 {offsets = [0, 0], sizes = [2, 32], strides = [1, 1]} : vector<2x384xf32> to vector<2x32xf32>
    %333 = arith.addf %331, %332 : vector<2x32xf32>
    %334 = arith.negf %333 : vector<2x32xf32>
    %335 = math.exp %334 : vector<2x32xf32>
    %cst_71 = arith.constant 1.000000e+00 : f32
    %336 = vector.broadcast %cst_71 : f32 to vector<2x32xf32>
    %337 = arith.addf %336, %335 : vector<2x32xf32>
    %338 = arith.divf %336, %337 : vector<2x32xf32>
    %339 = vector.extract_strided_slice %329 {offsets = [0, 128], sizes = [2, 32], strides = [1, 1]} : vector<2x384xf32> to vector<2x32xf32>
    %340 = vector.extract_strided_slice %330 {offsets = [0, 128], sizes = [2, 32], strides = [1, 1]} : vector<2x384xf32> to vector<2x32xf32>
    %341 = arith.addf %339, %340 : vector<2x32xf32>
    %342 = arith.negf %341 : vector<2x32xf32>
    %343 = math.exp %342 : vector<2x32xf32>
    %cst_72 = arith.constant 1.000000e+00 : f32
    %344 = vector.broadcast %cst_72 : f32 to vector<2x32xf32>
    %345 = arith.addf %344, %343 : vector<2x32xf32>
    %346 = arith.divf %344, %345 : vector<2x32xf32>
    %347 = vector.extract_strided_slice %329 {offsets = [0, 256], sizes = [2, 32], strides = [1, 1]} : vector<2x384xf32> to vector<2x32xf32>
    %348 = vector.extract_strided_slice %330 {offsets = [0, 256], sizes = [2, 32], strides = [1, 1]} : vector<2x384xf32> to vector<2x32xf32>
    %349 = arith.addf %348, %16 : vector<2x32xf32>
    %350 = arith.mulf %338, %349 : vector<2x32xf32>
    %351 = arith.addf %347, %350 : vector<2x32xf32>
    %352 = math.tanh %351 : vector<2x32xf32>
    %cst_73 = arith.constant 1.000000e+00 : f32
    %353 = vector.broadcast %cst_73 : f32 to vector<2x32xf32>
    %354 = arith.subf %353, %346 : vector<2x32xf32>
    %355 = arith.mulf %354, %352 : vector<2x32xf32>
    %356 = arith.mulf %346, %296 : vector<2x32xf32>
    %357 = arith.addf %355, %356 : vector<2x32xf32>
    %358 = vector.extract_strided_slice %6 {offsets = [6, 0, 0], sizes = [1, 2, 50], strides = [1, 1, 1]} : vector<8x2x50xf32> to vector<1x2x50xf32>
    %359 = vector.shape_cast %358 : vector<1x2x50xf32> to vector<2x50xf32>
    %cst_74 = arith.constant dense<0.000000e+00> : vector<2x384xf32>
    %360 = tpu.matmul %359, %7, %cst_74 {dimension_numbers = #tpu.dot_dimension_numbers<[1], [0], [0], [1], [0, 0, 1, 1], [], []>} : vector<2x50xf32>, vector<50x384xf32>, vector<2x384xf32> -> vector<2x384xf32>
    %cst_75 = arith.constant dense<0.000000e+00> : vector<2x384xf32>
    %361 = tpu.matmul %327, %8, %cst_75 {dimension_numbers = #tpu.dot_dimension_numbers<[1], [0], [0], [1], [0, 0, 1, 1], [], []>} : vector<2x32xf32>, vector<32x384xf32>, vector<2x384xf32> -> vector<2x384xf32>
    %362 = vector.extract_strided_slice %360 {offsets = [0, 0], sizes = [2, 32], strides = [1, 1]} : vector<2x384xf32> to vector<2x32xf32>
    %363 = vector.extract_strided_slice %361 {offsets = [0, 0], sizes = [2, 32], strides = [1, 1]} : vector<2x384xf32> to vector<2x32xf32>
    %364 = arith.addf %362, %363 : vector<2x32xf32>
    %365 = arith.negf %364 : vector<2x32xf32>
    %366 = math.exp %365 : vector<2x32xf32>
    %cst_76 = arith.constant 1.000000e+00 : f32
    %367 = vector.broadcast %cst_76 : f32 to vector<2x32xf32>
    %368 = arith.addf %367, %366 : vector<2x32xf32>
    %369 = arith.divf %367, %368 : vector<2x32xf32>
    %370 = vector.extract_strided_slice %360 {offsets = [0, 128], sizes = [2, 32], strides = [1, 1]} : vector<2x384xf32> to vector<2x32xf32>
    %371 = vector.extract_strided_slice %361 {offsets = [0, 128], sizes = [2, 32], strides = [1, 1]} : vector<2x384xf32> to vector<2x32xf32>
    %372 = arith.addf %370, %371 : vector<2x32xf32>
    %373 = arith.negf %372 : vector<2x32xf32>
    %374 = math.exp %373 : vector<2x32xf32>
    %cst_77 = arith.constant 1.000000e+00 : f32
    %375 = vector.broadcast %cst_77 : f32 to vector<2x32xf32>
    %376 = arith.addf %375, %374 : vector<2x32xf32>
    %377 = arith.divf %375, %376 : vector<2x32xf32>
    %378 = vector.extract_strided_slice %360 {offsets = [0, 256], sizes = [2, 32], strides = [1, 1]} : vector<2x384xf32> to vector<2x32xf32>
    %379 = vector.extract_strided_slice %361 {offsets = [0, 256], sizes = [2, 32], strides = [1, 1]} : vector<2x384xf32> to vector<2x32xf32>
    %380 = arith.addf %379, %13 : vector<2x32xf32>
    %381 = arith.mulf %369, %380 : vector<2x32xf32>
    %382 = arith.addf %378, %381 : vector<2x32xf32>
    %383 = math.tanh %382 : vector<2x32xf32>
    %cst_78 = arith.constant 1.000000e+00 : f32
    %384 = vector.broadcast %cst_78 : f32 to vector<2x32xf32>
    %385 = arith.subf %384, %377 : vector<2x32xf32>
    %386 = arith.mulf %385, %383 : vector<2x32xf32>
    %387 = arith.mulf %377, %327 : vector<2x32xf32>
    %388 = arith.addf %386, %387 : vector<2x32xf32>
    %cst_79 = arith.constant dense<0.000000e+00> : vector<2x384xf32>
    %389 = tpu.matmul %327, %9, %cst_79 {dimension_numbers = #tpu.dot_dimension_numbers<[1], [0], [0], [1], [0, 0, 1, 1], [], []>} : vector<2x32xf32>, vector<32x384xf32>, vector<2x384xf32> -> vector<2x384xf32>
    %390 = arith.addf %389, %19 : vector<2x384xf32>
    %cst_80 = arith.constant dense<0.000000e+00> : vector<2x384xf32>
    %391 = tpu.matmul %357, %10, %cst_80 {dimension_numbers = #tpu.dot_dimension_numbers<[1], [0], [0], [1], [0, 0, 1, 1], [], []>} : vector<2x32xf32>, vector<32x384xf32>, vector<2x384xf32> -> vector<2x384xf32>
    %392 = vector.extract_strided_slice %390 {offsets = [0, 0], sizes = [2, 32], strides = [1, 1]} : vector<2x384xf32> to vector<2x32xf32>
    %393 = vector.extract_strided_slice %391 {offsets = [0, 0], sizes = [2, 32], strides = [1, 1]} : vector<2x384xf32> to vector<2x32xf32>
    %394 = arith.addf %392, %393 : vector<2x32xf32>
    %395 = arith.negf %394 : vector<2x32xf32>
    %396 = math.exp %395 : vector<2x32xf32>
    %cst_81 = arith.constant 1.000000e+00 : f32
    %397 = vector.broadcast %cst_81 : f32 to vector<2x32xf32>
    %398 = arith.addf %397, %396 : vector<2x32xf32>
    %399 = arith.divf %397, %398 : vector<2x32xf32>
    %400 = vector.extract_strided_slice %390 {offsets = [0, 128], sizes = [2, 32], strides = [1, 1]} : vector<2x384xf32> to vector<2x32xf32>
    %401 = vector.extract_strided_slice %391 {offsets = [0, 128], sizes = [2, 32], strides = [1, 1]} : vector<2x384xf32> to vector<2x32xf32>
    %402 = arith.addf %400, %401 : vector<2x32xf32>
    %403 = arith.negf %402 : vector<2x32xf32>
    %404 = math.exp %403 : vector<2x32xf32>
    %cst_82 = arith.constant 1.000000e+00 : f32
    %405 = vector.broadcast %cst_82 : f32 to vector<2x32xf32>
    %406 = arith.addf %405, %404 : vector<2x32xf32>
    %407 = arith.divf %405, %406 : vector<2x32xf32>
    %408 = vector.extract_strided_slice %390 {offsets = [0, 256], sizes = [2, 32], strides = [1, 1]} : vector<2x384xf32> to vector<2x32xf32>
    %409 = vector.extract_strided_slice %391 {offsets = [0, 256], sizes = [2, 32], strides = [1, 1]} : vector<2x384xf32> to vector<2x32xf32>
    %410 = arith.addf %409, %16 : vector<2x32xf32>
    %411 = arith.mulf %399, %410 : vector<2x32xf32>
    %412 = arith.addf %408, %411 : vector<2x32xf32>
    %413 = math.tanh %412 : vector<2x32xf32>
    %cst_83 = arith.constant 1.000000e+00 : f32
    %414 = vector.broadcast %cst_83 : f32 to vector<2x32xf32>
    %415 = arith.subf %414, %407 : vector<2x32xf32>
    %416 = arith.mulf %415, %413 : vector<2x32xf32>
    %417 = arith.mulf %407, %357 : vector<2x32xf32>
    %418 = arith.addf %416, %417 : vector<2x32xf32>
    %419 = vector.extract_strided_slice %6 {offsets = [7, 0, 0], sizes = [1, 2, 50], strides = [1, 1, 1]} : vector<8x2x50xf32> to vector<1x2x50xf32>
    %420 = vector.shape_cast %419 : vector<1x2x50xf32> to vector<2x50xf32>
    %cst_84 = arith.constant dense<0.000000e+00> : vector<2x384xf32>
    %421 = tpu.matmul %420, %7, %cst_84 {dimension_numbers = #tpu.dot_dimension_numbers<[1], [0], [0], [1], [0, 0, 1, 1], [], []>} : vector<2x50xf32>, vector<50x384xf32>, vector<2x384xf32> -> vector<2x384xf32>
    %cst_85 = arith.constant dense<0.000000e+00> : vector<2x384xf32>
    %422 = tpu.matmul %388, %8, %cst_85 {dimension_numbers = #tpu.dot_dimension_numbers<[1], [0], [0], [1], [0, 0, 1, 1], [], []>} : vector<2x32xf32>, vector<32x384xf32>, vector<2x384xf32> -> vector<2x384xf32>
    %423 = vector.extract_strided_slice %421 {offsets = [0, 0], sizes = [2, 32], strides = [1, 1]} : vector<2x384xf32> to vector<2x32xf32>
    %424 = vector.extract_strided_slice %422 {offsets = [0, 0], sizes = [2, 32], strides = [1, 1]} : vector<2x384xf32> to vector<2x32xf32>
    %425 = arith.addf %423, %424 : vector<2x32xf32>
    %426 = arith.negf %425 : vector<2x32xf32>
    %427 = math.exp %426 : vector<2x32xf32>
    %cst_86 = arith.constant 1.000000e+00 : f32
    %428 = vector.broadcast %cst_86 : f32 to vector<2x32xf32>
    %429 = arith.addf %428, %427 : vector<2x32xf32>
    %430 = arith.divf %428, %429 : vector<2x32xf32>
    %431 = vector.extract_strided_slice %421 {offsets = [0, 128], sizes = [2, 32], strides = [1, 1]} : vector<2x384xf32> to vector<2x32xf32>
    %432 = vector.extract_strided_slice %422 {offsets = [0, 128], sizes = [2, 32], strides = [1, 1]} : vector<2x384xf32> to vector<2x32xf32>
    %433 = arith.addf %431, %432 : vector<2x32xf32>
    %434 = arith.negf %433 : vector<2x32xf32>
    %435 = math.exp %434 : vector<2x32xf32>
    %cst_87 = arith.constant 1.000000e+00 : f32
    %436 = vector.broadcast %cst_87 : f32 to vector<2x32xf32>
    %437 = arith.addf %436, %435 : vector<2x32xf32>
    %438 = arith.divf %436, %437 : vector<2x32xf32>
    %439 = vector.extract_strided_slice %421 {offsets = [0, 256], sizes = [2, 32], strides = [1, 1]} : vector<2x384xf32> to vector<2x32xf32>
    %440 = vector.extract_strided_slice %422 {offsets = [0, 256], sizes = [2, 32], strides = [1, 1]} : vector<2x384xf32> to vector<2x32xf32>
    %441 = arith.addf %440, %13 : vector<2x32xf32>
    %442 = arith.mulf %430, %441 : vector<2x32xf32>
    %443 = arith.addf %439, %442 : vector<2x32xf32>
    %444 = math.tanh %443 : vector<2x32xf32>
    %cst_88 = arith.constant 1.000000e+00 : f32
    %445 = vector.broadcast %cst_88 : f32 to vector<2x32xf32>
    %446 = arith.subf %445, %438 : vector<2x32xf32>
    %447 = arith.mulf %446, %444 : vector<2x32xf32>
    %448 = arith.mulf %438, %388 : vector<2x32xf32>
    %449 = arith.addf %447, %448 : vector<2x32xf32>
    %cst_89 = arith.constant dense<0.000000e+00> : vector<2x384xf32>
    %450 = tpu.matmul %388, %9, %cst_89 {dimension_numbers = #tpu.dot_dimension_numbers<[1], [0], [0], [1], [0, 0, 1, 1], [], []>} : vector<2x32xf32>, vector<32x384xf32>, vector<2x384xf32> -> vector<2x384xf32>
    %451 = arith.addf %450, %19 : vector<2x384xf32>
    %cst_90 = arith.constant dense<0.000000e+00> : vector<2x384xf32>
    %452 = tpu.matmul %418, %10, %cst_90 {dimension_numbers = #tpu.dot_dimension_numbers<[1], [0], [0], [1], [0, 0, 1, 1], [], []>} : vector<2x32xf32>, vector<32x384xf32>, vector<2x384xf32> -> vector<2x384xf32>
    %453 = vector.extract_strided_slice %451 {offsets = [0, 0], sizes = [2, 32], strides = [1, 1]} : vector<2x384xf32> to vector<2x32xf32>
    %454 = vector.extract_strided_slice %452 {offsets = [0, 0], sizes = [2, 32], strides = [1, 1]} : vector<2x384xf32> to vector<2x32xf32>
    %455 = arith.addf %453, %454 : vector<2x32xf32>
    %456 = arith.negf %455 : vector<2x32xf32>
    %457 = math.exp %456 : vector<2x32xf32>
    %cst_91 = arith.constant 1.000000e+00 : f32
    %458 = vector.broadcast %cst_91 : f32 to vector<2x32xf32>
    %459 = arith.addf %458, %457 : vector<2x32xf32>
    %460 = arith.divf %458, %459 : vector<2x32xf32>
    %461 = vector.extract_strided_slice %451 {offsets = [0, 128], sizes = [2, 32], strides = [1, 1]} : vector<2x384xf32> to vector<2x32xf32>
    %462 = vector.extract_strided_slice %452 {offsets = [0, 128], sizes = [2, 32], strides = [1, 1]} : vector<2x384xf32> to vector<2x32xf32>
    %463 = arith.addf %461, %462 : vector<2x32xf32>
    %464 = arith.negf %463 : vector<2x32xf32>
    %465 = math.exp %464 : vector<2x32xf32>
    %cst_92 = arith.constant 1.000000e+00 : f32
    %466 = vector.broadcast %cst_92 : f32 to vector<2x32xf32>
    %467 = arith.addf %466, %465 : vector<2x32xf32>
    %468 = arith.divf %466, %467 : vector<2x32xf32>
    %469 = vector.extract_strided_slice %451 {offsets = [0, 256], sizes = [2, 32], strides = [1, 1]} : vector<2x384xf32> to vector<2x32xf32>
    %470 = vector.extract_strided_slice %452 {offsets = [0, 256], sizes = [2, 32], strides = [1, 1]} : vector<2x384xf32> to vector<2x32xf32>
    %471 = arith.addf %470, %16 : vector<2x32xf32>
    %472 = arith.mulf %460, %471 : vector<2x32xf32>
    %473 = arith.addf %469, %472 : vector<2x32xf32>
    %474 = math.tanh %473 : vector<2x32xf32>
    %cst_93 = arith.constant 1.000000e+00 : f32
    %475 = vector.broadcast %cst_93 : f32 to vector<2x32xf32>
    %476 = arith.subf %475, %468 : vector<2x32xf32>
    %477 = arith.mulf %476, %474 : vector<2x32xf32>
    %478 = arith.mulf %468, %418 : vector<2x32xf32>
    %479 = arith.addf %477, %478 : vector<2x32xf32>
    %cst_94 = arith.constant dense<0.000000e+00> : vector<2x384xf32>
    %480 = tpu.matmul %449, %9, %cst_94 {dimension_numbers = #tpu.dot_dimension_numbers<[1], [0], [0], [1], [0, 0, 1, 1], [], []>} : vector<2x32xf32>, vector<32x384xf32>, vector<2x384xf32> -> vector<2x384xf32>
    %481 = arith.addf %480, %19 : vector<2x384xf32>
    %cst_95 = arith.constant dense<0.000000e+00> : vector<2x384xf32>
    %482 = tpu.matmul %479, %10, %cst_95 {dimension_numbers = #tpu.dot_dimension_numbers<[1], [0], [0], [1], [0, 0, 1, 1], [], []>} : vector<2x32xf32>, vector<32x384xf32>, vector<2x384xf32> -> vector<2x384xf32>
    %483 = vector.extract_strided_slice %481 {offsets = [0, 0], sizes = [2, 32], strides = [1, 1]} : vector<2x384xf32> to vector<2x32xf32>
    %484 = vector.extract_strided_slice %482 {offsets = [0, 0], sizes = [2, 32], strides = [1, 1]} : vector<2x384xf32> to vector<2x32xf32>
    %485 = arith.addf %483, %484 : vector<2x32xf32>
    %486 = arith.negf %485 : vector<2x32xf32>
    %487 = math.exp %486 : vector<2x32xf32>
    %cst_96 = arith.constant 1.000000e+00 : f32
    %488 = vector.broadcast %cst_96 : f32 to vector<2x32xf32>
    %489 = arith.addf %488, %487 : vector<2x32xf32>
    %490 = arith.divf %488, %489 : vector<2x32xf32>
    %491 = vector.extract_strided_slice %481 {offsets = [0, 128], sizes = [2, 32], strides = [1, 1]} : vector<2x384xf32> to vector<2x32xf32>
    %492 = vector.extract_strided_slice %482 {offsets = [0, 128], sizes = [2, 32], strides = [1, 1]} : vector<2x384xf32> to vector<2x32xf32>
    %493 = arith.addf %491, %492 : vector<2x32xf32>
    %494 = arith.negf %493 : vector<2x32xf32>
    %495 = math.exp %494 : vector<2x32xf32>
    %cst_97 = arith.constant 1.000000e+00 : f32
    %496 = vector.broadcast %cst_97 : f32 to vector<2x32xf32>
    %497 = arith.addf %496, %495 : vector<2x32xf32>
    %498 = arith.divf %496, %497 : vector<2x32xf32>
    %499 = vector.extract_strided_slice %481 {offsets = [0, 256], sizes = [2, 32], strides = [1, 1]} : vector<2x384xf32> to vector<2x32xf32>
    %500 = vector.extract_strided_slice %482 {offsets = [0, 256], sizes = [2, 32], strides = [1, 1]} : vector<2x384xf32> to vector<2x32xf32>
    %501 = arith.addf %500, %16 : vector<2x32xf32>
    %502 = arith.mulf %490, %501 : vector<2x32xf32>
    %503 = arith.addf %499, %502 : vector<2x32xf32>
    %504 = math.tanh %503 : vector<2x32xf32>
    %cst_98 = arith.constant 1.000000e+00 : f32
    %505 = vector.broadcast %cst_98 : f32 to vector<2x32xf32>
    %506 = arith.subf %505, %498 : vector<2x32xf32>
    %507 = arith.mulf %506, %504 : vector<2x32xf32>
    %508 = arith.mulf %498, %479 : vector<2x32xf32>
    %509 = arith.addf %507, %508 : vector<2x32xf32>
    %c0_99 = arith.constant 0 : index
    %c0_100 = arith.constant 0 : index
    %510 = vector.load %arg8[%c0_99, %c0_100] : memref<32x2xf32, #tpu.memory_space<vmem>>, vector<32x2xf32>
    %cst_101 = arith.constant dense<0.000000e+00> : vector<2x2xf32>
    %511 = tpu.matmul %509, %510, %cst_101 {dimension_numbers = #tpu.dot_dimension_numbers<[1], [0], [0], [1], [0, 0, 1, 1], [], []>} : vector<2x32xf32>, vector<32x2xf32>, vector<2x2xf32> -> vector<2x2xf32>
    %c0_102 = arith.constant 0 : index
    %c0_103 = arith.constant 0 : index
    %512 = vector.load %arg9[%c0_102, %c0_103] : memref<1x2xf32, #tpu.memory_space<vmem>>, vector<1x2xf32>
    %513 = vector.broadcast %512 : vector<1x2xf32> to vector<2x2xf32>
    %514 = arith.addf %511, %513 : vector<2x2xf32>
    %c0_104 = arith.constant 0 : index
    %c0_105 = arith.constant 0 : index
    %515 = vector.load %arg10[%c0_104, %c0_105] : memref<2x2xf32, #tpu.memory_space<vmem>>, vector<2x2xf32>
    tpu.vector_store %arg10[%c0_104, %c0_105], %514 {strides = array<i32>} : memref<2x2xf32, #tpu.memory_space<vmem>>, vector<2x2xf32>,
    return
  }
}

</mosaic_0001>

<bundles_post_ra>
// kernel: spam_model_forward.1
= control target key start
LH: loop header
LB: loop body
LE: loop exit
PB: predicated region body
PF: predicated region fallthrough
CT: control target
= control target key end

     0   :  { %15 = vsyncpa [#allocation3], 0  ;;  %s7683_s0 = inlined_call_operand.vmem [shape: s32[8,2,1], index: 0, kind: input, shape index: {}]   ;;  %s7684_s1 = inlined_call_operand.hbm [shape: f32[50,384], index: 1, kind: input, shape index: {}]   ;;  %s7685_s2 = inlined_call_operand.hbm [shape: f32[32,384], index: 2, kind: input, shape index: {}]   ;;  %s7686_s3 = inlined_call_operand.vmem [shape: f32[1,32], index: 3, kind: input, shape index: {}]   ;;  %s7687_s4 = inlined_call_operand.hbm [shape: f32[32,384], index: 4, kind: input, shape index: {}]   ;;  %s7688_s5 = inlined_call_operand.hbm [shape: f32[32,384], index: 5, kind: input, shape index: {}]   ;;  %s7689_s6 = inlined_call_operand.vmem [shape: f32[1,384], index: 6, kind: input, shape index: {}]   ;;  %s7690_s7 = inlined_call_operand.vmem [shape: f32[1,32], index: 7, kind: input, shape index: {}]   ;;  %s7691_s8 = inlined_call_operand.vmem [shape: f32[32,2], index: 8, kind: input, shape index: {}]   ;;  %s7692_s9 = inlined_call_operand.vmem [shape: f32[1,2], index: 9, kind: input, shape index: {}]   ;;  %s7693_s10 = inlined_call_operand.hbm [shape: f32[2,2], index: 10, kind: output, shape index: {}]  }
   0x1   :  { %16 = vsyncpa [#allocation6], 0 }
   0x2   :  { %17 = vsyncpa [#allocation9], 0 }
   0x3   :  { %18 = vsyncpa [#allocation4], 0  ;;  %s6339_s13 = smov [#allocation5]   ;;  %s6340_s15 = smov [#allocation2]  }
   0x4   :  { %s38_s14 = sshll.u32 %s6339_s13, 4  ;;  %s26_s16 = sshll.u32 %s6340_s15, 4  ;;  %s39_s14 = int_to_ptr.vmem [resolvable:$true] %s38_s14  ;;  %s27_s16 = int_to_ptr.vmem [resolvable:$true] %s26_s16 }
   0x5   :  { %s6239_s17 = scalar_lea.vmem %s39_s14, 1536  ;;  %p6244_p1 = scmp.lt.s32.totalorder %s39_s14, %s39_s14 }
   0x6   :  { %p6240_p0 = scmp.ne.s32.totalorder %s39_s14, %s6239_s17  ;;  %p6245_p2 = scmp.lt.s32.totalorder %s6239_s17, %s6239_s17 }
   0x8   :  { %p6246_p3 = por %p6245_p2, %p6244_p1 }
   0xa   :  { %p6247_p4 = pnand %p6246_p3, %p6240_p0 }
   0xc   :  { %6250 = shalt.err (!%p6247_p4)
}
   0xd   :  { %s6341_s18 = smov 384   ;;  %s6342_s19 = smov 24  }
   0xe   :  { %44 = dma.hbm_to_vmem [thread:$0]  %s7685_s2, 1536, %s39_s14, [#allocation6], %s6341_s18, %s6341_s18, %s6342_s19  }
   0xf   :  { %s6259_s22 = scalar_lea.vmem %s27_s16, 2688  ;;  %p6264_p6 = scmp.lt.s32.totalorder %s27_s16, %s27_s16 }
  0x10   :  { %p6260_p5 = scmp.ne.s32.totalorder %s27_s16, %s6259_s22  ;;  %p6265_p7 = scmp.lt.s32.totalorder %s6259_s22, %s6259_s22 }
  0x12   :  { %p6266_p8 = por %p6265_p7, %p6264_p6 }
  0x14   :  { %p6267_p9 = pnand %p6266_p8, %p6260_p5 }
  0x16   :  { %6270 = shalt.err (!%p6267_p9)
}
  0x17   :  { %32 = dma.hbm_to_vmem [thread:$0]  %s7684_s1, 2688, %s27_s16, [#allocation3], %s6341_s18, %s6341_s18, %s6342_s19  }
  0x18   :  { %s6343_s25 = smov [#allocation7]   ;;  %s6344_s27 = smov [#allocation8]  }
  0x19   :  { %s52_s26 = sshll.u32 %s6343_s25, 4  ;;  %s64_s28 = sshll.u32 %s6344_s27, 4  ;;  %s53_s26 = int_to_ptr.vmem [resolvable:$true] %s52_s26  ;;  %s65_s28 = int_to_ptr.vmem [resolvable:$true] %s64_s28 }
  0x1a   :  { %s6279_s2 = scalar_lea.vmem %s53_s26, 1536  ;;  %p6284_p11 = scmp.lt.s32.totalorder %s53_s26, %s53_s26 }
  0x1b   :  { %p6280_p10 = scmp.ne.s32.totalorder %s53_s26, %s6279_s2  ;;  %p6285_p12 = scmp.lt.s32.totalorder %s6279_s2, %s6279_s2 }
  0x1d   :  { %p6286_p13 = por %p6285_p12, %p6284_p11 }
  0x1f   :  { %p6287_p0 = pnand %p6286_p13, %p6280_p10 }
  0x21   :  { %6290 = shalt.err (!%p6287_p0)
}
  0x22   :  { %58 = dma.hbm_to_vmem [thread:$0]  %s7687_s4, 1536, %s53_s26, [#allocation6], %s6341_s18, %s6341_s18, %s6342_s19  }
  0x23   :  { %s6299_s1 = scalar_lea.vmem %s65_s28, 1536  ;;  %p6304_p2 = scmp.lt.s32.totalorder %s65_s28, %s65_s28 }
  0x24   :  { %p6300_p1 = scmp.ne.s32.totalorder %s65_s28, %s6299_s1  ;;  %p6305_p3 = scmp.lt.s32.totalorder %s6299_s1, %s6299_s1 }
  0x26   :  { %p6306_p4 = por %p6305_p3, %p6304_p2 }
  0x28   :  { %p6307_p5 = pnand %p6306_p4, %p6300_p1 }
  0x2a   :  { %6310 = shalt.err (!%p6307_p5)
}
  0x2b   :  { %70 = dma.hbm_to_vmem [thread:$0]  %s7688_s5, 1536, %s65_s28, [#allocation9], %s6341_s18, %s6341_s18, %s6342_s19  }
  0x2c   :  { %6331 = dma.done.wait [#allocation3], 2688  }
  0x2d   :  { %6332 = vsyncadd [#allocation3], 4294964608 }
  0x2e   :  { %6333 = dma.done.wait [#allocation6], 3072  }
  0x2f   :  { %6334 = vsyncadd [#allocation6], 4294964224 }
  0x30   :  { %6335 = dma.done.wait [#allocation9], 1536  }
  0x31   :  { %6336 = vsyncadd [#allocation9], 4294965760  ;;  %v6345_v0 = vmov 0   ;;  %v7709_v1 = vmov 0.0   ;;  %vm6347_vm0 = vmmov 0   ;;  %vm233_vm1 = vcmask 1041408  }
  0x32   :  { %6010 = vset.pattern.permute.xlu0 %v6345_v0  ;;  %5589 = vmatprep.subr.mxu1 %v7709_v1  ;;  %v91_v2 = vld [vmem:[%s7683_s0] sm:$0x3]  ;;  %v92_v3 = vld [vmem:[%s7683_s0 + $0x2] sm:$0x3]  ;;  %v6438_v4 = vld [vmem:[#allocation2 + $0x98] sm:$0x3]  ;;  %v7694_v28 = vlaneseq }
  0x33   :  { %307 = vmatprep.mubr.f32.mxu0 %v7709_v1  ;;  %6011 = vset.pattern.permute.xlu1 %v6345_v0  ;;  %v6440_v5 = vld [vmem:[#allocation2 + $0x90] sm:$0x3]  ;;  %v6444_v6 = vld [vmem:[#allocation2 + $0xa0] sm:$0x3]  ;;  %v6448_v8 = vld [vmem:[#allocation2 + $0x78] sm:$0xff]  ;;  %vm229_vm2 = vcmask 408576  }
  0x34   :  { %5603 = vmatprep.mubr.msk.f32.mxu1 %vm6347_vm0, %v7709_v1  ;;  %102 = vperm.xlu0 %6010, %v91_v2   ;;  %v6446_v7 = vld [vmem:[#allocation2 + $0x80] sm:$0xff]  ;;  %v6454_v9 = vld [vmem:[#allocation2 + $0x88] sm:$0xff]  ;;  %v6463_v12 = vld [vmem:[#allocation2 + $0x70] sm:$0xff]  ;;  %v6521_v29 = vand.u32 127, %v7694_v28  ;;  %vm384_vm5 = vcmask 261120   ;;  %s6348_s18 = smov [#allocation10]  }
  0x35   :  { %5282 = vmatprep.subr.msk.mxu0 %vm233_vm1, %v6438_v4  ;;  %5590 = vmatpush3.msk.msra.mxu1 %vm233_vm1, %v6444_v6  ;;  %v6456_v10 = vld [vmem:[#allocation2 + $0x68] sm:$0xff]  ;;  %v6460_v11 = vld [vmem:[#allocation2 + $0x60] sm:$0xff]  ;;  %v6465_v13 = vld [vmem:[#allocation2 + $0x50] sm:$0xff]  ;;  %s5269_s19 = sshll.u32 %s6348_s18, 4  ;;  %vm5261_vm12 = vcmask 9216   ;;  %s5270_s19 = int_to_ptr.vmem [resolvable:$true] %s5269_s19 }
  0x36   :  { %5283 = vmatpush1.msk.msra.mxu0 %vm233_vm1, %v6440_v5  ;;  %5591 = vmatprep.subr.mxu1 %v7709_v1  ;;  %v95_v14 = vld [vmem:[%s7683_s0 + $0x8] sm:$0x3]  ;;  %v6476_v16 = vld [vmem:[#allocation2 + $0x58] sm:$0xff]  ;;  %v6483_v18 = vld [vmem:[#allocation2 + $0x30] sm:$0xff]  ;;  %7802 = vst [vmem:[#allocation22_spill] sm:$0xff] %v6521_v29  ;;  %s6311_s20 = scalar_lea.vmem %s5270_s19, 32  ;;  %p6316_p7 = scmp.lt.s32.totalorder %s5270_s19, %s5270_s19 }
  0x37   :  { %263 = vmatprep.subr.mxu0 %v6446_v7  ;;  %5592 = vmatpush3.msra.mxu1 %v6454_v9  ;;  %v6474_v15 = vld [vmem:[#allocation2 + $0x48] sm:$0xff]  ;;  %v6480_v17 = vld [vmem:[#allocation2 + $0x38] sm:$0xff]  ;;  %v6485_v19 = vld [vmem:[#allocation2 + $0x40] sm:$0xff]  ;;  %p6312_p6 = scmp.ne.s32.totalorder %s5270_s19, %s6311_s20  ;;  %p6317_p8 = scmp.lt.s32.totalorder %s6311_s20, %s6311_s20 }
  0x38   :  { %105 = vperm.xlu0 %6010, %v92_v3   ;;  %264 = vmatpush1.msra.mxu0 %v6448_v8  ;;  %v97_v20 = vld [vmem:[%s7683_s0 + $0xc] sm:$0x3]  ;;  %v6492_v21 = vld [vmem:[#allocation2 + $0x20] sm:$0xff]  ;;  %v6496_v22 = vld [vmem:[#allocation2 + $0x18] sm:$0xff] }
  0x39   :  { %265 = vmatprep.subr.mxu0 %v6456_v10  ;;  %5593 = vmatprep.subr.mxu1 %v7709_v1  ;;  %7795 = vst [vmem:[#allocation15_spill] sm:$0xff] %v6492_v21  ;;  %7796 = vst [vmem:[#allocation16_spill] sm:$0xff] %v6496_v22  ;;  %v6500_v23 = vld [vmem:[#allocation2 + $0x28] sm:$0xff]  ;;  %v6505_v25 = vld [vmem:[#allocation2] sm:$0xff]  ;;  %p6318_p9 = por %p6317_p8, %p6316_p7 }
  0x3a   :  { %266 = vmatpush1.msra.mxu0 %v6460_v11  ;;  %5594 = vmatpush3.msra.mxu1 %v6463_v12  ;;  %7797 = vst [vmem:[#allocation17_spill] sm:$0xff] %v6500_v23  ;;  %v6502_v24 = vld [vmem:[#allocation2 + $0x8] sm:$0xff]  ;;  %7799 = vst [vmem:[#allocation19_spill] sm:$0xff] %v6505_v25  ;;  %v6509_v26 = vld [vmem:[#allocation2 + $0x10] sm:$0xff] }
  0x3b   :  { %267 = vmatprep.subr.mxu0 %v6465_v13  ;;  %5595 = vmatprep.subr.mxu1 %v7709_v1  ;;  %7798 = vst [vmem:[#allocation18_spill] sm:$0xff] %v6502_v24  ;;  %7800 = vst [vmem:[#allocation20_spill] sm:$0xff] %v6509_v26  ;;  %v6511_v27 = vld [vmem:[#allocation5 + $0x50] sm:$0xff]  ;;  %v6524_v31 = vld [vmem:[#allocation5 + $0x48] sm:$0xff]  ;;  %p6319_p10 = pnand %p6318_p9, %p6312_p6 }
  0x3c   :  { %114 = vperm.xlu0 %6010, %v95_v14   ;;  %268 = vmatpush1.msra.mxu0 %v6474_v15  ;;  %7801 = vst [vmem:[#allocation21_spill] sm:$0xff] %v6511_v27  ;;  %7803 = vst [vmem:[#allocation23_spill] sm:$0xff] %v6524_v31  ;;  %v6526_v32 = vld [vmem:[#allocation5 + $0x58] sm:$0xff]  ;;  %v6533_v35 = vld [vmem:[#allocation5 + $0x30] sm:$0xff] }
  0x3d   :  { %5596 = vmatpush3.msra.mxu1 %v6476_v16  ;;  %269 = vmatprep.subr.mxu0 %v6480_v17  ;;  %7804 = vst [vmem:[#allocation24_spill] sm:$0xff] %v6526_v32  ;;  %v6529_v34 = vld [vmem:[#allocation5 + $0x38] sm:$0xff]  ;;  %7806 = vst [vmem:[#allocation26_spill] sm:$0xff] %v6533_v35  ;;  %v6535_v36 = vld [vmem:[#allocation5 + $0x40] sm:$0xff] }
  0x3e   :  { %5597 = vmatprep.subr.mxu1 %v7709_v1  ;;  %270 = vmatpush1.msra.mxu0 %v6483_v18  ;;  %7805 = vst [vmem:[#allocation25_spill] sm:$0xff] %v6529_v34  ;;  %7807 = vst [vmem:[#allocation27_spill] sm:$0xff] %v6535_v36  ;;  %v6539_v37 = vld [vmem:[#allocation5 + $0x20] sm:$0xff]  ;;  %v6543_v38 = vld [vmem:[#allocation5 + $0x18] sm:$0xff] }
  0x3f   :  { %5598 = vmatpush3.msra.mxu1 %v6485_v19  ;;  %271 = vmatprep.subr.mxu0 %v6492_v21  ;;  %7808 = vst [vmem:[#allocation28_spill] sm:$0xff] %v6539_v37  ;;  %7809 = vst [vmem:[#allocation29_spill] sm:$0xff] %v6543_v38  ;;  %v6545_v39 = vld [vmem:[#allocation5 + $0x28] sm:$0xff]  ;;  %v6553_v41 = vld [vmem:[#allocation5] sm:$0xff] }
  0x40   :  { %120 = vperm.xlu0 %6010, %v97_v20   ;;  %5599 = vmatprep.subr.mxu1 %v7709_v1  ;;  %7810 = vst [vmem:[#allocation30_spill] sm:$0xff] %v6545_v39  ;;  %v6549_v40 = vld [vmem:[#allocation5 + $0x8] sm:$0xff]  ;;  %7812 = vst [vmem:[#allocation32_spill] sm:$0xff] %v6553_v41  ;;  %v6557_v42 = vld [vmem:[#allocation5 + $0x10] sm:$0xff] }
  0x41   :  { %272 = vmatpush1.msra.mxu0 %v6496_v22  ;;  %5600 = vmatpush3.msra.mxu1 %v6500_v23  ;;  %7811 = vst [vmem:[#allocation31_spill] sm:$0xff] %v6549_v40  ;;  %7813 = vst [vmem:[#allocation33_spill] sm:$0xff] %v6557_v42  ;;  %v6626_v45 = vld [vmem:[#allocation7 + $0x50] sm:$0xff]  ;;  %v93_v46 = vld [vmem:[%s7683_s0 + $0x4] sm:$0x3] }
  0x42   :  { %273 = vmatprep.subr.mxu0 %v6502_v24  ;;  %5601 = vmatprep.subr.mxu1 %v7709_v1  ;;  %7814 = vst [vmem:[#allocation34_spill] sm:$0xff] %v6626_v45  ;;  %v94_v47 = vld [vmem:[%s7683_s0 + $0x6] sm:$0x3]  ;;  %v96_v48 = vld [vmem:[%s7683_s0 + $0xa] sm:$0x3] }
  0x43   :  { %274 = vmatpush1.msra.mxu0 %v6505_v25  ;;  %5602 = vmatpush3.msra.mxu1 %v6509_v26  ;;  %v98_v49 = vld [vmem:[%s7683_s0 + $0xe] sm:$0x3]  ;;  %v6646_v14 = vld [vmem:[%s7686_s3] ss:$0 sm:$0xff] }
  0x44   :  { %412 = vmatprep.subr.mxu0 %v6511_v27  ;;  %5606 = vmatprep.subr.mxu1 %v7709_v1 }
  0x45   :  { %108 = vperm.xlu1 %6011, %v93_v46  }
  0x49   :  { %111 = vperm.xlu1 %6011, %v94_v47  }
  0x4d   :  { %117 = vperm.xlu1 %6011, %v96_v48  }
  0x51   :  { %123 = vperm.xlu1 %6011, %v98_v49  }
  0xaf   :  { %v103_v30 = vpop.permute.xlu0 %102 }
  0xb0   :  { %vm125_vm3 = vcmp.eq.s32.totalorder %v103_v30, %v6521_v29 }
  0xb1   :  { %v133_v33 = vsel %vm125_vm3, 1.0, %v7709_v1 }
  0xb2   :  { %5284 = vmatmul.mubr.msk.f32.vlgmr.msra.gmra.mxu0 %vm229_vm2, %v133_v33  ;;  %5604 = vmatmul.mubr.msk.f32.vlgmr.msra.gmra.mxu1 %vm229_vm2, %v133_v33 }
  0xb3   :  { %413 = vmatpush1.msra.mxu0 %v6524_v31  ;;  %5607 = vmatpush3.msra.mxu1 %v6526_v32  ;;  %v106_v43 = vpop.permute.xlu0 %105 }
  0xb4   :  { %414 = vmatprep.subr.mxu0 %v6529_v34  ;;  %5608 = vmatprep.subr.mxu1 %v7709_v1  ;;  %vm126_vm4 = vcmp.eq.s32.totalorder %v106_v43, %v6521_v29 }
  0xb5   :  { %415 = vmatpush1.msra.mxu0 %v6533_v35  ;;  %5609 = vmatpush3.msra.mxu1 %v6535_v36  ;;  %v134_v44 = vsel %vm126_vm4, 1.0, %v7709_v1 }
  0xb6   :  { %416 = vmatprep.subr.mxu0 %v6539_v37  ;;  %5610 = vmatprep.subr.mxu1 %v7709_v1 }
  0xb7   :  { %417 = vmatpush1.msra.mxu0 %v6543_v38  ;;  %5611 = vmatpush3.msra.mxu1 %v6545_v39 }
  0xb8   :  { %418 = vmatprep.subr.mxu0 %v6549_v40  ;;  %5612 = vmatprep.subr.mxu1 %v7709_v1 }
  0xb9   :  { %419 = vmatpush1.msra.mxu0 %v6553_v41  ;;  %452 = vmatprep.mubr.f32.mxu0 %v7709_v1 }
  0xba   :  { %5613 = vmatpush3.msra.mxu1 %v6557_v42  ;;  %453 = vmatmul.mubr.f32.vlgmr.msra.gmra.mxu0 %v7709_v1 }
  0xbb   :  { %5614 = vmatprep.mubr.msk.f32.mxu1 %vm6347_vm0, %v7709_v1  ;;  %5289 = vmatprep.subr.msk.mxu0 %vm233_vm1, %v6438_v4 }
  0xbc   :  { %5617 = vmatprep.subr.mxu1 %v7709_v1  ;;  %5615 = vmatmul.mubr.f32.vlgmr.msra.gmra.mxu1 %v7709_v1 }
  0xbd   :  { %5290 = vmatpush1.msk.msra.mxu0 %vm233_vm1, %v6440_v5  ;;  %5618 = vmatpush3.msk.msra.mxu1 %vm233_vm1, %v6444_v6 }
  0xbe   :  { %574 = vmatprep.subr.mxu0 %v6446_v7  ;;  %5619 = vmatprep.subr.mxu1 %v7709_v1 }
  0xbf   :  { %575 = vmatpush1.msra.mxu0 %v6448_v8  ;;  %5620 = vmatpush3.msra.mxu1 %v6454_v9 }
  0xc0   :  { %576 = vmatprep.subr.mxu0 %v6456_v10  ;;  %5621 = vmatprep.subr.mxu1 %v7709_v1 }
  0xc1   :  { %577 = vmatpush1.msra.mxu0 %v6460_v11  ;;  %5622 = vmatpush3.msra.mxu1 %v6463_v12 }
  0xc2   :  { %578 = vmatprep.subr.mxu0 %v6465_v13  ;;  %5623 = vmatprep.subr.mxu1 %v7709_v1 }
  0xc3   :  { %579 = vmatpush1.msra.mxu0 %v6474_v15  ;;  %5624 = vmatpush3.msra.mxu1 %v6476_v16 }
  0xc4   :  { %580 = vmatprep.subr.mxu0 %v6480_v17  ;;  %5625 = vmatprep.subr.mxu1 %v7709_v1 }
  0xc5   :  { %581 = vmatpush1.msra.mxu0 %v6483_v18  ;;  %5626 = vmatpush3.msra.mxu1 %v6485_v19 }
  0xc6   :  { %582 = vmatprep.subr.mxu0 %v6492_v21  ;;  %5627 = vmatprep.subr.mxu1 %v7709_v1 }
  0xc7   :  { %583 = vmatpush1.msra.mxu0 %v6496_v22  ;;  %5628 = vmatpush3.msra.mxu1 %v6500_v23 }
  0xc8   :  { %584 = vmatprep.subr.mxu0 %v6502_v24  ;;  %5629 = vmatprep.subr.mxu1 %v7709_v1 }
  0xc9   :  { %585 = vmatpush1.msra.mxu0 %v6505_v25  ;;  %618 = vmatprep.mubr.f32.mxu0 %v7709_v1 }
  0xca   :  { %5630 = vmatpush3.msra.mxu1 %v6509_v26  ;;  %5631 = vmatprep.mubr.msk.f32.mxu1 %vm6347_vm0, %v7709_v1 }
  0xcb   :  { %5291 = vmatmul.mubr.msk.f32.vlgmr.msra.gmra.mxu0 %vm229_vm2, %v134_v44  ;;  %5632 = vmatmul.mubr.msk.f32.vlgmr.msra.gmra.mxu1 %vm229_vm2, %v134_v44 }
  0xcc   :  { %722 = vmatprep.subr.mxu0 %v6511_v27  ;;  %5634 = vmatprep.subr.mxu1 %v7709_v1 }
  0xcd   :  { %723 = vmatpush1.msra.mxu0 %v6524_v31  ;;  %5635 = vmatpush3.msra.mxu1 %v6526_v32 }
  0xce   :  { %724 = vmatprep.subr.mxu0 %v6529_v34  ;;  %5636 = vmatprep.subr.mxu1 %v7709_v1 }
  0xcf   :  { %725 = vmatpush1.msra.mxu0 %v6533_v35  ;;  %5637 = vmatpush3.msra.mxu1 %v6535_v36 }
  0xd0   :  { %726 = vmatprep.subr.mxu0 %v6539_v37  ;;  %5638 = vmatprep.subr.mxu1 %v7709_v1 }
  0xd1   :  { %727 = vmatpush1.msra.mxu0 %v6543_v38  ;;  %5639 = vmatpush3.msra.mxu1 %v6545_v39 }
  0xd2   :  { %728 = vmatprep.subr.mxu0 %v6549_v40  ;;  %5640 = vmatprep.subr.mxu1 %v7709_v1 }
  0xd3   :  { %729 = vmatpush1.msra.mxu0 %v6553_v41  ;;  %5641 = vmatpush3.msra.mxu1 %v6557_v42 }
  0xd4   :  { %762 = vmatprep.mubr.f32.mxu0 %v7709_v1  ;;  %5642 = vmatprep.mubr.msk.f32.mxu1 %vm6347_vm0, %v7709_v1 }
  0xd5   :  { %5645 = vmatprep.subr.mxu1 %v7709_v1  ;;  %885 = vmatprep.subr.mxu0 %v6626_v45 }
 0x172   :  { %v380_v50 = vpop.f32.mrf.mxu1  ;;  %v309_v51 = vpop.f32.mrf.mxu0 }
 0x174   :  { %v5605_v52 = vpop.f32.mrf.mxu1  ;;  %v311_v53 = vpop.f32.mrf.mxu0 }
 0x17a   :  { %v454_v54 = vpop.f32.mrf.mxu0 }
 0x17b   :  { %v529_v55 = vadd.f32 %v454_v54, %v309_v51  ;;  %v6653_v54 = vld [vmem:[#allocation7 + $0x58] sm:$0xff] }
 0x17c   :  { %v525_v56 = vpop.f32.mrf.mxu1  ;;  %v456_v58 = vpop.f32.mrf.mxu0 }
 0x17d   :  { %v5287_v57 = vmul.f32 -1.442695, %v529_v55  ;;  %v536_v60 = vadd.f32 %v456_v58, %v311_v53  ;;  %v543_v30 = vadd.f32 %v6646_v14, %v525_v56  ;;  %v6651_v53 = vld [vmem:[#allocation7 + $0x48] sm:$0xff]  ;;  %v6655_v55 = vld [vmem:[#allocation7 + $0x38] sm:$0xff]  ;;  %v6663_v56 = vld [vmem:[#allocation7 + $0x40] sm:$0xff] }
 0x17e   :  { %v5616_v59 = vpop.f32.mrf.mxu1  ;;  %v6671_v58 = vld [vmem:[#allocation7 + $0x18] sm:$0xff] }
 0x17f   :  { %6012 = vpow2.f32 %v5287_v57  ;;  %v5288_v61 = vmul.f32 -1.442695, %v536_v60  ;;  %v6667_v57 = vld [vmem:[#allocation7 + $0x20] sm:$0xff]  ;;  %v6673_v59 = vld [vmem:[#allocation7 + $0x28] sm:$0xff] }
 0x180   :  { %v6677_v60 = vld [vmem:[#allocation7 + $0x8] sm:$0xff] }
 0x181   :  { %6014 = vpow2.f32 %v5288_v61  ;;  %v6681_v61 = vld [vmem:[#allocation7] sm:$0xff] }
 0x18b   :  { %v6641_v62 = vpop.f32.mrf.mxu1 }
 0x18c   :  { %v6013_v63 = vpop.eup %6012 }
 0x18d   :  { %v533_v0 = vadd.f32 1.0, %v6013_v63  ;;  %v5633_v2 = vpop.f32.mrf.mxu1  ;;  %v6685_v63 = vld [vmem:[#allocation7 + $0x10] sm:$0xff] }
 0x18e   :  { %v6015_v3 = vpop.eup %6014  ;;  %v6696_v2 = vld [vmem:[#allocation8 + $0x48] sm:$0xff] }
 0x18f   :  { %6016 = vrcp.f32 %v533_v0  ;;  %v540_v20 = vadd.f32 1.0, %v6015_v3  ;;  %v6691_v0 = vld [vmem:[#allocation8 + $0x50] sm:$0xff]  ;;  %v6702_v3 = vld [vmem:[#allocation8 + $0x38] sm:$0xff] }
 0x191   :  { %6018 = vrcp.f32 %v540_v20  ;;  %v6704_v20 = vld [vmem:[#allocation8 + $0x58] sm:$0xff] }
 0x19c   :  { %v6017_v33 = vpop.eup %6016 }
 0x19d   :  { %v544_v43 = vmul.f32 %v6017_v33, %v543_v30  ;;  %v6707_v30 = vld [vmem:[#allocation8 + $0x30] sm:$0xff]  ;;  %v6711_v33 = vld [vmem:[#allocation8 + $0x20] sm:$0xff] }
 0x19e   :  { %v6019_v46 = vpop.eup %6018 }
 0x19f   :  { %v545_v44 = vadd.f32 %v544_v43, %v380_v50  ;;  %v547_v47 = vsub.f32 1.0, %v6019_v46  ;;  %v549_v51 = vmul.f32 0.0, %v6019_v46  ;;  %v6661_v50 = vld [vmem:[#allocation7 + $0x30] sm:$0xff]  ;;  %v6714_v43 = vld [vmem:[#allocation8 + $0x40] sm:$0xff]  ;;  %v6721_v46 = vld [vmem:[#allocation8 + $0x8] sm:$0xff] }
 0x1a1   :  { %6020 = vtanh.f32 %v545_v44  ;;  %v6717_v44 = vld [vmem:[#allocation8 + $0x18] sm:$0xff] }
 0x1ae   :  { %v6021_v48 = vpop.eup %6020 }
 0x1af   :  { %v548_v49 = vmul.f32 %v6021_v48, %v547_v47  ;;  %v6724_v47 = vld [vmem:[#allocation8 + $0x28] sm:$0xff]  ;;  %v6727_v48 = vld [vmem:[#allocation8] sm:$0xff] }
 0x1b1   :  { %v6649_v52 = vadd.f32 %v549_v51, %v548_v49  ;;  %v6732_v49 = vld [vmem:[#allocation8 + $0x10] sm:$0xff]  ;;  %v109_v51 = vpop.permute.xlu1 %108 }
 0x1b2   :  { %vm127_vm6 = vcmp.eq.s32.totalorder %v109_v51, %v6521_v29 }
 0x1b3   :  { %5294 = vmatmul.mubr.msk.f32.vlgmr.msra.gmra.mxu0 %vm384_vm5, %v6649_v52  ;;  %5643 = vmatmul.mubr.msk.f32.vlgmr.msra.gmra.mxu1 %vm384_vm5, %v6649_v52  ;;  %v135_v28 = vsel %vm127_vm6, 1.0, %v7709_v1 }
 0x1b4   :  { %886 = vmatpush1.msra.mxu0 %v6651_v53  ;;  %5646 = vmatpush3.msra.mxu1 %v6653_v54 }
 0x1b5   :  { %887 = vmatprep.subr.mxu0 %v6655_v55  ;;  %5647 = vmatprep.subr.mxu1 %v7709_v1 }
 0x1b6   :  { %888 = vmatpush1.msra.mxu0 %v6661_v50  ;;  %5648 = vmatpush3.msra.mxu1 %v6663_v56 }
 0x1b7   :  { %889 = vmatprep.subr.mxu0 %v6667_v57  ;;  %5649 = vmatprep.subr.mxu1 %v7709_v1 }
 0x1b8   :  { %890 = vmatpush1.msra.mxu0 %v6671_v58  ;;  %5650 = vmatpush3.msra.mxu1 %v6673_v59 }
 0x1b9   :  { %891 = vmatprep.subr.mxu0 %v6677_v60  ;;  %5651 = vmatprep.subr.mxu1 %v7709_v1 }
 0x1ba   :  { %892 = vmatpush1.msra.mxu0 %v6681_v61  ;;  %925 = vmatprep.mubr.f32.mxu0 %v7709_v1 }
 0x1bb   :  { %5652 = vmatpush3.msra.mxu1 %v6685_v63  ;;  %5653 = vmatprep.mubr.msk.f32.mxu1 %vm6347_vm0, %v7709_v1 }
 0x1bc   :  { %5298 = vmatmul.mubr.msk.f32.vlgmr.msra.gmra.mxu0 %vm384_vm5, %v6649_v52  ;;  %5654 = vmatmul.mubr.msk.f32.vlgmr.msra.gmra.mxu1 %vm384_vm5, %v6649_v52 }
 0x1bd   :  { %1026 = vmatprep.subr.mxu0 %v6691_v0  ;;  %1066 = vmatprep.mubr.f32.mxu0 %v7709_v1 }
 0x1be   :  { %1027 = vmatpush1.msra.mxu0 %v6696_v2  ;;  %5656 = vmatprep.subr.mxu1 %v7709_v1 }
 0x1bf   :  { %1028 = vmatprep.subr.mxu0 %v6702_v3  ;;  %5657 = vmatpush3.msra.mxu1 %v6704_v20 }
 0x1c0   :  { %1029 = vmatpush1.msra.mxu0 %v6707_v30  ;;  %5658 = vmatprep.subr.mxu1 %v7709_v1 }
 0x1c1   :  { %1030 = vmatprep.subr.mxu0 %v6711_v33  ;;  %5659 = vmatpush3.msra.mxu1 %v6714_v43 }
 0x1c2   :  { %1031 = vmatpush1.msra.mxu0 %v6717_v44  ;;  %5660 = vmatprep.subr.mxu1 %v7709_v1 }
 0x1c3   :  { %1032 = vmatprep.subr.mxu0 %v6721_v46  ;;  %5661 = vmatpush3.msra.mxu1 %v6724_v47 }
 0x1c4   :  { %1033 = vmatpush1.msra.mxu0 %v6727_v48  ;;  %5662 = vmatprep.subr.mxu1 %v7709_v1 }
 0x1c5   :  { %1067 = vmatmul.mubr.f32.vlgmr.msra.gmra.mxu0 %v7709_v1  ;;  %5663 = vmatpush3.msra.mxu1 %v6732_v49 }
 0x1c6   :  { %5664 = vmatprep.mubr.msk.f32.mxu1 %vm6347_vm0, %v7709_v1  ;;  %5302 = vmatprep.subr.msk.mxu0 %vm233_vm1, %v6438_v4 }
 0x1c7   :  { %5665 = vmatmul.mubr.f32.vlgmr.msra.gmra.mxu1 %v7709_v1  ;;  %5667 = vmatprep.subr.mxu1 %v7709_v1 }
 0x1c8   :  { %5303 = vmatpush1.msk.msra.mxu0 %vm233_vm1, %v6440_v5  ;;  %5668 = vmatpush3.msk.msra.mxu1 %vm233_vm1, %v6444_v6 }
 0x1c9   :  { %1188 = vmatprep.subr.mxu0 %v6446_v7  ;;  %5669 = vmatprep.subr.mxu1 %v7709_v1 }
 0x1ca   :  { %1189 = vmatpush1.msra.mxu0 %v6448_v8  ;;  %5670 = vmatpush3.msra.mxu1 %v6454_v9 }
 0x1cb   :  { %1190 = vmatprep.subr.mxu0 %v6456_v10  ;;  %5671 = vmatprep.subr.mxu1 %v7709_v1 }
 0x1cc   :  { %1191 = vmatpush1.msra.mxu0 %v6460_v11  ;;  %5672 = vmatpush3.msra.mxu1 %v6463_v12 }
 0x1cd   :  { %1192 = vmatprep.subr.mxu0 %v6465_v13  ;;  %5673 = vmatprep.subr.mxu1 %v7709_v1 }
 0x1ce   :  { %1193 = vmatpush1.msra.mxu0 %v6474_v15  ;;  %5674 = vmatpush3.msra.mxu1 %v6476_v16 }
 0x1cf   :  { %1194 = vmatprep.subr.mxu0 %v6480_v17  ;;  %5675 = vmatprep.subr.mxu1 %v7709_v1 }
 0x1d0   :  { %1195 = vmatpush1.msra.mxu0 %v6483_v18  ;;  %5676 = vmatpush3.msra.mxu1 %v6485_v19 }
 0x1d1   :  { %1196 = vmatprep.subr.mxu0 %v6492_v21  ;;  %5677 = vmatprep.subr.mxu1 %v7709_v1 }
 0x1d2   :  { %1197 = vmatpush1.msra.mxu0 %v6496_v22  ;;  %5678 = vmatpush3.msra.mxu1 %v6500_v23 }
 0x1d3   :  { %1198 = vmatprep.subr.mxu0 %v6502_v24  ;;  %5679 = vmatprep.subr.mxu1 %v7709_v1 }
 0x1d4   :  { %1199 = vmatpush1.msra.mxu0 %v6505_v25  ;;  %1232 = vmatprep.mubr.f32.mxu0 %v7709_v1 }
 0x1d5   :  { %5680 = vmatpush3.msra.mxu1 %v6509_v26  ;;  %5681 = vmatprep.mubr.msk.f32.mxu1 %vm6347_vm0, %v7709_v1 }
 0x1d6   :  { %1336 = vmatprep.subr.mxu0 %v6511_v27  ;;  %5684 = vmatprep.subr.mxu1 %v7709_v1 }
 0x1d7   :  { %5304 = vmatmul.mubr.msk.f32.vlgmr.msra.gmra.mxu0 %vm229_vm2, %v135_v28  ;;  %5682 = vmatmul.mubr.msk.f32.vlgmr.msra.gmra.mxu1 %vm229_vm2, %v135_v28  ;;  %v620_v28 = vpop.f32.mrf.mxu0 }
 0x1d8   :  { %1337 = vmatpush1.msra.mxu0 %v6524_v31  ;;  %5685 = vmatpush3.msra.mxu1 %v6526_v32 }
 0x1d9   :  { %1338 = vmatprep.subr.mxu0 %v6529_v34  ;;  %5686 = vmatprep.subr.mxu1 %v7709_v1  ;;  %v622_v51 = vpop.f32.mrf.mxu0 }
 0x1da   :  { %1339 = vmatpush1.msra.mxu0 %v6533_v35  ;;  %5687 = vmatpush3.msra.mxu1 %v6535_v36 }
 0x1db   :  { %1340 = vmatprep.subr.mxu0 %v6539_v37  ;;  %5688 = vmatprep.subr.mxu1 %v7709_v1 }
 0x1dc   :  { %1341 = vmatpush1.msra.mxu0 %v6543_v38  ;;  %5689 = vmatpush3.msra.mxu1 %v6545_v39 }
 0x1dd   :  { %1342 = vmatprep.subr.mxu0 %v6549_v40  ;;  %5690 = vmatprep.subr.mxu1 %v7709_v1 }
 0x1de   :  { %1343 = vmatpush1.msra.mxu0 %v6553_v41  ;;  %5691 = vmatpush3.msra.mxu1 %v6557_v42  ;;  %v7815_v41 = vlaneseq }
 0x1df   :  { %1376 = vmatprep.mubr.f32.mxu0 %v7709_v1  ;;  %5692 = vmatprep.mubr.msk.f32.mxu1 %vm6347_vm0, %v7709_v1 }
 0x1e0   :  { %1499 = vmatprep.subr.mxu0 %v6626_v45  ;;  %5695 = vmatprep.subr.mxu1 %v7709_v1  ;;  %v215_v34 = vshrl.u32 %v7815_v41, 7  ;;  %v212_v45 = vld [vmem:[%s7689_s6] sm:$0x7] }
 0x1e2   :  { %v216_v32 = vsub.s32 0, %v215_v34 }
 0x1e4   :  { %v6806_v25 = vrot.slane %v212_v45, %v216_v32 }
 0x1e6   :  { %7816 = vst [vmem:[#allocation35_spill] sm:$0xff] %v6806_v25 }
 0x273   :  { %v764_v39 = vpop.f32.mrf.mxu0  ;;  %v835_v38 = vpop.f32.mrf.mxu1 }
 0x274   :  { %v839_v40 = vadd.f32 %v764_v39, %v620_v28  ;;  %v220_v39 = vsub.s32 1, %v215_v34 }
 0x275   :  { %v5644_v37 = vpop.f32.mrf.mxu1  ;;  %v766_v35 = vpop.f32.mrf.mxu0 }
 0x276   :  { %v5296_v36 = vmul.f32 -1.442695, %v839_v40  ;;  %v846_v42 = vadd.f32 %v766_v35, %v622_v51  ;;  %v6809_v51 = vrot.slane %v212_v45, %v220_v39 }
 0x278   :  { %6022 = vpow2.f32 %v5296_v36  ;;  %v5297_v27 = vmul.f32 -1.442695, %v846_v42 }
 0x27a   :  { %6024 = vpow2.f32 %v5297_v27 }
 0x27c   :  { %v998_v31 = vpop.f32.mrf.mxu1  ;;  %v927_v26 = vpop.f32.mrf.mxu0 }
 0x27d   :  { %v928_v40 = vadd.f32 %v927_v26, %v6806_v25  ;;  %v853_v26 = vadd.f32 %v6646_v14, %v835_v38 }
 0x27e   :  { %v5655_v1 = vpop.f32.mrf.mxu1  ;;  %v929_v37 = vpop.f32.mrf.mxu0 }
 0x27f   :  { %v930_v1 = vadd.f32 %v929_v37, %v6809_v51 }
 0x285   :  { %v6023_v28 = vpop.eup %6022  ;;  %v1068_v41 = vpop.f32.mrf.mxu0 }
 0x286   :  { %v843_v36 = vadd.f32 1.0, %v6023_v28  ;;  %v1143_v35 = vadd.f32 %v1068_v41, %v928_v40 }
 0x287   :  { %v1139_v24 = vpop.f32.mrf.mxu1  ;;  %v1070_v42 = vpop.f32.mrf.mxu0 }
 0x288   :  { %6026 = vrcp.f32 %v843_v36  ;;  %v5300_v23 = vmul.f32 -1.442695, %v1143_v35  ;;  %v1150_v32 = vadd.f32 %v1070_v42, %v930_v1  ;;  %v6025_v27 = vpop.eup %6024 }
 0x289   :  { %v5666_v22 = vpop.f32.mrf.mxu1  ;;  %v850_v21 = vadd.f32 1.0, %v6025_v27 }
 0x28a   :  { %6028 = vpow2.f32 %v5300_v23  ;;  %v5301_v29 = vmul.f32 -1.442695, %v1150_v32  ;;  %v224_v22 = vsub.s32 2, %v215_v34  ;;  %v6817_v23 = vld [vmem:[%s7690_s7] ss:$0 sm:$0xff] }
 0x28c   :  { %6030 = vpow2.f32 %v5301_v29  ;;  %v6819_v35 = vrot.slane %v212_v45, %v224_v22  ;;  %v7832_v22 = vld [vmem:[#allocation29_spill] sm:$0xff] }
 0x28d   :  { %6032 = vrcp.f32 %v850_v21 }
 0x28e   :  { %v999_v34 = vadd.f32 %v998_v31, %v6819_v35 }
 0x295   :  { %v6027_v25 = vpop.eup %6026 }
 0x296   :  { %v854_v28 = vmul.f32 %v6027_v25, %v853_v26  ;;  %v1157_v25 = vadd.f32 %v6817_v23, %v1139_v24  ;;  %v7817_v24 = vmov 0.0  }
 0x297   :  { %v6029_v39 = vpop.eup %6028 }
 0x298   :  { %v855_v40 = vadd.f32 %v854_v28, %v6641_v62  ;;  %v1147_v41 = vadd.f32 1.0, %v6029_v39 }
 0x299   :  { %v6031_v36 = vpop.eup %6030 }
 0x29a   :  { %6034 = vtanh.f32 %v855_v40  ;;  %v6033_v37 = vpop.eup %6032  ;;  %v1154_v38 = vadd.f32 1.0, %v6031_v36  ;;  %v7833_v36 = vld [vmem:[#allocation30_spill] sm:$0xff] }
 0x29b   :  { %6036 = vrcp.f32 %v1147_v41  ;;  %v857_v21 = vsub.f32 1.0, %v6033_v37  ;;  %v859_v1 = vmul.f32 %v6033_v37, %v6649_v52  ;;  %v7831_v41 = vld [vmem:[#allocation28_spill] sm:$0xff]  ;;  %v7834_v37 = vld [vmem:[#allocation31_spill] sm:$0xff] }
 0x29c   :  { %6038 = vrcp.f32 %v1154_v38  ;;  %v7835_v38 = vld [vmem:[#allocation32_spill] sm:$0xff] }
 0x2a7   :  { %v6035_v29 = vpop.eup %6034 }
 0x2a8   :  { %v6037_v42 = vpop.eup %6036  ;;  %v858_v62 = vmul.f32 %v6035_v29, %v857_v21  ;;  %v7837_v21 = vld [vmem:[#allocation34_spill] sm:$0xff]  ;;  %v1305_v29 = vpop.f32.mrf.mxu1 }
 0x2a9   :  { %v1158_v32 = vmul.f32 %v6037_v42, %v1157_v25  ;;  %v6039_v31 = vpop.eup %6038  ;;  %v7836_v25 = vld [vmem:[#allocation33_spill] sm:$0xff] }
 0x2aa   :  { %v6824_v27 = vadd.f32 %v859_v1, %v858_v62  ;;  %v1161_v45 = vsub.f32 1.0, %v6039_v31  ;;  %v1163_v39 = vmul.f32 0.0, %v6039_v31  ;;  %v5683_v42 = vpop.f32.mrf.mxu1  ;;  %v1234_v62 = vpop.f32.mrf.mxu0 }
 0x2ab   :  { %v1159_v26 = vadd.f32 %v1158_v32, %v999_v34 }
 0x2ac   :  { %5307 = vmatmul.mubr.msk.f32.vlgmr.msra.gmra.mxu0 %vm384_vm5, %v6824_v27  ;;  %5693 = vmatmul.mubr.msk.f32.vlgmr.msra.gmra.mxu1 %vm384_vm5, %v6824_v27  ;;  %v1236_v1 = vpop.f32.mrf.mxu0 }
 0x2ad   :  { %6040 = vtanh.f32 %v1159_v26  ;;  %1500 = vmatpush1.msra.mxu0 %v6651_v53  ;;  %5696 = vmatpush3.msra.mxu1 %v6653_v54 }
 0x2ae   :  { %1501 = vmatprep.subr.mxu0 %v6655_v55  ;;  %5697 = vmatprep.subr.mxu1 %v7817_v24 }
 0x2af   :  { %1502 = vmatpush1.msra.mxu0 %v6661_v50  ;;  %5698 = vmatpush3.msra.mxu1 %v6663_v56 }
 0x2b0   :  { %1503 = vmatprep.subr.mxu0 %v6667_v57  ;;  %5699 = vmatprep.subr.mxu1 %v7817_v24 }
 0x2b1   :  { %1504 = vmatpush1.msra.mxu0 %v6671_v58  ;;  %5700 = vmatpush3.msra.mxu1 %v6673_v59 }
 0x2b2   :  { %1505 = vmatprep.subr.mxu0 %v6677_v60  ;;  %5701 = vmatprep.subr.mxu1 %v7817_v24 }
 0x2b3   :  { %1506 = vmatpush1.msra.mxu0 %v6681_v61  ;;  %1539 = vmatprep.mubr.f32.mxu0 %v7817_v24 }
 0x2b4   :  { %5702 = vmatpush3.msra.mxu1 %v6685_v63  ;;  %5703 = vmatprep.mubr.msk.f32.mxu1 %vm6347_vm0, %v7817_v24 }
 0x2b5   :  { %5311 = vmatmul.mubr.msk.f32.vlgmr.msra.gmra.mxu0 %vm384_vm5, %v6824_v27  ;;  %5704 = vmatmul.mubr.msk.f32.vlgmr.msra.gmra.mxu1 %vm384_vm5, %v6824_v27 }
 0x2b6   :  { %1643 = vmatprep.subr.mxu0 %v6691_v0  ;;  %5706 = vmatprep.subr.mxu1 %v7817_v24 }
 0x2b7   :  { %1644 = vmatpush1.msra.mxu0 %v6696_v2  ;;  %5707 = vmatpush3.msra.mxu1 %v6704_v20 }
 0x2b8   :  { %1645 = vmatprep.subr.mxu0 %v6702_v3  ;;  %5708 = vmatprep.subr.mxu1 %v7817_v24 }
 0x2b9   :  { %1646 = vmatpush1.msra.mxu0 %v6707_v30  ;;  %5709 = vmatpush3.msra.mxu1 %v6714_v43 }
 0x2ba   :  { %v6041_v52 = vpop.eup %6040  ;;  %1647 = vmatprep.subr.mxu0 %v6711_v33  ;;  %5710 = vmatprep.subr.mxu1 %v7817_v24 }
 0x2bb   :  { %1648 = vmatpush1.msra.mxu0 %v6717_v44  ;;  %5711 = vmatpush3.msra.mxu1 %v6724_v47  ;;  %v1162_v28 = vmul.f32 %v6041_v52, %v1161_v45 }
 0x2bc   :  { %1649 = vmatprep.subr.mxu0 %v6721_v46  ;;  %5712 = vmatprep.subr.mxu1 %v7817_v24 }
 0x2bd   :  { %1650 = vmatpush1.msra.mxu0 %v6727_v48  ;;  %1683 = vmatprep.mubr.f32.mxu0 %v7817_v24  ;;  %v6867_v40 = vadd.f32 %v1163_v39, %v1162_v28 }
 0x2be   :  { %5713 = vmatpush3.msra.mxu1 %v6732_v49  ;;  %5714 = vmatprep.mubr.msk.f32.mxu1 %vm6347_vm0, %v7817_v24 }
 0x2bf   :  { %5313 = vmatmul.mubr.msk.f32.vlgmr.msra.gmra.mxu0 %vm384_vm5, %v6867_v40  ;;  %5715 = vmatmul.mubr.msk.f32.vlgmr.msra.gmra.mxu1 %vm384_vm5, %v6867_v40 }
 0x2c0   :  { %5317 = vmatprep.subr.msk.mxu0 %vm233_vm1, %v6438_v4  ;;  %5717 = vmatprep.subr.mxu1 %v7817_v24  ;;  %v112_v4 = vpop.permute.xlu1 %111 }
 0x2c1   :  { %5318 = vmatpush1.msk.msra.mxu0 %vm233_vm1, %v6440_v5  ;;  %5718 = vmatpush3.msk.msra.mxu1 %vm233_vm1, %v6444_v6  ;;  %v7818_v5 = vld [vmem:[#allocation15_spill] sm:$0xff]  ;;  %v7819_v6 = vld [vmem:[#allocation22_spill] sm:$0xff] }
 0x2c2   :  { %1805 = vmatprep.subr.mxu0 %v6446_v7  ;;  %5719 = vmatprep.subr.mxu1 %v7817_v24  ;;  %vm128_vm7 = vcmp.eq.s32.totalorder %v112_v4, %v7819_v6  ;;  %v7820_v7 = vld [vmem:[#allocation16_spill] sm:$0xff] }
 0x2c3   :  { %1806 = vmatpush1.msra.mxu0 %v6448_v8  ;;  %5720 = vmatpush3.msra.mxu1 %v6454_v9  ;;  %v7821_v8 = vld [vmem:[#allocation17_spill] sm:$0xff]  ;;  %v7822_v9 = vld [vmem:[#allocation18_spill] sm:$0xff] }
 0x2c4   :  { %1807 = vmatprep.subr.mxu0 %v6456_v10  ;;  %5721 = vmatprep.subr.mxu1 %v7817_v24  ;;  %v7823_v10 = vld [vmem:[#allocation19_spill] sm:$0xff] }
 0x2c5   :  { %1808 = vmatpush1.msra.mxu0 %v6460_v11  ;;  %5722 = vmatpush3.msra.mxu1 %v6463_v12  ;;  %v136_v11 = vsel %vm128_vm7, 1.0, %v7817_v24  ;;  %v7824_v12 = vld [vmem:[#allocation20_spill] sm:$0xff] }
 0x2c6   :  { %1809 = vmatprep.subr.mxu0 %v6465_v13  ;;  %5723 = vmatprep.subr.mxu1 %v7817_v24  ;;  %v7825_v13 = vld [vmem:[#allocation21_spill] sm:$0xff] }
 0x2c7   :  { %1810 = vmatpush1.msra.mxu0 %v6474_v15  ;;  %5724 = vmatpush3.msra.mxu1 %v6476_v16  ;;  %v7826_v15 = vld [vmem:[#allocation23_spill] sm:$0xff]  ;;  %v7827_v16 = vld [vmem:[#allocation24_spill] sm:$0xff] }
 0x2c8   :  { %1811 = vmatprep.subr.mxu0 %v6480_v17  ;;  %5725 = vmatprep.subr.mxu1 %v7817_v24  ;;  %v7828_v17 = vld [vmem:[#allocation25_spill] sm:$0xff] }
 0x2c9   :  { %1812 = vmatpush1.msra.mxu0 %v6483_v18  ;;  %5726 = vmatpush3.msra.mxu1 %v6485_v19  ;;  %v7829_v18 = vld [vmem:[#allocation26_spill] sm:$0xff]  ;;  %v7830_v19 = vld [vmem:[#allocation27_spill] sm:$0xff] }
 0x2ca   :  { %1813 = vmatprep.subr.mxu0 %v7818_v5  ;;  %5727 = vmatprep.subr.mxu1 %v7817_v24 }
 0x2cb   :  { %1814 = vmatpush1.msra.mxu0 %v7820_v7  ;;  %5728 = vmatpush3.msra.mxu1 %v7821_v8 }
 0x2cc   :  { %1815 = vmatprep.subr.mxu0 %v7822_v9  ;;  %5729 = vmatprep.subr.mxu1 %v7817_v24 }
 0x2cd   :  { %1816 = vmatpush1.msra.mxu0 %v7823_v10  ;;  %1849 = vmatprep.mubr.f32.mxu0 %v7817_v24  ;;  %v7838_v10 = vld [vmem:[#allocation35_spill] sm:$0xff] }
 0x2ce   :  { %5730 = vmatpush3.msra.mxu1 %v7824_v12  ;;  %5731 = vmatprep.mubr.msk.f32.mxu1 %vm6347_vm0, %v7817_v24 }
 0x2cf   :  { %5319 = vmatmul.mubr.msk.f32.vlgmr.msra.gmra.mxu0 %vm229_vm2, %v136_v11  ;;  %5732 = vmatmul.mubr.msk.f32.vlgmr.msra.gmra.mxu1 %vm229_vm2, %v136_v11 }
 0x2d0   :  { %1953 = vmatprep.subr.mxu0 %v7825_v13  ;;  %5734 = vmatprep.subr.mxu1 %v7817_v24 }
 0x2d1   :  { %1954 = vmatpush1.msra.mxu0 %v7826_v15  ;;  %5735 = vmatpush3.msra.mxu1 %v7827_v16 }
 0x2d2   :  { %1955 = vmatprep.subr.mxu0 %v7828_v17  ;;  %5736 = vmatprep.subr.mxu1 %v7817_v24 }
 0x2d3   :  { %1956 = vmatpush1.msra.mxu0 %v7829_v18  ;;  %5737 = vmatpush3.msra.mxu1 %v7830_v19 }
 0x2d4   :  { %1957 = vmatprep.subr.mxu0 %v7831_v41  ;;  %5738 = vmatprep.subr.mxu1 %v7817_v24 }
 0x2d5   :  { %1958 = vmatpush1.msra.mxu0 %v7832_v22  ;;  %5739 = vmatpush3.msra.mxu1 %v7833_v36 }
 0x2d6   :  { %1959 = vmatprep.subr.mxu0 %v7834_v37  ;;  %5740 = vmatprep.subr.mxu1 %v7817_v24 }
 0x2d7   :  { %1960 = vmatpush1.msra.mxu0 %v7835_v38  ;;  %5741 = vmatpush3.msra.mxu1 %v7836_v25 }
 0x2d8   :  { %1993 = vmatprep.mubr.f32.mxu0 %v7817_v24  ;;  %5742 = vmatprep.mubr.msk.f32.mxu1 %vm6347_vm0, %v7817_v24 }
 0x2d9   :  { %2116 = vmatprep.subr.mxu0 %v7837_v21  ;;  %5745 = vmatprep.subr.mxu1 %v7817_v24 }
 0x36c   :  { %v1378_v34 = vpop.f32.mrf.mxu0  ;;  %v1449_v32 = vpop.f32.mrf.mxu1 }
 0x36d   :  { %v1453_v26 = vadd.f32 %v1378_v34, %v1234_v62  ;;  %v1467_v25 = vadd.f32 %v6646_v14, %v1449_v32 }
 0x36e   :  { %v5694_v31 = vpop.f32.mrf.mxu1  ;;  %v1380_v52 = vpop.f32.mrf.mxu0 }
 0x36f   :  { %v5309_v45 = vmul.f32 -1.442695, %v1453_v26  ;;  %v1460_v28 = vadd.f32 %v1380_v52, %v1236_v1 }
 0x371   :  { %6042 = vpow2.f32 %v5309_v45  ;;  %v5310_v4 = vmul.f32 -1.442695, %v1460_v28 }
 0x373   :  { %6044 = vpow2.f32 %v5310_v4 }
 0x375   :  { %v1612_v39 = vpop.f32.mrf.mxu1  ;;  %v1541_v7 = vpop.f32.mrf.mxu0 }
 0x376   :  { %v1542_v11 = vadd.f32 %v1541_v7, %v7838_v10 }
 0x377   :  { %v5705_v5 = vpop.f32.mrf.mxu1  ;;  %v1543_v8 = vpop.f32.mrf.mxu0 }
 0x378   :  { %v1544_v41 = vadd.f32 %v1543_v8, %v6809_v51 }
 0x37e   :  { %v6043_v9 = vpop.eup %6042 }
 0x37f   :  { %v1457_v12 = vadd.f32 1.0, %v6043_v9  ;;  %v1685_v13 = vpop.f32.mrf.mxu0  ;;  %v1756_v15 = vpop.f32.mrf.mxu1 }
 0x380   :  { %v1760_v16 = vadd.f32 %v1685_v13, %v1542_v11  ;;  %v6045_v36 = vpop.eup %6044  ;;  %v1774_v8 = vadd.f32 %v6817_v23, %v1756_v15 }
 0x381   :  { %6046 = vrcp.f32 %v1457_v12  ;;  %v5716_v17 = vpop.f32.mrf.mxu1  ;;  %v1687_v19 = vpop.f32.mrf.mxu0  ;;  %v1464_v38 = vadd.f32 1.0, %v6045_v36  ;;  %v1613_v12 = vadd.f32 %v1612_v39, %v6819_v35  ;;  %v7009_v36 = vld [vmem:[#allocation2 + $0x80] sm:$0xff] }
 0x382   :  { %v5315_v18 = vmul.f32 -1.442695, %v1760_v16  ;;  %v1767_v22 = vadd.f32 %v1687_v19, %v1544_v41  ;;  %v7001_v41 = vld [vmem:[#allocation2 + $0x90] sm:$0x3] }
 0x384   :  { %6048 = vpow2.f32 %v5315_v18  ;;  %v5316_v37 = vmul.f32 -1.442695, %v1767_v22  ;;  %v7005_v22 = vld [vmem:[#allocation2 + $0xa0] sm:$0x3] }
 0x386   :  { %6050 = vpow2.f32 %v5316_v37  ;;  %v7013_v37 = vld [vmem:[#allocation2 + $0x78] sm:$0xff] }
 0x387   :  { %6052 = vrcp.f32 %v1464_v38  ;;  %v7016_v38 = vld [vmem:[#allocation2 + $0x88] sm:$0xff] }
 0x38e   :  { %v6047_v42 = vpop.eup %6046 }
 0x38f   :  { %v1468_v62 = vmul.f32 %v6047_v42, %v1467_v25  ;;  %v6938_v1 = vpop.f32.mrf.mxu1  ;;  %v7019_v25 = vld [vmem:[#allocation2 + $0x68] sm:$0xff]  ;;  %v7023_v42 = vld [vmem:[#allocation2 + $0x60] sm:$0xff] }
 0x391   :  { %v6049_v34 = vpop.eup %6048  ;;  %v1469_v26 = vadd.f32 %v1468_v62, %v1305_v29  ;;  %v5733_v31 = vpop.f32.mrf.mxu1  ;;  %v7026_v62 = vld [vmem:[#allocation2 + $0x70] sm:$0xff] }
 0x392   :  { %v1764_v45 = vadd.f32 1.0, %v6049_v34  ;;  %v7029_v34 = vld [vmem:[#allocation2 + $0x50] sm:$0xff]  ;;  %v7036_v31 = vld [vmem:[#allocation2 + $0x58] sm:$0xff] }
 0x393   :  { %6054 = vtanh.f32 %v1469_v26  ;;  %v6051_v52 = vpop.eup %6050  ;;  %v7033_v26 = vld [vmem:[#allocation2 + $0x48] sm:$0xff] }
 0x394   :  { %6056 = vrcp.f32 %v1764_v45  ;;  %v6053_v28 = vpop.eup %6052  ;;  %v1771_v4 = vadd.f32 1.0, %v6051_v52  ;;  %v115_v45 = vpop.permute.xlu0 %114  ;;  %v7039_v52 = vld [vmem:[#allocation2 + $0x38] sm:$0xff] }
 0x395   :  { %v1471_v5 = vsub.f32 1.0, %v6053_v28  ;;  %v1473_v11 = vmul.f32 %v6053_v28, %v6824_v27  ;;  %7839 = vst [vmem:[#allocation15_spill] sm:$0xff] %v7039_v52  ;;  %v7043_v28 = vld [vmem:[#allocation2 + $0x30] sm:$0xff]  ;;  %vm129_vm8 = vcmp.eq.s32.totalorder %v115_v45, %v7819_v6  ;;  %v7100_v45 = vld [vmem:[#allocation5 + $0x18] sm:$0xff] }
 0x396   :  { %6058 = vrcp.f32 %v1771_v4  ;;  %7840 = vst [vmem:[#allocation16_spill] sm:$0xff] %v7043_v28  ;;  %v7046_v4 = vld [vmem:[#allocation2 + $0x40] sm:$0xff]  ;;  %7855 = vst [vmem:[#allocation32_spill] sm:$0xff] %v7100_v45 }
 0x397   :  { %7841 = vst [vmem:[#allocation17_spill] sm:$0xff] %v7046_v4 }
 0x3a0   :  { %v6055_v7 = vpop.eup %6054 }
 0x3a1   :  { %v6057_v32 = vpop.eup %6056  ;;  %v1472_v9 = vmul.f32 %v6055_v7, %v1471_v5  ;;  %v7049_v5 = vld [vmem:[#allocation2 + $0x20] sm:$0xff]  ;;  %v7054_v7 = vld [vmem:[#allocation2 + $0x18] sm:$0xff] }
 0x3a2   :  { %v1775_v13 = vmul.f32 %v6057_v32, %v1774_v8  ;;  %7842 = vst [vmem:[#allocation18_spill] sm:$0xff] %v7049_v5  ;;  %7843 = vst [vmem:[#allocation19_spill] sm:$0xff] %v7054_v7  ;;  %v7057_v8 = vld [vmem:[#allocation2 + $0x28] sm:$0xff] }
 0x3a3   :  { %v6943_v29 = vadd.f32 %v1473_v11, %v1472_v9  ;;  %v6059_v27 = vpop.eup %6058  ;;  %7844 = vst [vmem:[#allocation20_spill] sm:$0xff] %v7057_v8  ;;  %v7060_v32 = vld [vmem:[#allocation2 + $0x8] sm:$0xff]  ;;  %v7064_v9 = vld [vmem:[#allocation2] sm:$0xff]  ;;  %v137_v11 = vsel %vm129_vm8, 1.0, %v7817_v24 }
 0x3a4   :  { %v1776_v16 = vadd.f32 %v1775_v13, %v1613_v12  ;;  %v1778_v39 = vsub.f32 1.0, %v6059_v27  ;;  %v1780_v18 = vmul.f32 %v6059_v27, %v6867_v40  ;;  %v6996_v40 = vld [vmem:[#allocation2 + $0x98] sm:$0x3]  ;;  %7845 = vst [vmem:[#allocation21_spill] sm:$0xff] %v7060_v32  ;;  %7846 = vst [vmem:[#allocation23_spill] sm:$0xff] %v7064_v9  ;;  %v7069_v12 = vld [vmem:[#allocation2 + $0x10] sm:$0xff] }
 0x3a5   :  { %5322 = vmatmul.mubr.msk.f32.vlgmr.msra.gmra.mxu0 %vm384_vm5, %v6943_v29  ;;  %5743 = vmatmul.mubr.msk.f32.vlgmr.msra.gmra.mxu1 %vm384_vm5, %v6943_v29  ;;  %7847 = vst [vmem:[#allocation24_spill] sm:$0xff] %v7069_v12  ;;  %v7076_v13 = vld [vmem:[#allocation5 + $0x50] sm:$0xff]  ;;  %v7083_v27 = vld [vmem:[#allocation5 + $0x58] sm:$0xff] }
 0x3a6   :  { %6060 = vtanh.f32 %v1776_v16  ;;  %2117 = vmatpush1.msra.mxu0 %v6651_v53  ;;  %5746 = vmatpush3.msra.mxu1 %v6653_v54  ;;  %7848 = vst [vmem:[#allocation25_spill] sm:$0xff] %v7076_v13  ;;  %v7080_v16 = vld [vmem:[#allocation5 + $0x48] sm:$0xff]  ;;  %7850 = vst [vmem:[#allocation27_spill] sm:$0xff] %v7083_v27 }
 0x3a7   :  { %2118 = vmatprep.subr.mxu0 %v6655_v55  ;;  %5747 = vmatprep.subr.mxu1 %v7817_v24  ;;  %7849 = vst [vmem:[#allocation26_spill] sm:$0xff] %v7080_v16 }
 0x3a8   :  { %2119 = vmatpush1.msra.mxu0 %v6661_v50  ;;  %5748 = vmatpush3.msra.mxu1 %v6663_v56 }
 0x3a9   :  { %2120 = vmatprep.subr.mxu0 %v6667_v57  ;;  %5749 = vmatprep.subr.mxu1 %v7817_v24 }
 0x3aa   :  { %2121 = vmatpush1.msra.mxu0 %v6671_v58  ;;  %5750 = vmatpush3.msra.mxu1 %v6673_v59 }
 0x3ab   :  { %2122 = vmatprep.subr.mxu0 %v6677_v60  ;;  %5751 = vmatprep.subr.mxu1 %v7817_v24 }
 0x3ac   :  { %2123 = vmatpush1.msra.mxu0 %v6681_v61  ;;  %2156 = vmatprep.mubr.f32.mxu0 %v7817_v24 }
 0x3ad   :  { %5752 = vmatpush3.msra.mxu1 %v6685_v63  ;;  %5753 = vmatprep.mubr.msk.f32.mxu1 %vm6347_vm0, %v7817_v24 }
 0x3ae   :  { %5326 = vmatmul.mubr.msk.f32.vlgmr.msra.gmra.mxu0 %vm384_vm5, %v6943_v29  ;;  %5754 = vmatmul.mubr.msk.f32.vlgmr.msra.gmra.mxu1 %vm384_vm5, %v6943_v29 }
 0x3af   :  { %2260 = vmatprep.subr.mxu0 %v6691_v0  ;;  %5756 = vmatprep.subr.mxu1 %v7817_v24 }
 0x3b0   :  { %2261 = vmatpush1.msra.mxu0 %v6696_v2  ;;  %5757 = vmatpush3.msra.mxu1 %v6704_v20 }
 0x3b1   :  { %2262 = vmatprep.subr.mxu0 %v6702_v3  ;;  %5758 = vmatprep.subr.mxu1 %v7817_v24 }
 0x3b2   :  { %2263 = vmatpush1.msra.mxu0 %v6707_v30  ;;  %5759 = vmatpush3.msra.mxu1 %v6714_v43 }
 0x3b3   :  { %v6061_v15 = vpop.eup %6060  ;;  %2264 = vmatprep.subr.mxu0 %v6711_v33  ;;  %5760 = vmatprep.subr.mxu1 %v7817_v24 }
 0x3b4   :  { %2265 = vmatpush1.msra.mxu0 %v6717_v44  ;;  %5761 = vmatpush3.msra.mxu1 %v6724_v47  ;;  %v1779_v17 = vmul.f32 %v6061_v15, %v1778_v39  ;;  %v7086_v39 = vld [vmem:[#allocation5 + $0x38] sm:$0xff]  ;;  %v7090_v15 = vld [vmem:[#allocation5 + $0x30] sm:$0xff] }
 0x3b5   :  { %2266 = vmatprep.subr.mxu0 %v6721_v46  ;;  %5762 = vmatprep.subr.mxu1 %v7817_v24  ;;  %7851 = vst [vmem:[#allocation28_spill] sm:$0xff] %v7086_v39  ;;  %7852 = vst [vmem:[#allocation29_spill] sm:$0xff] %v7090_v15 }
 0x3b6   :  { %2267 = vmatpush1.msra.mxu0 %v6727_v48  ;;  %2300 = vmatprep.mubr.f32.mxu0 %v7817_v24  ;;  %v6987_v19 = vadd.f32 %v1780_v18, %v1779_v17  ;;  %v7093_v17 = vld [vmem:[#allocation5 + $0x40] sm:$0xff] }
 0x3b7   :  { %5763 = vmatpush3.msra.mxu1 %v6732_v49  ;;  %5764 = vmatprep.mubr.msk.f32.mxu1 %vm6347_vm0, %v7817_v24  ;;  %7853 = vst [vmem:[#allocation30_spill] sm:$0xff] %v7093_v17  ;;  %v7096_v18 = vld [vmem:[#allocation5 + $0x20] sm:$0xff] }
 0x3b8   :  { %5328 = vmatmul.mubr.msk.f32.vlgmr.msra.gmra.mxu0 %vm384_vm5, %v6987_v19  ;;  %5765 = vmatmul.mubr.msk.f32.vlgmr.msra.gmra.mxu1 %vm384_vm5, %v6987_v19  ;;  %7854 = vst [vmem:[#allocation31_spill] sm:$0xff] %v7096_v18 }
 0x3b9   :  { %5332 = vmatprep.subr.msk.mxu0 %vm233_vm1, %v6996_v40  ;;  %5767 = vmatprep.subr.mxu1 %v7817_v24 }
 0x3ba   :  { %5333 = vmatpush1.msk.msra.mxu0 %vm233_vm1, %v7001_v41  ;;  %5768 = vmatpush3.msk.msra.mxu1 %vm233_vm1, %v7005_v22 }
 0x3bb   :  { %2422 = vmatprep.subr.mxu0 %v7009_v36  ;;  %5769 = vmatprep.subr.mxu1 %v7817_v24 }
 0x3bc   :  { %2423 = vmatpush1.msra.mxu0 %v7013_v37  ;;  %5770 = vmatpush3.msra.mxu1 %v7016_v38 }
 0x3bd   :  { %2424 = vmatprep.subr.mxu0 %v7019_v25  ;;  %5771 = vmatprep.subr.mxu1 %v7817_v24 }
 0x3be   :  { %2425 = vmatpush1.msra.mxu0 %v7023_v42  ;;  %5772 = vmatpush3.msra.mxu1 %v7026_v62 }
 0x3bf   :  { %2426 = vmatprep.subr.mxu0 %v7029_v34  ;;  %5773 = vmatprep.subr.mxu1 %v7817_v24 }
 0x3c0   :  { %2427 = vmatpush1.msra.mxu0 %v7033_v26  ;;  %5774 = vmatpush3.msra.mxu1 %v7036_v31 }
 0x3c1   :  { %2428 = vmatprep.subr.mxu0 %v7039_v52  ;;  %5775 = vmatprep.subr.mxu1 %v7817_v24 }
 0x3c2   :  { %2429 = vmatpush1.msra.mxu0 %v7043_v28  ;;  %5776 = vmatpush3.msra.mxu1 %v7046_v4 }
 0x3c3   :  { %2430 = vmatprep.subr.mxu0 %v7049_v5  ;;  %5777 = vmatprep.subr.mxu1 %v7817_v24 }
 0x3c4   :  { %2431 = vmatpush1.msra.mxu0 %v7054_v7  ;;  %5778 = vmatpush3.msra.mxu1 %v7057_v8 }
 0x3c5   :  { %2432 = vmatprep.subr.mxu0 %v7060_v32  ;;  %5779 = vmatprep.subr.mxu1 %v7817_v24 }
 0x3c6   :  { %2433 = vmatpush1.msra.mxu0 %v7064_v9  ;;  %2466 = vmatprep.mubr.f32.mxu0 %v7817_v24 }
 0x3c7   :  { %5780 = vmatpush3.msra.mxu1 %v7069_v12  ;;  %5781 = vmatprep.mubr.msk.f32.mxu1 %vm6347_vm0, %v7817_v24 }
 0x3c8   :  { %5334 = vmatmul.mubr.msk.f32.vlgmr.msra.gmra.mxu0 %vm229_vm2, %v137_v11  ;;  %5782 = vmatmul.mubr.msk.f32.vlgmr.msra.gmra.mxu1 %vm229_vm2, %v137_v11  ;;  %v7103_v11 = vld [vmem:[#allocation5 + $0x28] sm:$0xff] }
 0x3c9   :  { %2570 = vmatprep.subr.mxu0 %v7076_v13  ;;  %5784 = vmatprep.subr.mxu1 %v7817_v24  ;;  %7856 = vst [vmem:[#allocation33_spill] sm:$0xff] %v7103_v11 }
 0x3ca   :  { %2571 = vmatpush1.msra.mxu0 %v7080_v16  ;;  %5785 = vmatpush3.msra.mxu1 %v7083_v27 }
 0x3cb   :  { %2572 = vmatprep.subr.mxu0 %v7086_v39  ;;  %5786 = vmatprep.subr.mxu1 %v7817_v24  ;;  %v7106_v39 = vld [vmem:[#allocation5 + $0x8] sm:$0xff] }
 0x3cc   :  { %2573 = vmatpush1.msra.mxu0 %v7090_v15  ;;  %5787 = vmatpush3.msra.mxu1 %v7093_v17  ;;  %7857 = vst [vmem:[#allocation34_spill] sm:$0xff] %v7106_v39  ;;  %v7110_v17 = vld [vmem:[#allocation5] sm:$0xff] }
 0x3cd   :  { %2574 = vmatprep.subr.mxu0 %v7096_v18  ;;  %5788 = vmatprep.subr.mxu1 %v7817_v24  ;;  %7858 = vst [vmem:[#allocation35_spill] sm:$0xff] %v7110_v17  ;;  %v7113_v18 = vld [vmem:[#allocation5 + $0x10] sm:$0xff] }
 0x3ce   :  { %2575 = vmatpush1.msra.mxu0 %v7100_v45  ;;  %5789 = vmatpush3.msra.mxu1 %v7103_v11  ;;  %7859 = vst [vmem:[#allocation36_spill] sm:$0xff] %v7113_v18 }
 0x3cf   :  { %2576 = vmatprep.subr.mxu0 %v7106_v39  ;;  %5790 = vmatprep.subr.mxu1 %v7817_v24  ;;  %v1851_v39 = vpop.f32.mrf.mxu0 }
 0x3d0   :  { %2577 = vmatpush1.msra.mxu0 %v7110_v17  ;;  %5791 = vmatpush3.msra.mxu1 %v7113_v18 }
 0x3d1   :  { %2610 = vmatprep.mubr.f32.mxu0 %v7817_v24  ;;  %5792 = vmatprep.mubr.msk.f32.mxu1 %vm6347_vm0, %v7817_v24  ;;  %v1853_v11 = vpop.f32.mrf.mxu0 }
 0x3d2   :  { %2733 = vmatprep.subr.mxu0 %v7837_v21  ;;  %5795 = vmatprep.subr.mxu1 %v7817_v24 }
 0x465   :  { %v1995_v45 = vpop.f32.mrf.mxu0  ;;  %v2066_v15 = vpop.f32.mrf.mxu1 }
 0x466   :  { %v2070_v27 = vadd.f32 %v1995_v45, %v1851_v39 }
 0x467   :  { %v5744_v16 = vpop.f32.mrf.mxu1  ;;  %v1997_v13 = vpop.f32.mrf.mxu0 }
 0x468   :  { %v5324_v17 = vmul.f32 -1.442695, %v2070_v27  ;;  %v2077_v12 = vadd.f32 %v1997_v13, %v1853_v11 }
 0x46a   :  { %6062 = vpow2.f32 %v5324_v17  ;;  %v5325_v9 = vmul.f32 -1.442695, %v2077_v12 }
 0x46c   :  { %6064 = vpow2.f32 %v5325_v9  ;;  %v2084_v9 = vadd.f32 %v6646_v14, %v2066_v15 }
 0x46e   :  { %v2229_v18 = vpop.f32.mrf.mxu1  ;;  %v2158_v8 = vpop.f32.mrf.mxu0 }
 0x46f   :  { %v2159_v21 = vadd.f32 %v2158_v8, %v7838_v10 }
 0x470   :  { %v5755_v32 = vpop.f32.mrf.mxu1  ;;  %v2160_v7 = vpop.f32.mrf.mxu0 }
 0x471   :  { %v2161_v17 = vadd.f32 %v2160_v7, %v6809_v51 }
 0x477   :  { %v6063_v6 = vpop.eup %6062 }
 0x478   :  { %v2074_v5 = vadd.f32 1.0, %v6063_v6  ;;  %v2302_v4 = vpop.f32.mrf.mxu0  ;;  %v2373_v28 = vpop.f32.mrf.mxu1 }
 0x479   :  { %v2377_v52 = vadd.f32 %v2302_v4, %v2159_v21  ;;  %v6065_v12 = vpop.eup %6064  ;;  %v2391_v14 = vadd.f32 %v6817_v23, %v2373_v28  ;;  %v7877_v28 = vld [vmem:[#allocation32_spill] sm:$0xff] }
 0x47a   :  { %6066 = vrcp.f32 %v2074_v5  ;;  %v5766_v39 = vpop.f32.mrf.mxu1  ;;  %v2304_v27 = vpop.f32.mrf.mxu0  ;;  %v2081_v45 = vadd.f32 1.0, %v6065_v12 }
 0x47b   :  { %v5330_v16 = vmul.f32 -1.442695, %v2377_v52  ;;  %v2384_v13 = vadd.f32 %v2304_v27, %v2161_v17 }
 0x47d   :  { %6068 = vpow2.f32 %v5330_v16  ;;  %v5331_v32 = vmul.f32 -1.442695, %v2384_v13 }
 0x47f   :  { %6070 = vpow2.f32 %v5331_v32  ;;  %v2230_v32 = vadd.f32 %v2229_v18, %v6819_v35  ;;  %v7878_v18 = vld [vmem:[#allocation33_spill] sm:$0xff] }
 0x480   :  { %6072 = vrcp.f32 %v2081_v45 }
 0x487   :  { %v6067_v11 = vpop.eup %6066 }
 0x488   :  { %v2085_v8 = vmul.f32 %v6067_v11, %v2084_v9  ;;  %v7124_v6 = vpop.f32.mrf.mxu1  ;;  %v7879_v11 = vld [vmem:[#allocation34_spill] sm:$0xff] }
 0x48a   :  { %v6069_v4 = vpop.eup %6068  ;;  %v2086_v5 = vadd.f32 %v2085_v8, %v6938_v1  ;;  %v5783_v52 = vpop.f32.mrf.mxu1  ;;  %v7880_v8 = vld [vmem:[#allocation35_spill] sm:$0xff] }
 0x48b   :  { %v2381_v21 = vadd.f32 1.0, %v6069_v4  ;;  %v7881_v4 = vld [vmem:[#allocation36_spill] sm:$0xff]  ;;  %v2468_v52 = vpop.f32.mrf.mxu0 }
 0x48c   :  { %6074 = vtanh.f32 %v2086_v5  ;;  %v6071_v7 = vpop.eup %6070  ;;  %v7240_v5 = vld [vmem:[#allocation7 + $0x50] sm:$0xff] }
 0x48d   :  { %6076 = vrcp.f32 %v2381_v21  ;;  %v6073_v39 = vpop.eup %6072  ;;  %v2388_v16 = vadd.f32 1.0, %v6071_v7  ;;  %v2470_v21 = vpop.f32.mrf.mxu0 }
 0x48e   :  { %v2088_v27 = vsub.f32 1.0, %v6073_v39  ;;  %v2090_v12 = vmul.f32 %v6073_v39, %v6943_v29  ;;  %v7875_v29 = vld [vmem:[#allocation30_spill] sm:$0xff] }
 0x48f   :  { %6078 = vrcp.f32 %v2388_v16 }
 0x499   :  { %v6075_v17 = vpop.eup %6074 }
 0x49a   :  { %v6077_v15 = vpop.eup %6076  ;;  %v2089_v13 = vmul.f32 %v6075_v17, %v2088_v27 }
 0x49b   :  { %v2392_v45 = vmul.f32 %v6077_v15, %v2391_v14 }
 0x49c   :  { %v7130_v1 = vadd.f32 %v2090_v12, %v2089_v13 }
 0x49d   :  { %v2393_v9 = vadd.f32 %v2392_v45, %v2230_v32 }
 0x49e   :  { %5337 = vmatmul.mubr.msk.f32.vlgmr.msra.gmra.mxu0 %vm384_vm5, %v7130_v1  ;;  %5793 = vmatmul.mubr.msk.f32.vlgmr.msra.gmra.mxu1 %vm384_vm5, %v7130_v1 }
 0x49f   :  { %6080 = vtanh.f32 %v2393_v9  ;;  %2734 = vmatpush1.msra.mxu0 %v6651_v53  ;;  %5796 = vmatpush3.msra.mxu1 %v6653_v54  ;;  %v6079_v53 = vpop.eup %6078 }
 0x4a0   :  { %2735 = vmatprep.subr.mxu0 %v6655_v55  ;;  %5797 = vmatprep.subr.mxu1 %v7817_v24  ;;  %v2395_v54 = vsub.f32 1.0, %v6079_v53 }
 0x4a1   :  { %2736 = vmatpush1.msra.mxu0 %v6661_v50  ;;  %5798 = vmatpush3.msra.mxu1 %v6663_v56  ;;  %v2397_v56 = vmul.f32 %v6079_v53, %v6987_v19  ;;  %v7876_v19 = vld [vmem:[#allocation31_spill] sm:$0xff] }
 0x4a2   :  { %2737 = vmatprep.subr.mxu0 %v6667_v57  ;;  %5799 = vmatprep.subr.mxu1 %v7817_v24 }
 0x4a3   :  { %2738 = vmatpush1.msra.mxu0 %v6671_v58  ;;  %5800 = vmatpush3.msra.mxu1 %v6673_v59  ;;  %v7860_v58 = vld [vmem:[#allocation15_spill] sm:$0xff]  ;;  %v7861_v59 = vld [vmem:[#allocation16_spill] sm:$0xff] }
 0x4a4   :  { %2739 = vmatprep.subr.mxu0 %v6677_v60  ;;  %5801 = vmatprep.subr.mxu1 %v7817_v24  ;;  %v7862_v60 = vld [vmem:[#allocation17_spill] sm:$0xff]  ;;  %7882 = vst [vmem:[#allocation15_spill] sm:$0xff] %v7240_v5 }
 0x4a5   :  { %2740 = vmatpush1.msra.mxu0 %v6681_v61  ;;  %2773 = vmatprep.mubr.f32.mxu0 %v7817_v24  ;;  %v118_v61 = vpop.permute.xlu1 %117 }
 0x4a6   :  { %5802 = vmatpush3.msra.mxu1 %v6685_v63  ;;  %5803 = vmatprep.mubr.msk.f32.mxu1 %vm6347_vm0, %v7817_v24  ;;  %v7863_v63 = vld [vmem:[#allocation18_spill] sm:$0xff] }
 0x4a7   :  { %5341 = vmatmul.mubr.msk.f32.vlgmr.msra.gmra.mxu0 %vm384_vm5, %v7130_v1  ;;  %5804 = vmatmul.mubr.msk.f32.vlgmr.msra.gmra.mxu1 %vm384_vm5, %v7130_v1 }
 0x4a8   :  { %2877 = vmatprep.subr.mxu0 %v6691_v0  ;;  %5806 = vmatprep.subr.mxu1 %v7817_v24  ;;  %v7864_v0 = vld [vmem:[#allocation22_spill] sm:$0xff] }
 0x4a9   :  { %2878 = vmatpush1.msra.mxu0 %v6696_v2  ;;  %5807 = vmatpush3.msra.mxu1 %v6704_v20  ;;  %vm130_vm9 = vcmp.eq.s32.totalorder %v118_v61, %v7864_v0  ;;  %v7865_v2 = vld [vmem:[#allocation19_spill] sm:$0xff]  ;;  %v7867_v20 = vld [vmem:[#allocation21_spill] sm:$0xff] }
 0x4aa   :  { %2879 = vmatprep.subr.mxu0 %v6702_v3  ;;  %5808 = vmatprep.subr.mxu1 %v7817_v24  ;;  %v7866_v3 = vld [vmem:[#allocation20_spill] sm:$0xff] }
 0x4ab   :  { %2880 = vmatpush1.msra.mxu0 %v6707_v30  ;;  %5809 = vmatpush3.msra.mxu1 %v6714_v43  ;;  %v7868_v30 = vld [vmem:[#allocation23_spill] sm:$0xff]  ;;  %v7869_v43 = vld [vmem:[#allocation24_spill] sm:$0xff] }
 0x4ac   :  { %v6081_v55 = vpop.eup %6080  ;;  %2881 = vmatprep.subr.mxu0 %v6711_v33  ;;  %5810 = vmatprep.subr.mxu1 %v7817_v24  ;;  %v138_v33 = vsel %vm130_vm9, 1.0, %v7817_v24 }
 0x4ad   :  { %2882 = vmatpush1.msra.mxu0 %v6717_v44  ;;  %5811 = vmatpush3.msra.mxu1 %v6724_v47  ;;  %v2396_v50 = vmul.f32 %v6081_v55, %v2395_v54  ;;  %v7870_v44 = vld [vmem:[#allocation25_spill] sm:$0xff]  ;;  %v7872_v47 = vld [vmem:[#allocation27_spill] sm:$0xff] }
 0x4ae   :  { %2883 = vmatprep.subr.mxu0 %v6721_v46  ;;  %5812 = vmatprep.subr.mxu1 %v7817_v24  ;;  %v7871_v46 = vld [vmem:[#allocation26_spill] sm:$0xff] }
 0x4af   :  { %2884 = vmatpush1.msra.mxu0 %v6727_v48  ;;  %2917 = vmatprep.mubr.f32.mxu0 %v7817_v24  ;;  %v7174_v57 = vadd.f32 %v2397_v56, %v2396_v50  ;;  %v7873_v48 = vld [vmem:[#allocation28_spill] sm:$0xff] }
 0x4b0   :  { %5813 = vmatpush3.msra.mxu1 %v6732_v49  ;;  %5814 = vmatprep.mubr.msk.f32.mxu1 %vm6347_vm0, %v7817_v24  ;;  %v7874_v49 = vld [vmem:[#allocation29_spill] sm:$0xff] }
 0x4b1   :  { %5343 = vmatmul.mubr.msk.f32.vlgmr.msra.gmra.mxu0 %vm384_vm5, %v7174_v57  ;;  %5815 = vmatmul.mubr.msk.f32.vlgmr.msra.gmra.mxu1 %vm384_vm5, %v7174_v57 }
 0x4b2   :  { %5347 = vmatprep.subr.msk.mxu0 %vm233_vm1, %v6996_v40  ;;  %5817 = vmatprep.subr.mxu1 %v7817_v24 }
 0x4b3   :  { %5348 = vmatpush1.msk.msra.mxu0 %vm233_vm1, %v7001_v41  ;;  %5818 = vmatpush3.msk.msra.mxu1 %vm233_vm1, %v7005_v22 }
 0x4b4   :  { %3039 = vmatprep.subr.mxu0 %v7009_v36  ;;  %5819 = vmatprep.subr.mxu1 %v7817_v24 }
 0x4b5   :  { %3040 = vmatpush1.msra.mxu0 %v7013_v37  ;;  %5820 = vmatpush3.msra.mxu1 %v7016_v38 }
 0x4b6   :  { %3041 = vmatprep.subr.mxu0 %v7019_v25  ;;  %5821 = vmatprep.subr.mxu1 %v7817_v24 }
 0x4b7   :  { %3042 = vmatpush1.msra.mxu0 %v7023_v42  ;;  %5822 = vmatpush3.msra.mxu1 %v7026_v62 }
 0x4b8   :  { %3043 = vmatprep.subr.mxu0 %v7029_v34  ;;  %5823 = vmatprep.subr.mxu1 %v7817_v24 }
 0x4b9   :  { %3044 = vmatpush1.msra.mxu0 %v7033_v26  ;;  %5824 = vmatpush3.msra.mxu1 %v7036_v31 }
 0x4ba   :  { %3045 = vmatprep.subr.mxu0 %v7860_v58  ;;  %5825 = vmatprep.subr.mxu1 %v7817_v24 }
 0x4bb   :  { %3046 = vmatpush1.msra.mxu0 %v7861_v59  ;;  %5826 = vmatpush3.msra.mxu1 %v7862_v60 }
 0x4bc   :  { %3047 = vmatprep.subr.mxu0 %v7863_v63  ;;  %5827 = vmatprep.subr.mxu1 %v7817_v24 }
 0x4bd   :  { %3048 = vmatpush1.msra.mxu0 %v7865_v2  ;;  %5828 = vmatpush3.msra.mxu1 %v7866_v3 }
 0x4be   :  { %3049 = vmatprep.subr.mxu0 %v7867_v20  ;;  %5829 = vmatprep.subr.mxu1 %v7817_v24 }
 0x4bf   :  { %3050 = vmatpush1.msra.mxu0 %v7868_v30  ;;  %3083 = vmatprep.mubr.f32.mxu0 %v7817_v24 }
 0x4c0   :  { %5830 = vmatpush3.msra.mxu1 %v7869_v43  ;;  %5831 = vmatprep.mubr.msk.f32.mxu1 %vm6347_vm0, %v7817_v24 }
 0x4c1   :  { %5349 = vmatmul.mubr.msk.f32.vlgmr.msra.gmra.mxu0 %vm229_vm2, %v138_v33  ;;  %5832 = vmatmul.mubr.msk.f32.vlgmr.msra.gmra.mxu1 %vm229_vm2, %v138_v33 }
 0x4c2   :  { %3187 = vmatprep.subr.mxu0 %v7870_v44  ;;  %5834 = vmatprep.subr.mxu1 %v7817_v24 }
 0x4c3   :  { %3188 = vmatpush1.msra.mxu0 %v7871_v46  ;;  %5835 = vmatpush3.msra.mxu1 %v7872_v47 }
 0x4c4   :  { %3189 = vmatprep.subr.mxu0 %v7873_v48  ;;  %5836 = vmatprep.subr.mxu1 %v7817_v24 }
 0x4c5   :  { %3190 = vmatpush1.msra.mxu0 %v7874_v49  ;;  %5837 = vmatpush3.msra.mxu1 %v7875_v29 }
 0x4c6   :  { %3191 = vmatprep.subr.mxu0 %v7876_v19  ;;  %5838 = vmatprep.subr.mxu1 %v7817_v24 }
 0x4c7   :  { %3192 = vmatpush1.msra.mxu0 %v7877_v28  ;;  %5839 = vmatpush3.msra.mxu1 %v7878_v18 }
 0x4c8   :  { %3193 = vmatprep.subr.mxu0 %v7879_v11  ;;  %5840 = vmatprep.subr.mxu1 %v7817_v24 }
 0x4c9   :  { %3194 = vmatpush1.msra.mxu0 %v7880_v8  ;;  %5841 = vmatpush3.msra.mxu1 %v7881_v4 }
 0x4ca   :  { %3227 = vmatprep.mubr.f32.mxu0 %v7817_v24  ;;  %5842 = vmatprep.mubr.msk.f32.mxu1 %vm6347_vm0, %v7817_v24 }
 0x4cb   :  { %3350 = vmatprep.subr.mxu0 %v7240_v5  ;;  %5845 = vmatprep.subr.mxu1 %v7817_v24 }
 0x55e   :  { %v2612_v7 = vpop.f32.mrf.mxu0  ;;  %v2683_v39 = vpop.f32.mrf.mxu1 }
 0x55f   :  { %v2687_v16 = vadd.f32 %v2612_v7, %v2468_v52 }
 0x560   :  { %v5794_v27 = vpop.f32.mrf.mxu1  ;;  %v2614_v14 = vpop.f32.mrf.mxu0 }
 0x561   :  { %v5339_v17 = vmul.f32 -1.442695, %v2687_v16  ;;  %v2694_v15 = vadd.f32 %v2614_v14, %v2470_v21 }
 0x563   :  { %6082 = vpow2.f32 %v5339_v17  ;;  %v5340_v12 = vmul.f32 -1.442695, %v2694_v15  ;;  %v7249_v15 = vld [vmem:[%s7686_s3] ss:$0 sm:$0xff] }
 0x565   :  { %6084 = vpow2.f32 %v5340_v12  ;;  %v2701_v12 = vadd.f32 %v7249_v15, %v2683_v39 }
 0x567   :  { %v2846_v13 = vpop.f32.mrf.mxu1  ;;  %v2775_v45 = vpop.f32.mrf.mxu0 }
 0x568   :  { %v2776_v54 = vadd.f32 %v2775_v45, %v7838_v10 }
 0x569   :  { %v5805_v32 = vpop.f32.mrf.mxu1  ;;  %v2777_v9 = vpop.f32.mrf.mxu0 }
 0x56a   :  { %v2778_v16 = vadd.f32 %v2777_v9, %v6809_v51 }
 0x570   :  { %v6083_v53 = vpop.eup %6082 }
 0x571   :  { %v2691_v55 = vadd.f32 1.0, %v6083_v53  ;;  %v2919_v50 = vpop.f32.mrf.mxu0  ;;  %v2990_v56 = vpop.f32.mrf.mxu1 }
 0x572   :  { %v2994_v61 = vadd.f32 %v2919_v50, %v2776_v54  ;;  %v6085_v27 = vpop.eup %6084  ;;  %v3008_v39 = vadd.f32 %v6817_v23, %v2990_v56  ;;  %v7267_v23 = vld [vmem:[#allocation7 + $0x58] sm:$0xff]  ;;  %v7277_v56 = vld [vmem:[#allocation7 + $0x40] sm:$0xff] }
 0x573   :  { %6086 = vrcp.f32 %v2691_v55  ;;  %v5816_v33 = vpop.f32.mrf.mxu1  ;;  %v2921_v7 = vpop.f32.mrf.mxu0  ;;  %v2698_v14 = vadd.f32 1.0, %v6085_v27 }
 0x574   :  { %v5345_v52 = vmul.f32 -1.442695, %v2994_v61  ;;  %v3001_v21 = vadd.f32 %v2921_v7, %v2778_v16 }
 0x576   :  { %6088 = vpow2.f32 %v5345_v52  ;;  %v5346_v17 = vmul.f32 -1.442695, %v3001_v21 }
 0x578   :  { %6090 = vpow2.f32 %v5346_v17 }
 0x579   :  { %6092 = vrcp.f32 %v2698_v14  ;;  %v2847_v14 = vadd.f32 %v2846_v13, %v6819_v35  ;;  %v7274_v13 = vld [vmem:[#allocation7 + $0x30] sm:$0xff] }
 0x580   :  { %v6087_v32 = vpop.eup %6086 }
 0x581   :  { %v2702_v45 = vmul.f32 %v6087_v32, %v2701_v12  ;;  %v7252_v53 = vpop.f32.mrf.mxu1 }
 0x583   :  { %v6089_v54 = vpop.eup %6088  ;;  %v2703_v9 = vadd.f32 %v2702_v45, %v7124_v6  ;;  %v5833_v55 = vpop.f32.mrf.mxu1  ;;  %v7264_v45 = vld [vmem:[#allocation7 + $0x48] sm:$0xff] }
 0x584   :  { %v2998_v50 = vadd.f32 1.0, %v6089_v54  ;;  %v7280_v54 = vld [vmem:[#allocation7 + $0x20] sm:$0xff]  ;;  %v7287_v55 = vld [vmem:[#allocation7 + $0x28] sm:$0xff] }
 0x585   :  { %6094 = vtanh.f32 %v2703_v9  ;;  %v6091_v61 = vpop.eup %6090  ;;  %v7284_v9 = vld [vmem:[#allocation7 + $0x18] sm:$0xff] }
 0x586   :  { %6096 = vrcp.f32 %v2998_v50  ;;  %v6093_v33 = vpop.eup %6092  ;;  %v3005_v52 = vadd.f32 1.0, %v6091_v61  ;;  %v7290_v50 = vld [vmem:[#allocation7 + $0x8] sm:$0xff]  ;;  %v7294_v61 = vld [vmem:[#allocation7] sm:$0xff] }
 0x587   :  { %v2705_v7 = vsub.f32 1.0, %v6093_v33  ;;  %v2707_v17 = vmul.f32 %v6093_v33, %v7130_v1  ;;  %v7270_v1 = vld [vmem:[#allocation7 + $0x38] sm:$0xff]  ;;  %v7298_v33 = vld [vmem:[#allocation7 + $0x10] sm:$0xff] }
 0x588   :  { %6098 = vrcp.f32 %v3005_v52 }
 0x592   :  { %v6095_v16 = vpop.eup %6094 }
 0x593   :  { %v6097_v21 = vpop.eup %6096  ;;  %v2706_v27 = vmul.f32 %v6095_v16, %v2705_v7  ;;  %v7307_v7 = vld [vmem:[#allocation8 + $0x50] sm:$0xff]  ;;  %v7311_v16 = vld [vmem:[#allocation8 + $0x48] sm:$0xff] }
 0x594   :  { %v3009_v12 = vmul.f32 %v6097_v21, %v3008_v39  ;;  %7883 = vst [vmem:[#allocation16_spill] sm:$0xff] %v7307_v7  ;;  %7884 = vst [vmem:[#allocation17_spill] sm:$0xff] %v7311_v16  ;;  %v7314_v39 = vld [vmem:[#allocation8 + $0x58] sm:$0xff] }
 0x595   :  { %v7258_v6 = vadd.f32 %v2707_v17, %v2706_v27  ;;  %v6099_v52 = vpop.eup %6098  ;;  %7885 = vst [vmem:[#allocation18_spill] sm:$0xff] %v7314_v39  ;;  %v7317_v21 = vld [vmem:[#allocation8 + $0x38] sm:$0xff]  ;;  %v7321_v27 = vld [vmem:[#allocation8 + $0x30] sm:$0xff]  ;;  %v7324_v17 = vld [vmem:[#allocation8 + $0x40] sm:$0xff] }
 0x596   :  { %v3010_v32 = vadd.f32 %v3009_v12, %v2847_v14  ;;  %7886 = vst [vmem:[#allocation22_spill] sm:$0xff] %v7317_v21  ;;  %7887 = vst [vmem:[#allocation19_spill] sm:$0xff] %v7321_v27  ;;  %v3012_v14 = vsub.f32 1.0, %v6099_v52 }
 0x597   :  { %5352 = vmatmul.mubr.msk.f32.vlgmr.msra.gmra.mxu0 %vm384_vm5, %v7258_v6  ;;  %5843 = vmatmul.mubr.msk.f32.vlgmr.msra.gmra.mxu1 %vm384_vm5, %v7258_v6  ;;  %7888 = vst [vmem:[#allocation20_spill] sm:$0xff] %v7324_v17 }
 0x598   :  { %6100 = vtanh.f32 %v3010_v32  ;;  %3351 = vmatpush1.msra.mxu0 %v7264_v45  ;;  %5846 = vmatpush3.msra.mxu1 %v7267_v23  ;;  %v7327_v32 = vld [vmem:[#allocation8 + $0x20] sm:$0xff] }
 0x599   :  { %3352 = vmatprep.subr.mxu0 %v7270_v1  ;;  %5847 = vmatprep.subr.mxu1 %v7817_v24  ;;  %7889 = vst [vmem:[#allocation21_spill] sm:$0xff] %v7327_v32 }
 0x59a   :  { %3353 = vmatpush1.msra.mxu0 %v7274_v13  ;;  %5848 = vmatpush3.msra.mxu1 %v7277_v56 }
 0x59b   :  { %3354 = vmatprep.subr.mxu0 %v7280_v54  ;;  %5849 = vmatprep.subr.mxu1 %v7817_v24 }
 0x59c   :  { %3355 = vmatpush1.msra.mxu0 %v7284_v9  ;;  %5850 = vmatpush3.msra.mxu1 %v7287_v55 }
 0x59d   :  { %3356 = vmatprep.subr.mxu0 %v7290_v50  ;;  %5851 = vmatprep.subr.mxu1 %v7817_v24 }
 0x59e   :  { %3357 = vmatpush1.msra.mxu0 %v7294_v61  ;;  %3390 = vmatprep.mubr.f32.mxu0 %v7817_v24 }
 0x59f   :  { %5852 = vmatpush3.msra.mxu1 %v7298_v33  ;;  %5853 = vmatprep.mubr.msk.f32.mxu1 %vm6347_vm0, %v7817_v24 }
 0x5a0   :  { %5356 = vmatmul.mubr.msk.f32.vlgmr.msra.gmra.mxu0 %vm384_vm5, %v7258_v6  ;;  %5854 = vmatmul.mubr.msk.f32.vlgmr.msra.gmra.mxu1 %vm384_vm5, %v7258_v6 }
 0x5a1   :  { %3494 = vmatprep.subr.mxu0 %v7307_v7  ;;  %5856 = vmatprep.subr.mxu1 %v7817_v24  ;;  %v7348_v7 = vld [vmem:[#allocation8 + $0x10] sm:$0xff] }
 0x5a2   :  { %3495 = vmatpush1.msra.mxu0 %v7311_v16  ;;  %5857 = vmatpush3.msra.mxu1 %v7314_v39  ;;  %v7331_v39 = vld [vmem:[#allocation8 + $0x18] sm:$0xff]  ;;  %v3014_v16 = vmul.f32 %v6099_v52, %v7174_v57  ;;  %v121_v57 = vpop.permute.xlu0 %120 }
 0x5a3   :  { %3496 = vmatprep.subr.mxu0 %v7317_v21  ;;  %5858 = vmatprep.subr.mxu1 %v7817_v24  ;;  %7890 = vst [vmem:[#allocation23_spill] sm:$0xff] %v7331_v39  ;;  %v7334_v21 = vld [vmem:[#allocation8 + $0x28] sm:$0xff]  ;;  %vm131_vm10 = vcmp.eq.s32.totalorder %v121_v57, %v7864_v0 }
 0x5a4   :  { %3497 = vmatpush1.msra.mxu0 %v7321_v27  ;;  %5859 = vmatpush3.msra.mxu1 %v7324_v17  ;;  %v7338_v17 = vld [vmem:[#allocation8 + $0x8] sm:$0xff]  ;;  %v139_v52 = vsel %vm131_vm10, 1.0, %v7817_v24 }
 0x5a5   :  { %v6101_v12 = vpop.eup %6100  ;;  %3498 = vmatprep.subr.mxu0 %v7327_v32  ;;  %5860 = vmatprep.subr.mxu1 %v7817_v24  ;;  %v7342_v32 = vld [vmem:[#allocation8] sm:$0xff] }
 0x5a6   :  { %3499 = vmatpush1.msra.mxu0 %v7331_v39  ;;  %5861 = vmatpush3.msra.mxu1 %v7334_v21  ;;  %v3013_v27 = vmul.f32 %v6101_v12, %v3012_v14 }
 0x5a7   :  { %3500 = vmatprep.subr.mxu0 %v7338_v17  ;;  %5862 = vmatprep.subr.mxu1 %v7817_v24 }
 0x5a8   :  { %3501 = vmatpush1.msra.mxu0 %v7342_v32  ;;  %3534 = vmatprep.mubr.f32.mxu0 %v7817_v24  ;;  %v7346_v39 = vadd.f32 %v3014_v16, %v3013_v27  ;;  %v3085_v16 = vpop.f32.mrf.mxu0 }
 0x5a9   :  { %5863 = vmatpush3.msra.mxu1 %v7348_v7  ;;  %5864 = vmatprep.mubr.msk.f32.mxu1 %vm6347_vm0, %v7817_v24 }
 0x5aa   :  { %5358 = vmatmul.mubr.msk.f32.vlgmr.msra.gmra.mxu0 %vm384_vm5, %v7346_v39  ;;  %5865 = vmatmul.mubr.msk.f32.vlgmr.msra.gmra.mxu1 %vm384_vm5, %v7346_v39  ;;  %v3087_v27 = vpop.f32.mrf.mxu0 }
 0x5ab   :  { %5362 = vmatprep.subr.msk.mxu0 %vm233_vm1, %v6996_v40  ;;  %5867 = vmatprep.subr.mxu1 %v7817_v24 }
 0x5ac   :  { %5363 = vmatpush1.msk.msra.mxu0 %vm233_vm1, %v7001_v41  ;;  %5868 = vmatpush3.msk.msra.mxu1 %vm233_vm1, %v7005_v22 }
 0x5ad   :  { %3656 = vmatprep.subr.mxu0 %v7009_v36  ;;  %5869 = vmatprep.subr.mxu1 %v7817_v24 }
 0x5ae   :  { %3657 = vmatpush1.msra.mxu0 %v7013_v37  ;;  %5870 = vmatpush3.msra.mxu1 %v7016_v38 }
 0x5af   :  { %3658 = vmatprep.subr.mxu0 %v7019_v25  ;;  %5871 = vmatprep.subr.mxu1 %v7817_v24 }
 0x5b0   :  { %3659 = vmatpush1.msra.mxu0 %v7023_v42  ;;  %5872 = vmatpush3.msra.mxu1 %v7026_v62 }
 0x5b1   :  { %3660 = vmatprep.subr.mxu0 %v7029_v34  ;;  %5873 = vmatprep.subr.mxu1 %v7817_v24 }
 0x5b2   :  { %3661 = vmatpush1.msra.mxu0 %v7033_v26  ;;  %5874 = vmatpush3.msra.mxu1 %v7036_v31 }
 0x5b3   :  { %3662 = vmatprep.subr.mxu0 %v7860_v58  ;;  %5875 = vmatprep.subr.mxu1 %v7817_v24 }
 0x5b4   :  { %3663 = vmatpush1.msra.mxu0 %v7861_v59  ;;  %5876 = vmatpush3.msra.mxu1 %v7862_v60 }
 0x5b5   :  { %3664 = vmatprep.subr.mxu0 %v7863_v63  ;;  %5877 = vmatprep.subr.mxu1 %v7817_v24 }
 0x5b6   :  { %3665 = vmatpush1.msra.mxu0 %v7865_v2  ;;  %5878 = vmatpush3.msra.mxu1 %v7866_v3 }
 0x5b7   :  { %3666 = vmatprep.subr.mxu0 %v7867_v20  ;;  %5879 = vmatprep.subr.mxu1 %v7817_v24 }
 0x5b8   :  { %3667 = vmatpush1.msra.mxu0 %v7868_v30  ;;  %3700 = vmatprep.mubr.f32.mxu0 %v7817_v24 }
 0x5b9   :  { %5880 = vmatpush3.msra.mxu1 %v7869_v43  ;;  %5881 = vmatprep.mubr.msk.f32.mxu1 %vm6347_vm0, %v7817_v24 }
 0x5ba   :  { %5364 = vmatmul.mubr.msk.f32.vlgmr.msra.gmra.mxu0 %vm229_vm2, %v139_v52  ;;  %5882 = vmatmul.mubr.msk.f32.vlgmr.msra.gmra.mxu1 %vm229_vm2, %v139_v52 }
 0x5bb   :  { %3804 = vmatprep.subr.mxu0 %v7870_v44  ;;  %5884 = vmatprep.subr.mxu1 %v7817_v24 }
 0x5bc   :  { %3805 = vmatpush1.msra.mxu0 %v7871_v46  ;;  %5885 = vmatpush3.msra.mxu1 %v7872_v47 }
 0x5bd   :  { %3806 = vmatprep.subr.mxu0 %v7873_v48  ;;  %5886 = vmatprep.subr.mxu1 %v7817_v24 }
 0x5be   :  { %3807 = vmatpush1.msra.mxu0 %v7874_v49  ;;  %5887 = vmatpush3.msra.mxu1 %v7875_v29 }
 0x5bf   :  { %3808 = vmatprep.subr.mxu0 %v7876_v19  ;;  %5888 = vmatprep.subr.mxu1 %v7817_v24 }
 0x5c0   :  { %3809 = vmatpush1.msra.mxu0 %v7877_v28  ;;  %5889 = vmatpush3.msra.mxu1 %v7878_v18 }
 0x5c1   :  { %3810 = vmatprep.subr.mxu0 %v7879_v11  ;;  %5890 = vmatprep.subr.mxu1 %v7817_v24 }
 0x5c2   :  { %3811 = vmatpush1.msra.mxu0 %v7880_v8  ;;  %5891 = vmatpush3.msra.mxu1 %v7881_v4 }
 0x5c3   :  { %3844 = vmatprep.mubr.f32.mxu0 %v7817_v24  ;;  %5892 = vmatprep.mubr.msk.f32.mxu1 %vm6347_vm0, %v7817_v24 }
 0x5c4   :  { %3967 = vmatprep.subr.mxu0 %v7240_v5  ;;  %5895 = vmatprep.subr.mxu1 %v7817_v24 }
 0x657   :  { %v3229_v14 = vpop.f32.mrf.mxu0  ;;  %v3300_v12 = vpop.f32.mrf.mxu1 }
 0x658   :  { %v3304_v57 = vadd.f32 %v3229_v14, %v3085_v16 }
 0x659   :  { %v5844_v52 = vpop.f32.mrf.mxu1  ;;  %v3231_v18 = vpop.f32.mrf.mxu0 }
 0x65a   :  { %v5354_v11 = vmul.f32 -1.442695, %v3304_v57  ;;  %v3311_v8 = vadd.f32 %v3231_v18, %v3087_v27 }
 0x65c   :  { %6102 = vpow2.f32 %v5354_v11  ;;  %v5355_v28 = vmul.f32 -1.442695, %v3311_v8 }
 0x65e   :  { %6104 = vpow2.f32 %v5355_v28  ;;  %v3318_v28 = vadd.f32 %v7249_v15, %v3300_v12  ;;  %v7425_v12 = vld [vmem:[%s7690_s7] ss:$0 sm:$0xff] }
 0x660   :  { %v3463_v4 = vpop.f32.mrf.mxu1  ;;  %v3392_v29 = vpop.f32.mrf.mxu0 }
 0x661   :  { %v3393_v5 = vadd.f32 %v3392_v29, %v7838_v10 }
 0x662   :  { %v5855_v19 = vpop.f32.mrf.mxu1  ;;  %v3394_v49 = vpop.f32.mrf.mxu0 }
 0x663   :  { %v3395_v11 = vadd.f32 %v3394_v49, %v6809_v51 }
 0x669   :  { %v6103_v48 = vpop.eup %6102 }
 0x66a   :  { %v3308_v47 = vadd.f32 1.0, %v6103_v48  ;;  %v3536_v46 = vpop.f32.mrf.mxu0  ;;  %v3607_v44 = vpop.f32.mrf.mxu1 }
 0x66b   :  { %v3611_v43 = vadd.f32 %v3536_v46, %v3393_v5  ;;  %v6105_v8 = vpop.eup %6104 }
 0x66c   :  { %6106 = vrcp.f32 %v3308_v47  ;;  %v5866_v16 = vpop.f32.mrf.mxu1  ;;  %v3538_v57 = vpop.f32.mrf.mxu0  ;;  %v3315_v27 = vadd.f32 1.0, %v6105_v8 }
 0x66d   :  { %v5360_v14 = vmul.f32 -1.442695, %v3611_v43  ;;  %v3618_v18 = vadd.f32 %v3538_v57, %v3395_v11 }
 0x66f   :  { %6108 = vpow2.f32 %v5360_v14  ;;  %v5361_v19 = vmul.f32 -1.442695, %v3618_v18  ;;  %v3625_v18 = vadd.f32 %v7425_v12, %v3607_v44 }
 0x671   :  { %6110 = vpow2.f32 %v5361_v19 }
 0x672   :  { %6112 = vrcp.f32 %v3315_v27  ;;  %v3464_v27 = vadd.f32 %v3463_v4, %v6819_v35  ;;  %v7891_v4 = vld [vmem:[#allocation16_spill] sm:$0xff] }
 0x679   :  { %v6107_v52 = vpop.eup %6106 }
 0x67a   :  { %v3319_v29 = vmul.f32 %v6107_v52, %v3318_v28  ;;  %v7419_v48 = vpop.f32.mrf.mxu1 }
 0x67c   :  { %v6109_v46 = vpop.eup %6108  ;;  %v3320_v47 = vadd.f32 %v3319_v29, %v7252_v53  ;;  %v5883_v43 = vpop.f32.mrf.mxu1 }
 0x67d   :  { %v3615_v5 = vadd.f32 1.0, %v6109_v46  ;;  %v7893_v46 = vld [vmem:[#allocation18_spill] sm:$0xff]  ;;  %v7895_v43 = vld [vmem:[#allocation19_spill] sm:$0xff] }
 0x67e   :  { %6114 = vtanh.f32 %v3320_v47  ;;  %v6111_v49 = vpop.eup %6110  ;;  %v7894_v47 = vld [vmem:[#allocation22_spill] sm:$0xff] }
 0x67f   :  { %6116 = vrcp.f32 %v3615_v5  ;;  %v6113_v16 = vpop.eup %6112  ;;  %v3622_v14 = vadd.f32 1.0, %v6111_v49  ;;  %v7896_v5 = vld [vmem:[#allocation20_spill] sm:$0xff] }
 0x680   :  { %v3322_v57 = vsub.f32 1.0, %v6113_v16  ;;  %v3324_v53 = vmul.f32 %v6113_v16, %v7258_v6  ;;  %v7892_v6 = vld [vmem:[#allocation17_spill] sm:$0xff] }
 0x681   :  { %6118 = vrcp.f32 %v3622_v14  ;;  %v7897_v14 = vld [vmem:[#allocation21_spill] sm:$0xff] }
 0x68b   :  { %v6115_v11 = vpop.eup %6114 }
 0x68c   :  { %v6117_v8 = vpop.eup %6116  ;;  %v3323_v19 = vmul.f32 %v6115_v11, %v3322_v57  ;;  %v7898_v57 = vld [vmem:[#allocation23_spill] sm:$0xff] }
 0x68d   :  { %v3626_v28 = vmul.f32 %v6117_v8, %v3625_v18 }
 0x68e   :  { %v7430_v52 = vadd.f32 %v3324_v53, %v3323_v19  ;;  %v6119_v44 = vpop.eup %6118 }
 0x68f   :  { %v3627_v29 = vadd.f32 %v3626_v28, %v3464_v27  ;;  %v3629_v49 = vsub.f32 1.0, %v6119_v44  ;;  %v3631_v18 = vmul.f32 %v6119_v44, %v7346_v39 }
 0x690   :  { %5367 = vmatmul.mubr.msk.f32.vlgmr.msra.gmra.mxu0 %vm384_vm5, %v7430_v52  ;;  %5893 = vmatmul.mubr.msk.f32.vlgmr.msra.gmra.mxu1 %vm384_vm5, %v7430_v52 }
 0x691   :  { %6120 = vtanh.f32 %v3627_v29  ;;  %3968 = vmatpush1.msra.mxu0 %v7264_v45  ;;  %5896 = vmatpush3.msra.mxu1 %v7267_v23 }
 0x692   :  { %3969 = vmatprep.subr.mxu0 %v7270_v1  ;;  %5897 = vmatprep.subr.mxu1 %v7817_v24 }
 0x693   :  { %3970 = vmatpush1.msra.mxu0 %v7274_v13  ;;  %5898 = vmatpush3.msra.mxu1 %v7277_v56 }
 0x694   :  { %3971 = vmatprep.subr.mxu0 %v7280_v54  ;;  %5899 = vmatprep.subr.mxu1 %v7817_v24 }
 0x695   :  { %3972 = vmatpush1.msra.mxu0 %v7284_v9  ;;  %5900 = vmatpush3.msra.mxu1 %v7287_v55 }
 0x696   :  { %3973 = vmatprep.subr.mxu0 %v7290_v50  ;;  %5901 = vmatprep.subr.mxu1 %v7817_v24 }
 0x697   :  { %3974 = vmatpush1.msra.mxu0 %v7294_v61  ;;  %4007 = vmatprep.mubr.f32.mxu0 %v7817_v24 }
 0x698   :  { %5902 = vmatpush3.msra.mxu1 %v7298_v33  ;;  %5903 = vmatprep.mubr.msk.f32.mxu1 %vm6347_vm0, %v7817_v24 }
 0x699   :  { %5371 = vmatmul.mubr.msk.f32.vlgmr.msra.gmra.mxu0 %vm384_vm5, %v7430_v52  ;;  %5904 = vmatmul.mubr.msk.f32.vlgmr.msra.gmra.mxu1 %vm384_vm5, %v7430_v52 }
 0x69a   :  { %4111 = vmatprep.subr.mxu0 %v7891_v4  ;;  %5906 = vmatprep.subr.mxu1 %v7817_v24 }
 0x69b   :  { %4112 = vmatpush1.msra.mxu0 %v7892_v6  ;;  %5907 = vmatpush3.msra.mxu1 %v7893_v46 }
 0x69c   :  { %4113 = vmatprep.subr.mxu0 %v7894_v47  ;;  %5908 = vmatprep.subr.mxu1 %v7817_v24 }
 0x69d   :  { %4114 = vmatpush1.msra.mxu0 %v7895_v43  ;;  %5909 = vmatpush3.msra.mxu1 %v7896_v5 }
 0x69e   :  { %v6121_v16 = vpop.eup %6120  ;;  %4115 = vmatprep.subr.mxu0 %v7897_v14  ;;  %5910 = vmatprep.subr.mxu1 %v7817_v24 }
 0x69f   :  { %4116 = vmatpush1.msra.mxu0 %v7898_v57  ;;  %5911 = vmatpush3.msra.mxu1 %v7334_v21  ;;  %v3630_v11 = vmul.f32 %v6121_v16, %v3629_v49 }
 0x6a0   :  { %4117 = vmatprep.subr.mxu0 %v7338_v17  ;;  %5912 = vmatprep.subr.mxu1 %v7817_v24 }
 0x6a1   :  { %4118 = vmatpush1.msra.mxu0 %v7342_v32  ;;  %4151 = vmatprep.mubr.f32.mxu0 %v7817_v24  ;;  %v7474_v8 = vadd.f32 %v3631_v18, %v3630_v11 }
 0x6a2   :  { %5913 = vmatpush3.msra.mxu1 %v7348_v7  ;;  %5914 = vmatprep.mubr.msk.f32.mxu1 %vm6347_vm0, %v7817_v24 }
 0x6a3   :  { %5373 = vmatmul.mubr.msk.f32.vlgmr.msra.gmra.mxu0 %vm384_vm5, %v7474_v8  ;;  %5915 = vmatmul.mubr.msk.f32.vlgmr.msra.gmra.mxu1 %vm384_vm5, %v7474_v8 }
 0x6a4   :  { %5377 = vmatprep.subr.msk.mxu0 %vm233_vm1, %v6996_v40  ;;  %5917 = vmatprep.subr.mxu1 %v7817_v24  ;;  %v124_v40 = vpop.permute.xlu1 %123 }
 0x6a5   :  { %5378 = vmatpush1.msk.msra.mxu0 %vm233_vm1, %v7001_v41  ;;  %5918 = vmatpush3.msk.msra.mxu1 %vm233_vm1, %v7005_v22  ;;  %vm132_vm11 = vcmp.eq.s32.totalorder %v124_v40, %v7864_v0  ;;  %v7899_v22 = vld [vmem:[#allocation24_spill] sm:$0xff]  ;;  %v3702_v0 = vpop.f32.mrf.mxu0 }
 0x6a6   :  { %4273 = vmatprep.subr.mxu0 %v7009_v36  ;;  %5919 = vmatprep.subr.mxu1 %v7817_v24  ;;  %v140_v41 = vsel %vm132_vm11, 1.0, %v7817_v24  ;;  %v7900_v36 = vld [vmem:[#allocation25_spill] sm:$0xff] }
 0x6a7   :  { %4274 = vmatpush1.msra.mxu0 %v7013_v37  ;;  %5920 = vmatpush3.msra.mxu1 %v7016_v38  ;;  %v7901_v37 = vld [vmem:[#allocation26_spill] sm:$0xff]  ;;  %v7902_v38 = vld [vmem:[#allocation27_spill] sm:$0xff] }
 0x6a8   :  { %4275 = vmatprep.subr.mxu0 %v7019_v25  ;;  %5921 = vmatprep.subr.mxu1 %v7817_v24  ;;  %v7903_v25 = vld [vmem:[#allocation28_spill] sm:$0xff] }
 0x6a9   :  { %4276 = vmatpush1.msra.mxu0 %v7023_v42  ;;  %5922 = vmatpush3.msra.mxu1 %v7026_v62  ;;  %v7904_v42 = vld [vmem:[#allocation29_spill] sm:$0xff]  ;;  %v7905_v62 = vld [vmem:[#allocation30_spill] sm:$0xff] }
 0x6aa   :  { %4277 = vmatprep.subr.mxu0 %v7029_v34  ;;  %5923 = vmatprep.subr.mxu1 %v7817_v24  ;;  %v7906_v34 = vld [vmem:[#allocation31_spill] sm:$0xff] }
 0x6ab   :  { %4278 = vmatpush1.msra.mxu0 %v7033_v26  ;;  %5924 = vmatpush3.msra.mxu1 %v7036_v31  ;;  %v7907_v26 = vld [vmem:[#allocation32_spill] sm:$0xff]  ;;  %v7908_v31 = vld [vmem:[#allocation33_spill] sm:$0xff] }
 0x6ac   :  { %4279 = vmatprep.subr.mxu0 %v7860_v58  ;;  %5925 = vmatprep.subr.mxu1 %v7817_v24  ;;  %v7909_v58 = vld [vmem:[#allocation34_spill] sm:$0xff] }
 0x6ad   :  { %4280 = vmatpush1.msra.mxu0 %v7861_v59  ;;  %5926 = vmatpush3.msra.mxu1 %v7862_v60  ;;  %v7910_v59 = vld [vmem:[#allocation35_spill] sm:$0xff]  ;;  %v7911_v60 = vld [vmem:[#allocation36_spill] sm:$0xff] }
 0x6ae   :  { %4281 = vmatprep.subr.mxu0 %v7863_v63  ;;  %5927 = vmatprep.subr.mxu1 %v7817_v24  ;;  %v7912_v63 = vld [vmem:[#allocation15_spill] sm:$0xff] }
 0x6af   :  { %4282 = vmatpush1.msra.mxu0 %v7865_v2  ;;  %5928 = vmatpush3.msra.mxu1 %v7866_v3  ;;  %v3704_v2 = vpop.f32.mrf.mxu0 }
 0x6b0   :  { %4283 = vmatprep.subr.mxu0 %v7867_v20  ;;  %5929 = vmatprep.subr.mxu1 %v7817_v24 }
 0x6b1   :  { %4284 = vmatpush1.msra.mxu0 %v7868_v30  ;;  %4317 = vmatprep.mubr.f32.mxu0 %v7817_v24 }
 0x6b2   :  { %5930 = vmatpush3.msra.mxu1 %v7899_v22  ;;  %5931 = vmatprep.mubr.msk.f32.mxu1 %vm6347_vm0, %v7817_v24 }
 0x6b3   :  { %5379 = vmatmul.mubr.msk.f32.vlgmr.msra.gmra.mxu0 %vm229_vm2, %v140_v41  ;;  %5932 = vmatmul.mubr.msk.f32.vlgmr.msra.gmra.mxu1 %vm229_vm2, %v140_v41 }
 0x6b4   :  { %4421 = vmatprep.subr.mxu0 %v7900_v36  ;;  %5934 = vmatprep.subr.mxu1 %v7817_v24 }
 0x6b5   :  { %4422 = vmatpush1.msra.mxu0 %v7901_v37  ;;  %5935 = vmatpush3.msra.mxu1 %v7902_v38 }
 0x6b6   :  { %4423 = vmatprep.subr.mxu0 %v7903_v25  ;;  %5936 = vmatprep.subr.mxu1 %v7817_v24 }
 0x6b7   :  { %4424 = vmatpush1.msra.mxu0 %v7904_v42  ;;  %5937 = vmatpush3.msra.mxu1 %v7905_v62 }
 0x6b8   :  { %4425 = vmatprep.subr.mxu0 %v7906_v34  ;;  %5938 = vmatprep.subr.mxu1 %v7817_v24 }
 0x6b9   :  { %4426 = vmatpush1.msra.mxu0 %v7907_v26  ;;  %5939 = vmatpush3.msra.mxu1 %v7908_v31 }
 0x6ba   :  { %4427 = vmatprep.subr.mxu0 %v7909_v58  ;;  %5940 = vmatprep.subr.mxu1 %v7817_v24 }
 0x6bb   :  { %4428 = vmatpush1.msra.mxu0 %v7910_v59  ;;  %5941 = vmatpush3.msra.mxu1 %v7911_v60 }
 0x6bc   :  { %4461 = vmatprep.mubr.f32.mxu0 %v7817_v24  ;;  %5942 = vmatprep.mubr.msk.f32.mxu1 %vm6347_vm0, %v7817_v24 }
 0x6bd   :  { %4584 = vmatprep.subr.mxu0 %v7912_v63  ;;  %5945 = vmatprep.subr.mxu1 %v7817_v24 }
 0x750   :  { %v3846_v3 = vpop.f32.mrf.mxu0  ;;  %v3917_v20 = vpop.f32.mrf.mxu1 }
 0x751   :  { %v3921_v30 = vadd.f32 %v3846_v3, %v3702_v0  ;;  %v3935_v58 = vadd.f32 %v7249_v15, %v3917_v20 }
 0x752   :  { %v5894_v39 = vpop.f32.mrf.mxu1  ;;  %v3848_v53 = vpop.f32.mrf.mxu0 }
 0x753   :  { %v5369_v19 = vmul.f32 -1.442695, %v3921_v30  ;;  %v3928_v27 = vadd.f32 %v3848_v53, %v3704_v2 }
 0x755   :  { %6122 = vpow2.f32 %v5369_v19  ;;  %v5370_v29 = vmul.f32 -1.442695, %v3928_v27 }
 0x757   :  { %6124 = vpow2.f32 %v5370_v29 }
 0x759   :  { %v4080_v28 = vpop.f32.mrf.mxu1  ;;  %v4009_v49 = vpop.f32.mrf.mxu0 }
 0x75a   :  { %v4010_v18 = vadd.f32 %v4009_v49, %v7838_v10 }
 0x75b   :  { %v5905_v44 = vpop.f32.mrf.mxu1  ;;  %v4011_v16 = vpop.f32.mrf.mxu0 }
 0x75c   :  { %v4012_v42 = vadd.f32 %v4011_v16, %v6809_v51 }
 0x762   :  { %v6123_v11 = vpop.eup %6122 }
 0x763   :  { %v3925_v40 = vadd.f32 1.0, %v6123_v11  ;;  %v4153_v41 = vpop.f32.mrf.mxu0  ;;  %v4224_v22 = vpop.f32.mrf.mxu1 }
 0x764   :  { %v4228_v36 = vadd.f32 %v4153_v41, %v4010_v18  ;;  %v6125_v34 = vpop.eup %6124  ;;  %v4242_v20 = vadd.f32 %v7425_v12, %v4224_v22  ;;  %v4081_v18 = vadd.f32 %v4080_v28, %v6819_v35 }
 0x765   :  { %6126 = vrcp.f32 %v3925_v40  ;;  %v5916_v37 = vpop.f32.mrf.mxu1  ;;  %v4155_v25 = vpop.f32.mrf.mxu0  ;;  %v3932_v31 = vadd.f32 1.0, %v6125_v34 }
 0x766   :  { %v5375_v38 = vmul.f32 -1.442695, %v4228_v36  ;;  %v4235_v62 = vadd.f32 %v4155_v25, %v4012_v42 }
 0x768   :  { %6128 = vpow2.f32 %v5375_v38  ;;  %v5376_v26 = vmul.f32 -1.442695, %v4235_v62 }
 0x76a   :  { %6130 = vpow2.f32 %v5376_v26 }
 0x76b   :  { %6132 = vrcp.f32 %v3932_v31 }
 0x772   :  { %v6127_v59 = vpop.eup %6126 }
 0x773   :  { %v3936_v60 = vmul.f32 %v6127_v59, %v3935_v58  ;;  %v7545_v0 = vpop.f32.mrf.mxu1 }
 0x775   :  { %v6129_v2 = vpop.eup %6128  ;;  %v3937_v3 = vadd.f32 %v3936_v60, %v7419_v48  ;;  %v5933_v30 = vpop.f32.mrf.mxu1 }
 0x776   :  { %v4232_v39 = vadd.f32 1.0, %v6129_v2 }
 0x777   :  { %6134 = vtanh.f32 %v3937_v3  ;;  %v6131_v19 = vpop.eup %6130 }
 0x778   :  { %6136 = vrcp.f32 %v4232_v39  ;;  %v6133_v53 = vpop.eup %6132  ;;  %v4239_v27 = vadd.f32 1.0, %v6131_v19 }
 0x779   :  { %v3939_v29 = vsub.f32 1.0, %v6133_v53  ;;  %v3941_v11 = vmul.f32 %v6133_v53, %v7430_v52 }
 0x77a   :  { %6138 = vrcp.f32 %v4239_v27 }
 0x784   :  { %v6135_v44 = vpop.eup %6134 }
 0x785   :  { %v6137_v49 = vpop.eup %6136  ;;  %v3940_v16 = vmul.f32 %v6135_v44, %v3939_v29 }
 0x786   :  { %v4243_v40 = vmul.f32 %v6137_v49, %v4242_v20 }
 0x787   :  { %v7551_v48 = vadd.f32 %v3941_v11, %v3940_v16  ;;  %v6139_v52 = vpop.eup %6138 }
 0x788   :  { %v4244_v41 = vadd.f32 %v4243_v40, %v4081_v18  ;;  %v4246_v28 = vsub.f32 1.0, %v6139_v52  ;;  %v4248_v37 = vmul.f32 %v6139_v52, %v7474_v8 }
 0x789   :  { %5382 = vmatmul.mubr.msk.f32.vlgmr.msra.gmra.mxu0 %vm384_vm5, %v7551_v48  ;;  %5943 = vmatmul.mubr.msk.f32.vlgmr.msra.gmra.mxu1 %vm384_vm5, %v7551_v48 }
 0x78a   :  { %6140 = vtanh.f32 %v4244_v41  ;;  %4585 = vmatpush1.msra.mxu0 %v7264_v45  ;;  %5946 = vmatpush3.msra.mxu1 %v7267_v23 }
 0x78b   :  { %4586 = vmatprep.subr.mxu0 %v7270_v1  ;;  %5947 = vmatprep.subr.mxu1 %v7817_v24 }
 0x78c   :  { %4587 = vmatpush1.msra.mxu0 %v7274_v13  ;;  %5948 = vmatpush3.msra.mxu1 %v7277_v56 }
 0x78d   :  { %4588 = vmatprep.subr.mxu0 %v7280_v54  ;;  %5949 = vmatprep.subr.mxu1 %v7817_v24 }
 0x78e   :  { %4589 = vmatpush1.msra.mxu0 %v7284_v9  ;;  %5950 = vmatpush3.msra.mxu1 %v7287_v55 }
 0x78f   :  { %4590 = vmatprep.subr.mxu0 %v7290_v50  ;;  %5951 = vmatprep.subr.mxu1 %v7817_v24 }
 0x790   :  { %4591 = vmatpush1.msra.mxu0 %v7294_v61  ;;  %4624 = vmatprep.mubr.f32.mxu0 %v7817_v24 }
 0x791   :  { %5952 = vmatpush3.msra.mxu1 %v7298_v33  ;;  %5953 = vmatprep.mubr.msk.f32.mxu1 %vm6347_vm0, %v7817_v24 }
 0x792   :  { %5386 = vmatmul.mubr.msk.f32.vlgmr.msra.gmra.mxu0 %vm384_vm5, %v7551_v48  ;;  %5954 = vmatmul.mubr.msk.f32.vlgmr.msra.gmra.mxu1 %vm384_vm5, %v7551_v48 }
 0x793   :  { %4728 = vmatprep.subr.mxu0 %v7891_v4  ;;  %5956 = vmatprep.subr.mxu1 %v7817_v24 }
 0x794   :  { %4729 = vmatpush1.msra.mxu0 %v7892_v6  ;;  %5957 = vmatpush3.msra.mxu1 %v7893_v46 }
 0x795   :  { %4730 = vmatprep.subr.mxu0 %v7894_v47  ;;  %5958 = vmatprep.subr.mxu1 %v7817_v24 }
 0x796   :  { %4731 = vmatpush1.msra.mxu0 %v7895_v43  ;;  %5959 = vmatpush3.msra.mxu1 %v7896_v5 }
 0x797   :  { %v6141_v22 = vpop.eup %6140  ;;  %4732 = vmatprep.subr.mxu0 %v7897_v14  ;;  %5960 = vmatprep.subr.mxu1 %v7817_v24 }
 0x798   :  { %4733 = vmatpush1.msra.mxu0 %v7898_v57  ;;  %5961 = vmatpush3.msra.mxu1 %v7334_v21  ;;  %v4247_v36 = vmul.f32 %v6141_v22, %v4246_v28 }
 0x799   :  { %4734 = vmatprep.subr.mxu0 %v7338_v17  ;;  %5962 = vmatprep.subr.mxu1 %v7817_v24 }
 0x79a   :  { %4735 = vmatpush1.msra.mxu0 %v7342_v32  ;;  %4768 = vmatprep.mubr.f32.mxu0 %v7817_v24  ;;  %v7595_v38 = vadd.f32 %v4248_v37, %v4247_v36 }
 0x79b   :  { %5963 = vmatpush3.msra.mxu1 %v7348_v7  ;;  %5964 = vmatprep.mubr.msk.f32.mxu1 %vm6347_vm0, %v7817_v24 }
 0x79c   :  { %5388 = vmatmul.mubr.msk.f32.vlgmr.msra.gmra.mxu0 %vm384_vm5, %v7595_v38  ;;  %5965 = vmatmul.mubr.msk.f32.vlgmr.msra.gmra.mxu1 %vm384_vm5, %v7595_v38 }
 0x79d   :  { %4894 = vmatprep.subr.mxu0 %v7912_v63  ;;  %5967 = vmatprep.subr.mxu1 %v7817_v24 }
 0x79e   :  { %4895 = vmatpush1.msra.mxu0 %v7264_v45  ;;  %5968 = vmatpush3.msra.mxu1 %v7267_v23  ;;  %v4319_v45 = vpop.f32.mrf.mxu0 }
 0x79f   :  { %4896 = vmatprep.subr.mxu0 %v7270_v1  ;;  %5969 = vmatprep.subr.mxu1 %v7817_v24 }
 0x7a0   :  { %4897 = vmatpush1.msra.mxu0 %v7274_v13  ;;  %5970 = vmatpush3.msra.mxu1 %v7277_v56  ;;  %v4321_v23 = vpop.f32.mrf.mxu0 }
 0x7a1   :  { %4898 = vmatprep.subr.mxu0 %v7280_v54  ;;  %5971 = vmatprep.subr.mxu1 %v7817_v24 }
 0x7a2   :  { %4899 = vmatpush1.msra.mxu0 %v7284_v9  ;;  %5972 = vmatpush3.msra.mxu1 %v7287_v55 }
 0x7a3   :  { %4900 = vmatprep.subr.mxu0 %v7290_v50  ;;  %5973 = vmatprep.subr.mxu1 %v7817_v24 }
 0x7a4   :  { %4901 = vmatpush1.msra.mxu0 %v7294_v61  ;;  %4934 = vmatprep.mubr.f32.mxu0 %v7817_v24 }
 0x7a5   :  { %5974 = vmatpush3.msra.mxu1 %v7298_v33  ;;  %5975 = vmatprep.mubr.msk.f32.mxu1 %vm6347_vm0, %v7817_v24 }
 0x7a6   :  { %5038 = vmatprep.subr.mxu0 %v7891_v4  ;;  %5978 = vmatprep.subr.mxu1 %v7817_v24 }
 0x849   :  { %v4463_v1 = vpop.f32.mrf.mxu0  ;;  %v4534_v13 = vpop.f32.mrf.mxu1 }
 0x84a   :  { %v4538_v56 = vadd.f32 %v4463_v1, %v4319_v45  ;;  %v4552_v53 = vadd.f32 %v7249_v15, %v4534_v13 }
 0x84b   :  { %v5944_v54 = vpop.f32.mrf.mxu1  ;;  %v4465_v55 = vpop.f32.mrf.mxu0 }
 0x84c   :  { %v5384_v9 = vmul.f32 -1.442695, %v4538_v56  ;;  %v4545_v50 = vadd.f32 %v4465_v55, %v4321_v23 }
 0x84e   :  { %6142 = vpow2.f32 %v5384_v9  ;;  %v5385_v8 = vmul.f32 -1.442695, %v4545_v50 }
 0x850   :  { %6144 = vpow2.f32 %v5385_v8 }
 0x852   :  { %v4697_v61 = vpop.f32.mrf.mxu1  ;;  %v4626_v63 = vpop.f32.mrf.mxu0 }
 0x853   :  { %v4627_v4 = vadd.f32 %v4626_v63, %v7838_v10  ;;  %v4698_v36 = vadd.f32 %v4697_v61, %v6819_v35 }
 0x854   :  { %v5955_v33 = vpop.f32.mrf.mxu1  ;;  %v4628_v25 = vpop.f32.mrf.mxu0 }
 0x855   :  { %v4629_v2 = vadd.f32 %v4628_v25, %v6809_v51 }
 0x85b   :  { %v6143_v42 = vpop.eup %6142 }
 0x85c   :  { %v4542_v62 = vadd.f32 1.0, %v6143_v42  ;;  %v4770_v34 = vpop.f32.mrf.mxu0  ;;  %v4841_v26 = vpop.f32.mrf.mxu1 }
 0x85d   :  { %v4845_v31 = vadd.f32 %v4770_v34, %v4627_v4  ;;  %v6145_v30 = vpop.eup %6144  ;;  %v4859_v52 = vadd.f32 %v7425_v12, %v4841_v26 }
 0x85e   :  { %6146 = vrcp.f32 %v4542_v62  ;;  %v5966_v58 = vpop.f32.mrf.mxu1  ;;  %v4772_v60 = vpop.f32.mrf.mxu0  ;;  %v4549_v19 = vadd.f32 1.0, %v6145_v30 }
 0x85f   :  { %v5390_v59 = vmul.f32 -1.442695, %v4845_v31  ;;  %v4852_v3 = vadd.f32 %v4772_v60, %v4629_v2 }
 0x861   :  { %6148 = vpow2.f32 %v5390_v59  ;;  %v5391_v39 = vmul.f32 -1.442695, %v4852_v3  ;;  %v5398_v3 = vld [vmem:[%s7692_s9] ss:$0 sm:$0xff] }
 0x863   :  { %6150 = vpow2.f32 %v5391_v39 }
 0x864   :  { %6152 = vrcp.f32 %v4549_v19 }
 0x86b   :  { %v6147_v27 = vpop.eup %6146 }
 0x86c   :  { %v4553_v29 = vmul.f32 %v6147_v27, %v4552_v53 }
 0x86e   :  { %v6149_v44 = vpop.eup %6148  ;;  %v4554_v20 = vadd.f32 %v4553_v29, %v7545_v0 }
 0x86f   :  { %v4849_v49 = vadd.f32 1.0, %v6149_v44 }
 0x870   :  { %6154 = vtanh.f32 %v4554_v20  ;;  %v6151_v16 = vpop.eup %6150 }
 0x871   :  { %6156 = vrcp.f32 %v4849_v49  ;;  %v6153_v11 = vpop.eup %6152  ;;  %v4856_v18 = vadd.f32 1.0, %v6151_v16 }
 0x872   :  { %v4556_v40 = vsub.f32 1.0, %v6153_v11  ;;  %v4558_v15 = vmul.f32 %v6153_v11, %v7551_v48 }
 0x873   :  { %6158 = vrcp.f32 %v4856_v18 }
 0x87d   :  { %v6155_v41 = vpop.eup %6154 }
 0x87e   :  { %v6157_v28 = vpop.eup %6156  ;;  %v4557_v22 = vmul.f32 %v6155_v41, %v4556_v40 }
 0x87f   :  { %v4860_v37 = vmul.f32 %v6157_v28, %v4859_v52 }
 0x880   :  { %v4559_v45 = vadd.f32 %v4558_v15, %v4557_v22 }
 0x881   :  { %v4861_v0 = vadd.f32 %v4860_v37, %v4698_v36 }
 0x882   :  { %5392 = vmatmul.mubr.msk.f32.vlgmr.msra.gmra.mxu0 %vm384_vm5, %v4559_v45  ;;  %5976 = vmatmul.mubr.msk.f32.vlgmr.msra.gmra.mxu1 %vm384_vm5, %v4559_v45 }
 0x883   :  { %6160 = vtanh.f32 %v4861_v0  ;;  %5039 = vmatpush1.msra.mxu0 %v7892_v6  ;;  %5979 = vmatpush3.msra.mxu1 %v7893_v46  ;;  %v6159_v6 = vpop.eup %6158 }
 0x884   :  { %5040 = vmatprep.subr.mxu0 %v7894_v47  ;;  %5980 = vmatprep.subr.mxu1 %v7817_v24  ;;  %v4863_v46 = vsub.f32 1.0, %v6159_v6 }
 0x885   :  { %5041 = vmatpush1.msra.mxu0 %v7895_v43  ;;  %5981 = vmatpush3.msra.mxu1 %v7896_v5  ;;  %v5178_v5 = vld [vmem:[%s7691_s8 + $0x8] sm:$0xff] }
 0x886   :  { %5042 = vmatprep.subr.mxu0 %v7897_v14  ;;  %5982 = vmatprep.subr.mxu1 %v7817_v24  ;;  %v5177_v14 = vld [vmem:[%s7691_s8] sm:$0xff] }
 0x887   :  { %5043 = vmatpush1.msra.mxu0 %v7898_v57  ;;  %5983 = vmatpush3.msra.mxu1 %v7334_v21  ;;  %v4865_v21 = vmul.f32 %v6159_v6, %v7595_v38 }
 0x888   :  { %5044 = vmatprep.subr.mxu0 %v7338_v17  ;;  %5984 = vmatprep.subr.mxu1 %v7817_v24 }
 0x889   :  { %5045 = vmatpush1.msra.mxu0 %v7342_v32  ;;  %5078 = vmatprep.mubr.f32.mxu0 %v7817_v24  ;;  %v5179_v32 = vld [vmem:[%s7691_s8 + $0x10] sm:$0xff] }
 0x88a   :  { %5985 = vmatpush3.msra.mxu1 %v7348_v7  ;;  %5986 = vmatprep.mubr.msk.f32.mxu1 %vm6347_vm0, %v7817_v24  ;;  %v5180_v7 = vld [vmem:[%s7691_s8 + $0x18] sm:$0xff] }
 0x88b   :  { %5989 = vmatprep.subr.mxu0 %v7817_v24 }
 0x890   :  { %v6161_v47 = vpop.eup %6160 }
 0x891   :  { %v4864_v43 = vmul.f32 %v6161_v47, %v4863_v46 }
 0x893   :  { %v4866_v17 = vadd.f32 %v4865_v21, %v4864_v43 }
 0x895   :  { %5394 = vmatmul.mubr.msk.f32.vlgmr.msra.gmra.mxu0 %vm384_vm5, %v4866_v17  ;;  %5987 = vmatmul.mubr.msk.f32.vlgmr.msra.gmra.mxu1 %vm384_vm5, %v4866_v17 }
 0x896   :  { %5997 = vmatprep.mubr.msk.f32.mxu0 %vm6347_vm0, %v7817_v24  ;;  %5990 = vmatpush3.msra.mxu0 %v5180_v7 }
 0x897   :  { %5991 = vmatprep.subr.mxu0 %v7817_v24 }
 0x898   :  { %5992 = vmatpush3.msra.mxu0 %v5179_v32 }
 0x899   :  { %5993 = vmatprep.subr.mxu0 %v7817_v24 }
 0x89a   :  { %5994 = vmatpush3.msra.mxu0 %v5178_v5 }
 0x89b   :  { %5995 = vmatprep.subr.mxu0 %v7817_v24 }
 0x89c   :  { %5996 = vmatpush3.msra.mxu0 %v5177_v14 }
 0x942   :  { %v5007_v57 = vpop.f32.mrf.mxu1  ;;  %v4936_v38 = vpop.f32.mrf.mxu0 }
 0x943   :  { %v4937_v1 = vadd.f32 %v4936_v38, %v7838_v10  ;;  %v5008_v62 = vadd.f32 %v5007_v57, %v6819_v35 }
 0x944   :  { %v5977_v48 = vpop.f32.mrf.mxu1  ;;  %v4938_v23 = vpop.f32.mrf.mxu0 }
 0x945   :  { %v4939_v61 = vadd.f32 %v4938_v23, %v6809_v51 }
 0x955   :  { %v5080_v13 = vpop.f32.mrf.mxu0  ;;  %v5151_v56 = vpop.f32.mrf.mxu1 }
 0x956   :  { %v5155_v54 = vadd.f32 %v5080_v13, %v4937_v1  ;;  %v5169_v4 = vadd.f32 %v7425_v12, %v5151_v56 }
 0x957   :  { %v5988_v9 = vpop.f32.mrf.mxu1  ;;  %v5082_v50 = vpop.f32.mrf.mxu0 }
 0x958   :  { %v5396_v55 = vmul.f32 -1.442695, %v5155_v54  ;;  %v5162_v8 = vadd.f32 %v5082_v50, %v4939_v61 }
 0x95a   :  { %6162 = vpow2.f32 %v5396_v55  ;;  %v5397_v33 = vmul.f32 -1.442695, %v5162_v8 }
 0x95c   :  { %6164 = vpow2.f32 %v5397_v33 }
 0x967   :  { %v6163_v24 = vpop.eup %6162 }
 0x968   :  { %v5159_v63 = vadd.f32 1.0, %v6163_v24 }
 0x969   :  { %v6165_v25 = vpop.eup %6164 }
 0x96a   :  { %6166 = vrcp.f32 %v5159_v63  ;;  %v5166_v42 = vadd.f32 1.0, %v6165_v25 }
 0x96c   :  { %6168 = vrcp.f32 %v5166_v42 }
 0x977   :  { %v6167_v10 = vpop.eup %6166 }
 0x978   :  { %v5170_v34 = vmul.f32 %v6167_v10, %v5169_v4 }
 0x979   :  { %v6169_v31 = vpop.eup %6168 }
 0x97a   :  { %v5171_v26 = vadd.f32 %v5170_v34, %v5008_v62  ;;  %v5173_v51 = vsub.f32 1.0, %v6169_v31  ;;  %v5175_v60 = vmul.f32 %v6169_v31, %v4866_v17 }
 0x97c   :  { %6170 = vtanh.f32 %v5171_v26 }
 0x989   :  { %v6171_v58 = vpop.eup %6170 }
 0x98a   :  { %v5174_v59 = vmul.f32 %v6171_v58, %v5173_v51 }
 0x98c   :  { %v5176_v2 = vadd.f32 %v5175_v60, %v5174_v59 }
 0x98e   :  { %5998 = vmatmul.mubr.msk.f32.vlgmr.msra.gmra.mxu0 %vm384_vm5, %v5176_v2 }
 0xa4e   :  { %v5257_v12 = vpop.f32.mrf.mxu0 }
 0xa4f   :  { %v5258_v35 = vadd.f32 %v5398_v3, %v5257_v12 }
 0xa50   :  { %v5999_v30 = vpop.f32.mrf.mxu0 }
 0xa51   :  { %5262 = vst.msk [vmem:[#allocation10] sm:$0x3] %vm5261_vm12, %v5258_v35 }
 0xa52   :  { %6322 = shalt.err (!%p6319_p10)
}
 0xa53   :  { %5272 = dma.vmem_to_hbm [thread:$0]  %s5270_s19, 32, %s7693_s10, [#allocation4]  }
 0xa54   :  { %6337 = dma.done.wait [#allocation4], 32  }
 0xa55   :  { %6338 = vsyncadd [#allocation4], 4294967264 }
 0xa56   :  { %5276 = vsyncpa [#allocation3], 1 }
 0xa57   :  { %5277 = vsyncpa [#allocation6], 1 }
 0xa58   :  { %5278 = vsyncpa [#allocation9], 1 }
 0xa59   :  { %5279 = vsyncpa [#allocation4], 1 }

</bundles_post_ra>
